<compile_context>
chip_gen: v6e
topology: v6e:2x2x1
jax: 0.10.0
libtpu: 0.0.40
codegen_flags: <defaults>
</compile_context>

<pallas_src>
import functools
import math

import jax
import jax.numpy as jnp
import numpy as np
from jax.experimental import pallas as pl
from jax.experimental.pallas import tpu as pltpu

# Full-f32 matmul passes so the autodiff reference check is tight.
jax.config.update("jax_default_matmul_precision", "highest")

_SQRT_HALF = 0.7071067811865476       # 1/sqrt(2)
_INV_SQRT_2PI = 0.3989422804014327    # 1/sqrt(2*pi)
_LN_EPS = 1e-5                        # torch.nn.LayerNorm default eps
_LANE = 128


def _erf_approx(x):
    # Abramowitz & Stegun 7.1.26 (max abs err ~1.5e-7): reproduces PyTorch's
    # exact (erf-based) GELU to within f32 precision inside the kernel.
    p = 0.3275911
    a1, a2, a3, a4, a5 = (0.254829592, -0.284496736, 1.421413741,
                          -1.453152027, 1.061405429)
    s = jnp.where(x >= 0.0, 1.0, -1.0)
    ax = jnp.abs(x)
    t = 1.0 / (1.0 + p * ax)
    poly = ((((a5 * t + a4) * t + a3) * t + a2) * t + a1) * t
    return s * (1.0 - poly * jnp.exp(-ax * ax))


def _dyn_encoder_kernel(x_ref, w0t_ref, b0_ref, wst_ref, bs_ref,
                        w0_ref, ws_ref, we0_ref, wlvt_ref, blv_ref,
                        mu_ref, lv_ref, *, inv_h):
    """One batch tile: forward MLP + analytic input-gradient backward.

    Feature dims are lane-padded; LayerNorm statistics divide by the *real*
    h_dim (inv_h).  Padded lanes of every pre-norm activation are exactly zero
    (weights are zero-padded in both dims), so summing over the full padded
    lane width is correct, and any pollution of padded lanes downstream is
    annihilated by the zero-padded weight rows of the next matmul.
    """
    num_seq = wst_ref.shape[0]                 # num_h_layers - 1 (static)
    x = x_ref[...]

    fwd_w = [w0t_ref[...]] + [wst_ref[i] for i in range(num_seq)]   # (in, out)
    fwd_b = [b0_ref[...]] + [bs_ref[i] for i in range(num_seq)]
    bwd_w = [w0_ref[...]] + [ws_ref[i] for i in range(num_seq)]     # (out, in)

    # ---- forward pass (save y, inv-std, GELU CDF for the backward pass)
    ys, invs, cdfs = [], [], []
    h = x
    for wt, b in zip(fwd_w, fwd_b):
        a = jnp.dot(h, wt, preferred_element_type=jnp.float32) + b   # Linear
        # One-pass LayerNorm stats over the real h_dim features.
        mean = jnp.sum(a, axis=-1, keepdims=True) * inv_h
        mean_sq = jnp.sum(a * a, axis=-1, keepdims=True) * inv_h
        var = mean_sq - mean * mean
        inv = jax.lax.rsqrt(var + _LN_EPS)
        y = (a - mean) * inv
        cdf = 0.5 * (1.0 + _erf_approx(y * _SQRT_HALF))               # Phi(y)
        ys.append(y)
        invs.append(inv)
        cdfs.append(cdf)
        h = y * cdf                                                   # GELU (exact)

    # ---- logvar head: post_h @ W_lv^T + b_lv
    lv_ref[...] = (jnp.dot(h, wlvt_ref[...], preferred_element_type=jnp.float32)
                   + blv_ref[...])

    # ---- mu = d(sum_b e_b)/dx  (grad_outputs = ones)
    # e_b = sum_j post_h[b, j] * W_e[0, j] + b_e[0]  =>  seed grad = W_e[0, :].
    g = jnp.broadcast_to(we0_ref[...], h.shape)
    for w, y, inv, cdf in zip(reversed(bwd_w), reversed(ys),
                              reversed(invs), reversed(cdfs)):
        pdf = _INV_SQRT_2PI * jnp.exp(-0.5 * y * y)
        g = g * (cdf + y * pdf)                               # GELU' (reuse CDF)
        gm = jnp.sum(g, axis=-1, keepdims=True) * inv_h       # LayerNorm backward
        gym = jnp.sum(g * y, axis=-1, keepdims=True) * inv_h
        g = inv * (g - gm - y * gym)
        # Linear backward w.r.t. input: g @ W with W in natural (out, in)
        # layout -> plain MXU matmul, no transpose needed.
        g = jnp.dot(g, w, preferred_element_type=jnp.float32)
    mu_ref[...] = g


def _round_up(n, m):
    return ((n + m - 1) // m) * m


def _resident_spec(shape):
    nd = len(shape)
    return pl.BlockSpec(shape, lambda i, _nd=nd: (0,) * _nd)


def dyn_encoder_forward(x, raw, *, block_batch=128):
    """Returns (mu, logvar), matching DynEncoder.forward."""
    B, x_dim = x.shape
    lin_ws, lin_bs = raw["lin_ws"], raw["lin_bs"]
    we, wlv, blv = raw["we"], raw["wlv"], raw["blv"]
    h_dim = lin_ws[0].shape[0]
    z_dim = wlv.shape[0]
    num_seq = len(lin_ws) - 1

    # ---- pad feature dims to the 128-lane width, batch to the tile size.
    xp = _round_up(x_dim, _LANE)
    hp = _round_up(h_dim, _LANE)
    zp = _round_up(z_dim, _LANE)
    TB = _round_up(min(block_batch, _round_up(B, 8)), 8)
    Bp = _round_up(B, TB)

    def pad2(a, r, c):
        return jnp.pad(a, ((0, r - a.shape[0]), (0, c - a.shape[1])))

    x_p = pad2(x, Bp, xp)
    # forward (transposed, in x out) and backward (natural, out x in) layouts
    w0_t = pad2(lin_ws[0].T, xp, hp)
    w0_n = pad2(lin_ws[0], hp, xp)
    b0 = pad2(lin_bs[0].reshape(1, h_dim), 1, hp)
    if num_seq > 0:
        wseq_t = jnp.stack([pad2(w.T, hp, hp) for w in lin_ws[1:]])
        wseq_n = jnp.stack([pad2(w, hp, hp) for w in lin_ws[1:]])
        bseq = jnp.stack([pad2(b.reshape(1, h_dim), 1, hp) for b in lin_bs[1:]])
    else:
        wseq_t = jnp.zeros((0, hp, hp), jnp.float32)
        wseq_n = jnp.zeros((0, hp, hp), jnp.float32)
        bseq = jnp.zeros((0, 1, hp), jnp.float32)
    we0 = pad2(we[0:1, :], 1, hp)
    wlv_t = pad2(wlv.T, hp, zp)
    blv_p = pad2(blv.reshape(1, z_dim), 1, zp)

    args = (x_p, w0_t, b0, wseq_t, bseq, w0_n, wseq_n, we0, wlv_t, blv_p)

    # ---- VMEM budget (weights x2 double-buffer + io tiles x2 + activations).
    weight_elems = sum(int(a.size) for a in args[1:])
    io_elems = TB * (2 * xp + zp)
    act_elems = (num_seq + 1) * TB * hp * 4 + 4 * TB * hp
    est_bytes = 4 * (2 * weight_elems + 2 * io_elems + act_elems)
    vmem_limit = int(min(max(2 * est_bytes, 16 * 1024 * 1024),
                         60 * 1024 * 1024))        # fits v7x 64 MiB physical

    grid = (Bp // TB,)
    in_specs = [pl.BlockSpec((TB, xp), lambda i: (i, 0))] + \
               [_resident_spec(a.shape) for a in args[1:]]
    out_specs = (pl.BlockSpec((TB, xp), lambda i: (i, 0)),
                 pl.BlockSpec((TB, zp), lambda i: (i, 0)))

    mu_p, lv_p = pl.pallas_call(
        functools.partial(_dyn_encoder_kernel, inv_h=float(1.0 / h_dim)),
        out_shape=(jax.ShapeDtypeStruct((Bp, xp), jnp.float32),
                   jax.ShapeDtypeStruct((Bp, zp), jnp.float32)),
        grid=grid,
        in_specs=in_specs,
        out_specs=out_specs,
        compiler_params=pltpu.CompilerParams(
            dimension_semantics=("parallel",),      # megacore-shard batch tiles
            vmem_limit_bytes=vmem_limit),
    )(*args)

    return mu_p[:B, :x_dim], lv_p[:B, :z_dim]


def init_params(key, num_h_layers, x_dim, h_dim, z_dim):
    """Deterministic torch.nn.Linear-style init (U(-1/sqrt(fan_in), +))."""
    assert num_h_layers >= 2

    def linear(k, fan_in, fan_out):
        k1, k2 = jax.random.split(k)
        bound = 1.0 / math.sqrt(fan_in)
        w = jax.random.uniform(k1, (fan_out, fan_in), jnp.float32, -bound, bound)
        b = jax.random.uniform(k2, (fan_out,), jnp.float32, -bound, bound)
        return w, b

    keys = jax.random.split(key, num_h_layers + 2)
    w0, b0 = linear(keys[0], x_dim, h_dim)
    seq_ws, seq_bs = [], []
    for i in range(num_h_layers - 1):
        w, b = linear(keys[1 + i], h_dim, h_dim)
        seq_ws.append(w)
        seq_bs.append(b)
    we, be = linear(keys[num_h_layers], h_dim, 2)
    wlv, blv = linear(keys[num_h_layers + 1], h_dim, z_dim)

    raw = {
        "lin_ws": [w0] + seq_ws, "lin_bs": [b0] + seq_bs,
        "we": we, "be": be, "wlv": wlv, "blv": blv,
    }
    return raw


def ref_dyn_encoder(x, raw):
    """Pure-JAX reference using autodiff (mirrors torch.autograd.grad)."""
    def energy(xx):
        h = xx
        for w, b in zip(raw["lin_ws"], raw["lin_bs"]):
            a = h @ w.T + b
            mean = a.mean(-1, keepdims=True)
            var = ((a - mean) ** 2).mean(-1, keepdims=True)
            y = (a - mean) / jnp.sqrt(var + _LN_EPS)
            h = 0.5 * y * (1.0 + jax.scipy.special.erf(y * _SQRT_HALF))
        e = (h @ raw["we"].T + raw["be"])[:, 0]
        logvar = h @ raw["wlv"].T + raw["blv"]
        return e, logvar

    def e_sum(xx):
        e, lv = energy(xx)
        return e.sum(), lv

    mu, logvar = jax.grad(e_sum, has_aux=True)(x)
    return mu, logvar


if __name__ == "__main__":
    B, x_dim, h_dim, z_dim, num_h_layers = 16, 16, 32, 8, 3

    key = jax.random.PRNGKey(0)
    kx, kp = jax.random.split(key)
    x = jax.random.normal(kx, (B, x_dim), dtype=jnp.float32)
    raw = init_params(kp, num_h_layers, x_dim, h_dim, z_dim)

    # block_batch=8 exercises a multi-step batch grid at these toy sizes;
    # at real sizes use the default (128) or larger.
    mu, logvar = dyn_encoder_forward(x, raw, block_batch=8)
    jax.block_until_ready((mu, logvar))

    mu_ref, lv_ref = ref_dyn_encoder(x, raw)
    np.testing.assert_allclose(np.asarray(mu), np.asarray(mu_ref),
                               rtol=1e-3, atol=1e-4)
    np.testing.assert_allclose(np.asarray(logvar), np.asarray(lv_ref),
                               rtol=1e-3, atol=1e-4)
    print("KERNEL_OK")
</pallas_src>

<mosaic_0001>
module attributes {stable_mosaic.version = 11 : i64} {
  func.func @_dyn_encoder_kernel(%arg0: i32, %arg1: memref<8x128xf32, #tpu.memory_space<vmem>>, %arg2: memref<128x128xf32, #tpu.memory_space<vmem>>, %arg3: memref<1x128xf32, #tpu.memory_space<vmem>>, %arg4: memref<2x128x128xf32, #tpu.memory_space<vmem>>, %arg5: memref<2x1x128xf32, #tpu.memory_space<vmem>>, %arg6: memref<128x128xf32, #tpu.memory_space<vmem>>, %arg7: memref<2x128x128xf32, #tpu.memory_space<vmem>>, %arg8: memref<1x128xf32, #tpu.memory_space<vmem>>, %arg9: memref<128x128xf32, #tpu.memory_space<vmem>>, %arg10: memref<1x128xf32, #tpu.memory_space<vmem>>, %arg11: memref<8x128xf32, #tpu.memory_space<vmem>>, %arg12: memref<8x128xf32, #tpu.memory_space<vmem>>) attributes {dimension_semantics = [#tpu.dimension_semantics<parallel>], iteration_bounds = array<i64: 2>, scalar_prefetch = 0 : i64, scratch_operands = 0 : i64, tpu.core_type = #tpu.core_type<tc>, window_params = [{transform_indices = @transform_0, window_bounds = array<i64: 8, 128>}, {pipeline_mode = #tpu.pipeline_mode<synchronous>, transform_indices = @transform_1, window_bounds = array<i64: 128, 128>}, {pipeline_mode = #tpu.pipeline_mode<synchronous>, transform_indices = @transform_2, window_bounds = array<i64: 1, 128>}, {pipeline_mode = #tpu.pipeline_mode<synchronous>, transform_indices = @transform_3, window_bounds = array<i64: 2, 128, 128>}, {pipeline_mode = #tpu.pipeline_mode<synchronous>, transform_indices = @transform_4, window_bounds = array<i64: 2, 1, 128>}, {pipeline_mode = #tpu.pipeline_mode<synchronous>, transform_indices = @transform_5, window_bounds = array<i64: 128, 128>}, {pipeline_mode = #tpu.pipeline_mode<synchronous>, transform_indices = @transform_6, window_bounds = array<i64: 2, 128, 128>}, {pipeline_mode = #tpu.pipeline_mode<synchronous>, transform_indices = @transform_7, window_bounds = array<i64: 1, 128>}, {pipeline_mode = #tpu.pipeline_mode<synchronous>, transform_indices = @transform_8, window_bounds = array<i64: 128, 128>}, {pipeline_mode = #tpu.pipeline_mode<synchronous>, transform_indices = @transform_9, window_bounds = array<i64: 1, 128>}, {transform_indices = @transform_10, window_bounds = array<i64: 8, 128>}, {transform_indices = @transform_11, window_bounds = array<i64: 8, 128>}]} {
    %c0 = arith.constant 0 : index
    %c0_0 = arith.constant 0 : index
    %0 = vector.load %arg1[%c0, %c0_0] : memref<8x128xf32, #tpu.memory_space<vmem>>, vector<8x128xf32>
    %c0_1 = arith.constant 0 : index
    %c0_2 = arith.constant 0 : index
    %1 = vector.load %arg2[%c0_1, %c0_2] : memref<128x128xf32, #tpu.memory_space<vmem>>, vector<128x128xf32>
    %c0_3 = arith.constant 0 : index
    %c0_4 = arith.constant 0 : index
    %c0_5 = arith.constant 0 : index
    %2 = vector.load %arg4[%c0_3, %c0_4, %c0_5] : memref<2x128x128xf32, #tpu.memory_space<vmem>>, vector<1x128x128xf32>
    %3 = vector.shape_cast %2 : vector<1x128x128xf32> to vector<128x128xf32>
    %c1 = arith.constant 1 : index
    %c0_6 = arith.constant 0 : index
    %c0_7 = arith.constant 0 : index
    %4 = vector.load %arg4[%c1, %c0_6, %c0_7] : memref<2x128x128xf32, #tpu.memory_space<vmem>>, vector<1x128x128xf32>
    %5 = vector.shape_cast %4 : vector<1x128x128xf32> to vector<128x128xf32>
    %c0_8 = arith.constant 0 : index
    %c0_9 = arith.constant 0 : index
    %6 = vector.load %arg3[%c0_8, %c0_9] : memref<1x128xf32, #tpu.memory_space<vmem>>, vector<1x128xf32>
    %c0_10 = arith.constant 0 : index
    %c0_11 = arith.constant 0 : index
    %c0_12 = arith.constant 0 : index
    %7 = vector.load %arg5[%c0_10, %c0_11, %c0_12] : memref<2x1x128xf32, #tpu.memory_space<vmem>>, vector<1x1x128xf32>
    %8 = vector.shape_cast %7 : vector<1x1x128xf32> to vector<1x128xf32>
    %c1_13 = arith.constant 1 : index
    %c0_14 = arith.constant 0 : index
    %c0_15 = arith.constant 0 : index
    %9 = vector.load %arg5[%c1_13, %c0_14, %c0_15] : memref<2x1x128xf32, #tpu.memory_space<vmem>>, vector<1x1x128xf32>
    %10 = vector.shape_cast %9 : vector<1x1x128xf32> to vector<1x128xf32>
    %c0_16 = arith.constant 0 : index
    %c0_17 = arith.constant 0 : index
    %11 = vector.load %arg6[%c0_16, %c0_17] : memref<128x128xf32, #tpu.memory_space<vmem>>, vector<128x128xf32>
    %c0_18 = arith.constant 0 : index
    %c0_19 = arith.constant 0 : index
    %c0_20 = arith.constant 0 : index
    %12 = vector.load %arg7[%c0_18, %c0_19, %c0_20] : memref<2x128x128xf32, #tpu.memory_space<vmem>>, vector<1x128x128xf32>
    %13 = vector.shape_cast %12 : vector<1x128x128xf32> to vector<128x128xf32>
    %c1_21 = arith.constant 1 : index
    %c0_22 = arith.constant 0 : index
    %c0_23 = arith.constant 0 : index
    %14 = vector.load %arg7[%c1_21, %c0_22, %c0_23] : memref<2x128x128xf32, #tpu.memory_space<vmem>>, vector<1x128x128xf32>
    %15 = vector.shape_cast %14 : vector<1x128x128xf32> to vector<128x128xf32>
    %cst = arith.constant dense<0.000000e+00> : vector<8x128xf32>
    %16 = tpu.matmul %0, %1, %cst {dimension_numbers = #tpu.dot_dimension_numbers<[1], [0], [0], [1], [0, 0, 1, 1], [], []>, precision = #tpu.contract_precision<fp32>} : vector<8x128xf32>, vector<128x128xf32>, vector<8x128xf32> -> vector<8x128xf32>
    %17 = vector.broadcast %6 : vector<1x128xf32> to vector<8x128xf32>
    %18 = arith.addf %16, %17 : vector<8x128xf32>
    %cst_24 = arith.constant dense<0.000000e+00> : vector<8xf32>
    %19 = vector.multi_reduction <add>, %18, %cst_24 [1] : vector<8x128xf32> to vector<8xf32>
    %20 = vector.shape_cast %19 : vector<8xf32> to vector<8x1xf32>
    %cst_25 = arith.constant 3.125000e-02 : f32
    %21 = vector.broadcast %cst_25 : f32 to vector<8x1xf32>
    %22 = arith.mulf %20, %21 : vector<8x1xf32>
    %23 = arith.mulf %18, %18 : vector<8x128xf32>
    %cst_26 = arith.constant dense<0.000000e+00> : vector<8xf32>
    %24 = vector.multi_reduction <add>, %23, %cst_26 [1] : vector<8x128xf32> to vector<8xf32>
    %25 = vector.shape_cast %24 : vector<8xf32> to vector<8x1xf32>
    %cst_27 = arith.constant 3.125000e-02 : f32
    %26 = vector.broadcast %cst_27 : f32 to vector<8x1xf32>
    %27 = arith.mulf %25, %26 : vector<8x1xf32>
    %28 = arith.mulf %22, %22 : vector<8x1xf32>
    %29 = arith.subf %27, %28 : vector<8x1xf32>
    %cst_28 = arith.constant 9.99999974E-6 : f32
    %30 = vector.broadcast %cst_28 : f32 to vector<8x1xf32>
    %31 = arith.addf %29, %30 : vector<8x1xf32>
    %32 = math.rsqrt %31 : vector<8x1xf32>
    %33 = vector.broadcast %22 : vector<8x1xf32> to vector<8x128xf32>
    %34 = arith.subf %18, %33 : vector<8x128xf32>
    %35 = vector.broadcast %32 : vector<8x1xf32> to vector<8x128xf32>
    %36 = arith.mulf %34, %35 : vector<8x128xf32>
    %cst_29 = arith.constant 0.707106769 : f32
    %37 = vector.broadcast %cst_29 : f32 to vector<8x128xf32>
    %38 = arith.mulf %36, %37 : vector<8x128xf32>
    %cst_30 = arith.constant 0.000000e+00 : f32
    %39 = vector.broadcast %cst_30 : f32 to vector<8x128xf32>
    %40 = arith.cmpf oge, %38, %39 : vector<8x128xf32>
    %cst_31 = arith.constant 1.000000e+00 : f32
    %cst_32 = arith.constant -1.000000e+00 : f32
    %41 = vector.broadcast %cst_31 : f32 to vector<8x128xf32>
    %42 = vector.broadcast %cst_32 : f32 to vector<8x128xf32>
    %43 = arith.select %40, %41, %42 : vector<8x128xi1>, vector<8x128xf32>
    %44 = math.absf %38 : vector<8x128xf32>
    %cst_33 = arith.constant 0.327591091 : f32
    %45 = vector.broadcast %cst_33 : f32 to vector<8x128xf32>
    %46 = arith.mulf %45, %44 : vector<8x128xf32>
    %cst_34 = arith.constant 1.000000e+00 : f32
    %47 = vector.broadcast %cst_34 : f32 to vector<8x128xf32>
    %48 = arith.addf %47, %46 : vector<8x128xf32>
    %cst_35 = arith.constant 1.000000e+00 : f32
    %49 = vector.broadcast %cst_35 : f32 to vector<8x128xf32>
    %50 = arith.divf %49, %48 : vector<8x128xf32>
    %cst_36 = arith.constant 1.06140542 : f32
    %51 = vector.broadcast %cst_36 : f32 to vector<8x128xf32>
    %52 = arith.mulf %51, %50 : vector<8x128xf32>
    %cst_37 = arith.constant -1.45315206 : f32
    %53 = vector.broadcast %cst_37 : f32 to vector<8x128xf32>
    %54 = arith.addf %52, %53 : vector<8x128xf32>
    %55 = arith.mulf %54, %50 : vector<8x128xf32>
    %cst_38 = arith.constant 1.42141378 : f32
    %56 = vector.broadcast %cst_38 : f32 to vector<8x128xf32>
    %57 = arith.addf %55, %56 : vector<8x128xf32>
    %58 = arith.mulf %57, %50 : vector<8x128xf32>
    %cst_39 = arith.constant -0.284496725 : f32
    %59 = vector.broadcast %cst_39 : f32 to vector<8x128xf32>
    %60 = arith.addf %58, %59 : vector<8x128xf32>
    %61 = arith.mulf %60, %50 : vector<8x128xf32>
    %cst_40 = arith.constant 0.254829586 : f32
    %62 = vector.broadcast %cst_40 : f32 to vector<8x128xf32>
    %63 = arith.addf %61, %62 : vector<8x128xf32>
    %64 = arith.mulf %63, %50 : vector<8x128xf32>
    %cst_41 = arith.constant 0.000000e+00 : f32
    %65 = vector.broadcast %cst_41 : f32 to vector<8x128xf32>
    %66 = arith.subf %65, %44 : vector<8x128xf32>
    %67 = arith.mulf %66, %44 : vector<8x128xf32>
    %68 = math.exp %67 : vector<8x128xf32>
    %69 = arith.mulf %64, %68 : vector<8x128xf32>
    %cst_42 = arith.constant 1.000000e+00 : f32
    %70 = vector.broadcast %cst_42 : f32 to vector<8x128xf32>
    %71 = arith.subf %70, %69 : vector<8x128xf32>
    %72 = arith.mulf %43, %71 : vector<8x128xf32>
    %cst_43 = arith.constant 1.000000e+00 : f32
    %73 = vector.broadcast %cst_43 : f32 to vector<8x128xf32>
    %74 = arith.addf %73, %72 : vector<8x128xf32>
    %cst_44 = arith.constant 5.000000e-01 : f32
    %75 = vector.broadcast %cst_44 : f32 to vector<8x128xf32>
    %76 = arith.mulf %75, %74 : vector<8x128xf32>
    %77 = arith.mulf %36, %76 : vector<8x128xf32>
    %cst_45 = arith.constant dense<0.000000e+00> : vector<8x128xf32>
    %78 = tpu.matmul %77, %3, %cst_45 {dimension_numbers = #tpu.dot_dimension_numbers<[1], [0], [0], [1], [0, 0, 1, 1], [], []>, precision = #tpu.contract_precision<fp32>} : vector<8x128xf32>, vector<128x128xf32>, vector<8x128xf32> -> vector<8x128xf32>
    %79 = vector.broadcast %8 : vector<1x128xf32> to vector<8x128xf32>
    %80 = arith.addf %78, %79 : vector<8x128xf32>
    %cst_46 = arith.constant dense<0.000000e+00> : vector<8xf32>
    %81 = vector.multi_reduction <add>, %80, %cst_46 [1] : vector<8x128xf32> to vector<8xf32>
    %82 = vector.shape_cast %81 : vector<8xf32> to vector<8x1xf32>
    %cst_47 = arith.constant 3.125000e-02 : f32
    %83 = vector.broadcast %cst_47 : f32 to vector<8x1xf32>
    %84 = arith.mulf %82, %83 : vector<8x1xf32>
    %85 = arith.mulf %80, %80 : vector<8x128xf32>
    %cst_48 = arith.constant dense<0.000000e+00> : vector<8xf32>
    %86 = vector.multi_reduction <add>, %85, %cst_48 [1] : vector<8x128xf32> to vector<8xf32>
    %87 = vector.shape_cast %86 : vector<8xf32> to vector<8x1xf32>
    %cst_49 = arith.constant 3.125000e-02 : f32
    %88 = vector.broadcast %cst_49 : f32 to vector<8x1xf32>
    %89 = arith.mulf %87, %88 : vector<8x1xf32>
    %90 = arith.mulf %84, %84 : vector<8x1xf32>
    %91 = arith.subf %89, %90 : vector<8x1xf32>
    %cst_50 = arith.constant 9.99999974E-6 : f32
    %92 = vector.broadcast %cst_50 : f32 to vector<8x1xf32>
    %93 = arith.addf %91, %92 : vector<8x1xf32>
    %94 = math.rsqrt %93 : vector<8x1xf32>
    %95 = vector.broadcast %84 : vector<8x1xf32> to vector<8x128xf32>
    %96 = arith.subf %80, %95 : vector<8x128xf32>
    %97 = vector.broadcast %94 : vector<8x1xf32> to vector<8x128xf32>
    %98 = arith.mulf %96, %97 : vector<8x128xf32>
    %cst_51 = arith.constant 0.707106769 : f32
    %99 = vector.broadcast %cst_51 : f32 to vector<8x128xf32>
    %100 = arith.mulf %98, %99 : vector<8x128xf32>
    %cst_52 = arith.constant 0.000000e+00 : f32
    %101 = vector.broadcast %cst_52 : f32 to vector<8x128xf32>
    %102 = arith.cmpf oge, %100, %101 : vector<8x128xf32>
    %cst_53 = arith.constant 1.000000e+00 : f32
    %cst_54 = arith.constant -1.000000e+00 : f32
    %103 = vector.broadcast %cst_53 : f32 to vector<8x128xf32>
    %104 = vector.broadcast %cst_54 : f32 to vector<8x128xf32>
    %105 = arith.select %102, %103, %104 : vector<8x128xi1>, vector<8x128xf32>
    %106 = math.absf %100 : vector<8x128xf32>
    %cst_55 = arith.constant 0.327591091 : f32
    %107 = vector.broadcast %cst_55 : f32 to vector<8x128xf32>
    %108 = arith.mulf %107, %106 : vector<8x128xf32>
    %cst_56 = arith.constant 1.000000e+00 : f32
    %109 = vector.broadcast %cst_56 : f32 to vector<8x128xf32>
    %110 = arith.addf %109, %108 : vector<8x128xf32>
    %cst_57 = arith.constant 1.000000e+00 : f32
    %111 = vector.broadcast %cst_57 : f32 to vector<8x128xf32>
    %112 = arith.divf %111, %110 : vector<8x128xf32>
    %cst_58 = arith.constant 1.06140542 : f32
    %113 = vector.broadcast %cst_58 : f32 to vector<8x128xf32>
    %114 = arith.mulf %113, %112 : vector<8x128xf32>
    %cst_59 = arith.constant -1.45315206 : f32
    %115 = vector.broadcast %cst_59 : f32 to vector<8x128xf32>
    %116 = arith.addf %114, %115 : vector<8x128xf32>
    %117 = arith.mulf %116, %112 : vector<8x128xf32>
    %cst_60 = arith.constant 1.42141378 : f32
    %118 = vector.broadcast %cst_60 : f32 to vector<8x128xf32>
    %119 = arith.addf %117, %118 : vector<8x128xf32>
    %120 = arith.mulf %119, %112 : vector<8x128xf32>
    %cst_61 = arith.constant -0.284496725 : f32
    %121 = vector.broadcast %cst_61 : f32 to vector<8x128xf32>
    %122 = arith.addf %120, %121 : vector<8x128xf32>
    %123 = arith.mulf %122, %112 : vector<8x128xf32>
    %cst_62 = arith.constant 0.254829586 : f32
    %124 = vector.broadcast %cst_62 : f32 to vector<8x128xf32>
    %125 = arith.addf %123, %124 : vector<8x128xf32>
    %126 = arith.mulf %125, %112 : vector<8x128xf32>
    %cst_63 = arith.constant 0.000000e+00 : f32
    %127 = vector.broadcast %cst_63 : f32 to vector<8x128xf32>
    %128 = arith.subf %127, %106 : vector<8x128xf32>
    %129 = arith.mulf %128, %106 : vector<8x128xf32>
    %130 = math.exp %129 : vector<8x128xf32>
    %131 = arith.mulf %126, %130 : vector<8x128xf32>
    %cst_64 = arith.constant 1.000000e+00 : f32
    %132 = vector.broadcast %cst_64 : f32 to vector<8x128xf32>
    %133 = arith.subf %132, %131 : vector<8x128xf32>
    %134 = arith.mulf %105, %133 : vector<8x128xf32>
    %cst_65 = arith.constant 1.000000e+00 : f32
    %135 = vector.broadcast %cst_65 : f32 to vector<8x128xf32>
    %136 = arith.addf %135, %134 : vector<8x128xf32>
    %cst_66 = arith.constant 5.000000e-01 : f32
    %137 = vector.broadcast %cst_66 : f32 to vector<8x128xf32>
    %138 = arith.mulf %137, %136 : vector<8x128xf32>
    %139 = arith.mulf %98, %138 : vector<8x128xf32>
    %cst_67 = arith.constant dense<0.000000e+00> : vector<8x128xf32>
    %140 = tpu.matmul %139, %5, %cst_67 {dimension_numbers = #tpu.dot_dimension_numbers<[1], [0], [0], [1], [0, 0, 1, 1], [], []>, precision = #tpu.contract_precision<fp32>} : vector<8x128xf32>, vector<128x128xf32>, vector<8x128xf32> -> vector<8x128xf32>
    %141 = vector.broadcast %10 : vector<1x128xf32> to vector<8x128xf32>
    %142 = arith.addf %140, %141 : vector<8x128xf32>
    %cst_68 = arith.constant dense<0.000000e+00> : vector<8xf32>
    %143 = vector.multi_reduction <add>, %142, %cst_68 [1] : vector<8x128xf32> to vector<8xf32>
    %144 = vector.shape_cast %143 : vector<8xf32> to vector<8x1xf32>
    %cst_69 = arith.constant 3.125000e-02 : f32
    %145 = vector.broadcast %cst_69 : f32 to vector<8x1xf32>
    %146 = arith.mulf %144, %145 : vector<8x1xf32>
    %147 = arith.mulf %142, %142 : vector<8x128xf32>
    %cst_70 = arith.constant dense<0.000000e+00> : vector<8xf32>
    %148 = vector.multi_reduction <add>, %147, %cst_70 [1] : vector<8x128xf32> to vector<8xf32>
    %149 = vector.shape_cast %148 : vector<8xf32> to vector<8x1xf32>
    %cst_71 = arith.constant 3.125000e-02 : f32
    %150 = vector.broadcast %cst_71 : f32 to vector<8x1xf32>
    %151 = arith.mulf %149, %150 : vector<8x1xf32>
    %152 = arith.mulf %146, %146 : vector<8x1xf32>
    %153 = arith.subf %151, %152 : vector<8x1xf32>
    %cst_72 = arith.constant 9.99999974E-6 : f32
    %154 = vector.broadcast %cst_72 : f32 to vector<8x1xf32>
    %155 = arith.addf %153, %154 : vector<8x1xf32>
    %156 = math.rsqrt %155 : vector<8x1xf32>
    %157 = vector.broadcast %146 : vector<8x1xf32> to vector<8x128xf32>
    %158 = arith.subf %142, %157 : vector<8x128xf32>
    %159 = vector.broadcast %156 : vector<8x1xf32> to vector<8x128xf32>
    %160 = arith.mulf %158, %159 : vector<8x128xf32>
    %cst_73 = arith.constant 0.707106769 : f32
    %161 = vector.broadcast %cst_73 : f32 to vector<8x128xf32>
    %162 = arith.mulf %160, %161 : vector<8x128xf32>
    %cst_74 = arith.constant 0.000000e+00 : f32
    %163 = vector.broadcast %cst_74 : f32 to vector<8x128xf32>
    %164 = arith.cmpf oge, %162, %163 : vector<8x128xf32>
    %cst_75 = arith.constant 1.000000e+00 : f32
    %cst_76 = arith.constant -1.000000e+00 : f32
    %165 = vector.broadcast %cst_75 : f32 to vector<8x128xf32>
    %166 = vector.broadcast %cst_76 : f32 to vector<8x128xf32>
    %167 = arith.select %164, %165, %166 : vector<8x128xi1>, vector<8x128xf32>
    %168 = math.absf %162 : vector<8x128xf32>
    %cst_77 = arith.constant 0.327591091 : f32
    %169 = vector.broadcast %cst_77 : f32 to vector<8x128xf32>
    %170 = arith.mulf %169, %168 : vector<8x128xf32>
    %cst_78 = arith.constant 1.000000e+00 : f32
    %171 = vector.broadcast %cst_78 : f32 to vector<8x128xf32>
    %172 = arith.addf %171, %170 : vector<8x128xf32>
    %cst_79 = arith.constant 1.000000e+00 : f32
    %173 = vector.broadcast %cst_79 : f32 to vector<8x128xf32>
    %174 = arith.divf %173, %172 : vector<8x128xf32>
    %cst_80 = arith.constant 1.06140542 : f32
    %175 = vector.broadcast %cst_80 : f32 to vector<8x128xf32>
    %176 = arith.mulf %175, %174 : vector<8x128xf32>
    %cst_81 = arith.constant -1.45315206 : f32
    %177 = vector.broadcast %cst_81 : f32 to vector<8x128xf32>
    %178 = arith.addf %176, %177 : vector<8x128xf32>
    %179 = arith.mulf %178, %174 : vector<8x128xf32>
    %cst_82 = arith.constant 1.42141378 : f32
    %180 = vector.broadcast %cst_82 : f32 to vector<8x128xf32>
    %181 = arith.addf %179, %180 : vector<8x128xf32>
    %182 = arith.mulf %181, %174 : vector<8x128xf32>
    %cst_83 = arith.constant -0.284496725 : f32
    %183 = vector.broadcast %cst_83 : f32 to vector<8x128xf32>
    %184 = arith.addf %182, %183 : vector<8x128xf32>
    %185 = arith.mulf %184, %174 : vector<8x128xf32>
    %cst_84 = arith.constant 0.254829586 : f32
    %186 = vector.broadcast %cst_84 : f32 to vector<8x128xf32>
    %187 = arith.addf %185, %186 : vector<8x128xf32>
    %188 = arith.mulf %187, %174 : vector<8x128xf32>
    %cst_85 = arith.constant 0.000000e+00 : f32
    %189 = vector.broadcast %cst_85 : f32 to vector<8x128xf32>
    %190 = arith.subf %189, %168 : vector<8x128xf32>
    %191 = arith.mulf %190, %168 : vector<8x128xf32>
    %192 = math.exp %191 : vector<8x128xf32>
    %193 = arith.mulf %188, %192 : vector<8x128xf32>
    %cst_86 = arith.constant 1.000000e+00 : f32
    %194 = vector.broadcast %cst_86 : f32 to vector<8x128xf32>
    %195 = arith.subf %194, %193 : vector<8x128xf32>
    %196 = arith.mulf %167, %195 : vector<8x128xf32>
    %cst_87 = arith.constant 1.000000e+00 : f32
    %197 = vector.broadcast %cst_87 : f32 to vector<8x128xf32>
    %198 = arith.addf %197, %196 : vector<8x128xf32>
    %cst_88 = arith.constant 5.000000e-01 : f32
    %199 = vector.broadcast %cst_88 : f32 to vector<8x128xf32>
    %200 = arith.mulf %199, %198 : vector<8x128xf32>
    %201 = arith.mulf %160, %200 : vector<8x128xf32>
    %c0_89 = arith.constant 0 : index
    %c0_90 = arith.constant 0 : index
    %202 = vector.load %arg9[%c0_89, %c0_90] : memref<128x128xf32, #tpu.memory_space<vmem>>, vector<128x128xf32>
    %cst_91 = arith.constant dense<0.000000e+00> : vector<8x128xf32>
    %203 = tpu.matmul %201, %202, %cst_91 {dimension_numbers = #tpu.dot_dimension_numbers<[1], [0], [0], [1], [0, 0, 1, 1], [], []>, precision = #tpu.contract_precision<fp32>} : vector<8x128xf32>, vector<128x128xf32>, vector<8x128xf32> -> vector<8x128xf32>
    %c0_92 = arith.constant 0 : index
    %c0_93 = arith.constant 0 : index
    %204 = vector.load %arg10[%c0_92, %c0_93] : memref<1x128xf32, #tpu.memory_space<vmem>>, vector<1x128xf32>
    %205 = vector.broadcast %204 : vector<1x128xf32> to vector<8x128xf32>
    %206 = arith.addf %203, %205 : vector<8x128xf32>
    %c0_94 = arith.constant 0 : index
    %c0_95 = arith.constant 0 : index
    %207 = vector.load %arg12[%c0_94, %c0_95] : memref<8x128xf32, #tpu.memory_space<vmem>>, vector<8x128xf32>
    tpu.vector_store %arg12[%c0_94, %c0_95], %206 {strides = array<i32>} : memref<8x128xf32, #tpu.memory_space<vmem>>, vector<8x128xf32>,
    %c0_96 = arith.constant 0 : index
    %c0_97 = arith.constant 0 : index
    %208 = vector.load %arg8[%c0_96, %c0_97] : memref<1x128xf32, #tpu.memory_space<vmem>>, vector<1x128xf32>
    %209 = vector.shape_cast %208 : vector<1x128xf32> to vector<1x128xf32>
    %210 = vector.broadcast %209 : vector<1x128xf32> to vector<8x128xf32>
    %cst_98 = arith.constant -5.000000e-01 : f32
    %211 = vector.broadcast %cst_98 : f32 to vector<8x128xf32>
    %212 = arith.mulf %211, %160 : vector<8x128xf32>
    %213 = arith.mulf %212, %160 : vector<8x128xf32>
    %214 = math.exp %213 : vector<8x128xf32>
    %cst_99 = arith.constant 0.398942292 : f32
    %215 = vector.broadcast %cst_99 : f32 to vector<8x128xf32>
    %216 = arith.mulf %215, %214 : vector<8x128xf32>
    %217 = arith.mulf %160, %216 : vector<8x128xf32>
    %218 = arith.addf %200, %217 : vector<8x128xf32>
    %219 = arith.mulf %210, %218 : vector<8x128xf32>
    %cst_100 = arith.constant dense<0.000000e+00> : vector<8xf32>
    %220 = vector.multi_reduction <add>, %219, %cst_100 [1] : vector<8x128xf32> to vector<8xf32>
    %221 = vector.shape_cast %220 : vector<8xf32> to vector<8x1xf32>
    %cst_101 = arith.constant 3.125000e-02 : f32
    %222 = vector.broadcast %cst_101 : f32 to vector<8x1xf32>
    %223 = arith.mulf %221, %222 : vector<8x1xf32>
    %224 = arith.mulf %219, %160 : vector<8x128xf32>
    %cst_102 = arith.constant dense<0.000000e+00> : vector<8xf32>
    %225 = vector.multi_reduction <add>, %224, %cst_102 [1] : vector<8x128xf32> to vector<8xf32>
    %226 = vector.shape_cast %225 : vector<8xf32> to vector<8x1xf32>
    %cst_103 = arith.constant 3.125000e-02 : f32
    %227 = vector.broadcast %cst_103 : f32 to vector<8x1xf32>
    %228 = arith.mulf %226, %227 : vector<8x1xf32>
    %229 = vector.broadcast %223 : vector<8x1xf32> to vector<8x128xf32>
    %230 = arith.subf %219, %229 : vector<8x128xf32>
    %231 = vector.broadcast %228 : vector<8x1xf32> to vector<8x128xf32>
    %232 = arith.mulf %160, %231 : vector<8x128xf32>
    %233 = arith.subf %230, %232 : vector<8x128xf32>
    %234 = vector.broadcast %156 : vector<8x1xf32> to vector<8x128xf32>
    %235 = arith.mulf %234, %233 : vector<8x128xf32>
    %cst_104 = arith.constant dense<0.000000e+00> : vector<8x128xf32>
    %236 = tpu.matmul %235, %15, %cst_104 {dimension_numbers = #tpu.dot_dimension_numbers<[1], [0], [0], [1], [0, 0, 1, 1], [], []>, precision = #tpu.contract_precision<fp32>} : vector<8x128xf32>, vector<128x128xf32>, vector<8x128xf32> -> vector<8x128xf32>
    %cst_105 = arith.constant -5.000000e-01 : f32
    %237 = vector.broadcast %cst_105 : f32 to vector<8x128xf32>
    %238 = arith.mulf %237, %98 : vector<8x128xf32>
    %239 = arith.mulf %238, %98 : vector<8x128xf32>
    %240 = math.exp %239 : vector<8x128xf32>
    %cst_106 = arith.constant 0.398942292 : f32
    %241 = vector.broadcast %cst_106 : f32 to vector<8x128xf32>
    %242 = arith.mulf %241, %240 : vector<8x128xf32>
    %243 = arith.mulf %98, %242 : vector<8x128xf32>
    %244 = arith.addf %138, %243 : vector<8x128xf32>
    %245 = arith.mulf %236, %244 : vector<8x128xf32>
    %cst_107 = arith.constant dense<0.000000e+00> : vector<8xf32>
    %246 = vector.multi_reduction <add>, %245, %cst_107 [1] : vector<8x128xf32> to vector<8xf32>
    %247 = vector.shape_cast %246 : vector<8xf32> to vector<8x1xf32>
    %cst_108 = arith.constant 3.125000e-02 : f32
    %248 = vector.broadcast %cst_108 : f32 to vector<8x1xf32>
    %249 = arith.mulf %247, %248 : vector<8x1xf32>
    %250 = arith.mulf %245, %98 : vector<8x128xf32>
    %cst_109 = arith.constant dense<0.000000e+00> : vector<8xf32>
    %251 = vector.multi_reduction <add>, %250, %cst_109 [1] : vector<8x128xf32> to vector<8xf32>
    %252 = vector.shape_cast %251 : vector<8xf32> to vector<8x1xf32>
    %cst_110 = arith.constant 3.125000e-02 : f32
    %253 = vector.broadcast %cst_110 : f32 to vector<8x1xf32>
    %254 = arith.mulf %252, %253 : vector<8x1xf32>
    %255 = vector.broadcast %249 : vector<8x1xf32> to vector<8x128xf32>
    %256 = arith.subf %245, %255 : vector<8x128xf32>
    %257 = vector.broadcast %254 : vector<8x1xf32> to vector<8x128xf32>
    %258 = arith.mulf %98, %257 : vector<8x128xf32>
    %259 = arith.subf %256, %258 : vector<8x128xf32>
    %260 = vector.broadcast %94 : vector<8x1xf32> to vector<8x128xf32>
    %261 = arith.mulf %260, %259 : vector<8x128xf32>
    %cst_111 = arith.constant dense<0.000000e+00> : vector<8x128xf32>
    %262 = tpu.matmul %261, %13, %cst_111 {dimension_numbers = #tpu.dot_dimension_numbers<[1], [0], [0], [1], [0, 0, 1, 1], [], []>, precision = #tpu.contract_precision<fp32>} : vector<8x128xf32>, vector<128x128xf32>, vector<8x128xf32> -> vector<8x128xf32>
    %cst_112 = arith.constant -5.000000e-01 : f32
    %263 = vector.broadcast %cst_112 : f32 to vector<8x128xf32>
    %264 = arith.mulf %263, %36 : vector<8x128xf32>
    %265 = arith.mulf %264, %36 : vector<8x128xf32>
    %266 = math.exp %265 : vector<8x128xf32>
    %cst_113 = arith.constant 0.398942292 : f32
    %267 = vector.broadcast %cst_113 : f32 to vector<8x128xf32>
    %268 = arith.mulf %267, %266 : vector<8x128xf32>
    %269 = arith.mulf %36, %268 : vector<8x128xf32>
    %270 = arith.addf %76, %269 : vector<8x128xf32>
    %271 = arith.mulf %262, %270 : vector<8x128xf32>
    %cst_114 = arith.constant dense<0.000000e+00> : vector<8xf32>
    %272 = vector.multi_reduction <add>, %271, %cst_114 [1] : vector<8x128xf32> to vector<8xf32>
    %273 = vector.shape_cast %272 : vector<8xf32> to vector<8x1xf32>
    %cst_115 = arith.constant 3.125000e-02 : f32
    %274 = vector.broadcast %cst_115 : f32 to vector<8x1xf32>
    %275 = arith.mulf %273, %274 : vector<8x1xf32>
    %276 = arith.mulf %271, %36 : vector<8x128xf32>
    %cst_116 = arith.constant dense<0.000000e+00> : vector<8xf32>
    %277 = vector.multi_reduction <add>, %276, %cst_116 [1] : vector<8x128xf32> to vector<8xf32>
    %278 = vector.shape_cast %277 : vector<8xf32> to vector<8x1xf32>
    %cst_117 = arith.constant 3.125000e-02 : f32
    %279 = vector.broadcast %cst_117 : f32 to vector<8x1xf32>
    %280 = arith.mulf %278, %279 : vector<8x1xf32>
    %281 = vector.broadcast %275 : vector<8x1xf32> to vector<8x128xf32>
    %282 = arith.subf %271, %281 : vector<8x128xf32>
    %283 = vector.broadcast %280 : vector<8x1xf32> to vector<8x128xf32>
    %284 = arith.mulf %36, %283 : vector<8x128xf32>
    %285 = arith.subf %282, %284 : vector<8x128xf32>
    %286 = vector.broadcast %32 : vector<8x1xf32> to vector<8x128xf32>
    %287 = arith.mulf %286, %285 : vector<8x128xf32>
    %cst_118 = arith.constant dense<0.000000e+00> : vector<8x128xf32>
    %288 = tpu.matmul %287, %11, %cst_118 {dimension_numbers = #tpu.dot_dimension_numbers<[1], [0], [0], [1], [0, 0, 1, 1], [], []>, precision = #tpu.contract_precision<fp32>} : vector<8x128xf32>, vector<128x128xf32>, vector<8x128xf32> -> vector<8x128xf32>
    %c0_119 = arith.constant 0 : index
    %c0_120 = arith.constant 0 : index
    %289 = vector.load %arg11[%c0_119, %c0_120] : memref<8x128xf32, #tpu.memory_space<vmem>>, vector<8x128xf32>
    tpu.vector_store %arg11[%c0_119, %c0_120], %288 {strides = array<i32>} : memref<8x128xf32, #tpu.memory_space<vmem>>, vector<8x128xf32>,
    return
  }
  func.func @transform_0(%arg0: i32) -> (i32, i32) {
    %c0_i32 = arith.constant 0 : i32
    %c0_i32_0 = arith.constant 0 : i32
    return %arg0, %c0_i32 : i32, i32
  }
  func.func @transform_1(%arg0: i32) -> (i32, i32) {
    %c0_i32 = arith.constant 0 : i32
    %c0_i32_0 = arith.constant 0 : i32
    %c0_i32_1 = arith.constant 0 : i32
    return %c0_i32, %c0_i32_0 : i32, i32
  }
  func.func @transform_2(%arg0: i32) -> (i32, i32) {
    %c0_i32 = arith.constant 0 : i32
    %c0_i32_0 = arith.constant 0 : i32
    %c0_i32_1 = arith.constant 0 : i32
    return %c0_i32, %c0_i32_0 : i32, i32
  }
  func.func @transform_3(%arg0: i32) -> (i32, i32, i32) {
    %c0_i32 = arith.constant 0 : i32
    %c0_i32_0 = arith.constant 0 : i32
    %c0_i32_1 = arith.constant 0 : i32
    %c0_i32_2 = arith.constant 0 : i32
    return %c0_i32, %c0_i32_0, %c0_i32_1 : i32, i32, i32
  }
  func.func @transform_4(%arg0: i32) -> (i32, i32, i32) {
    %c0_i32 = arith.constant 0 : i32
    %c0_i32_0 = arith.constant 0 : i32
    %c0_i32_1 = arith.constant 0 : i32
    %c0_i32_2 = arith.constant 0 : i32
    return %c0_i32, %c0_i32_0, %c0_i32_1 : i32, i32, i32
  }
  func.func @transform_5(%arg0: i32) -> (i32, i32) {
    %c0_i32 = arith.constant 0 : i32
    %c0_i32_0 = arith.constant 0 : i32
    %c0_i32_1 = arith.constant 0 : i32
    return %c0_i32, %c0_i32_0 : i32, i32
  }
  func.func @transform_6(%arg0: i32) -> (i32, i32, i32) {
    %c0_i32 = arith.constant 0 : i32
    %c0_i32_0 = arith.constant 0 : i32
    %c0_i32_1 = arith.constant 0 : i32
    %c0_i32_2 = arith.constant 0 : i32
    return %c0_i32, %c0_i32_0, %c0_i32_1 : i32, i32, i32
  }
  func.func @transform_7(%arg0: i32) -> (i32, i32) {
    %c0_i32 = arith.constant 0 : i32
    %c0_i32_0 = arith.constant 0 : i32
    %c0_i32_1 = arith.constant 0 : i32
    return %c0_i32, %c0_i32_0 : i32, i32
  }
  func.func @transform_8(%arg0: i32) -> (i32, i32) {
    %c0_i32 = arith.constant 0 : i32
    %c0_i32_0 = arith.constant 0 : i32
    %c0_i32_1 = arith.constant 0 : i32
    return %c0_i32, %c0_i32_0 : i32, i32
  }
  func.func @transform_9(%arg0: i32) -> (i32, i32) {
    %c0_i32 = arith.constant 0 : i32
    %c0_i32_0 = arith.constant 0 : i32
    %c0_i32_1 = arith.constant 0 : i32
    return %c0_i32, %c0_i32_0 : i32, i32
  }
  func.func @transform_10(%arg0: i32) -> (i32, i32) {
    %c0_i32 = arith.constant 0 : i32
    %c0_i32_0 = arith.constant 0 : i32
    return %arg0, %c0_i32 : i32, i32
  }
  func.func @transform_11(%arg0: i32) -> (i32, i32) {
    %c0_i32 = arith.constant 0 : i32
    %c0_i32_0 = arith.constant 0 : i32
    return %arg0, %c0_i32 : i32, i32
  }
}

</mosaic_0001>

<bundles_post_ra>
// kernel: tpu_custom_call.1
= control target key start
LH: loop header
LB: loop body
LE: loop exit
PB: predicated region body
PF: predicated region fallthrough
CT: control target
= control target key end

     0   :  { %s11042_s0 = inlined_call_operand.hbm [shape: f32[16,128], index: 0, kind: input, shape index: {}]   ;;  %s11043_s1 = inlined_call_operand.hbm [shape: f32[128,128], index: 1, kind: input, shape index: {}]   ;;  %s11044_s2 = inlined_call_operand.vmem [shape: f32[1,128], index: 2, kind: input, shape index: {}]   ;;  %s11045_s3 = inlined_call_operand.hbm [shape: f32[2,128,128], index: 3, kind: input, shape index: {}]   ;;  %s11046_s4 = inlined_call_operand.vmem [shape: f32[2,1,128], index: 4, kind: input, shape index: {}]   ;;  %s11047_s5 = inlined_call_operand.hbm [shape: f32[128,128], index: 5, kind: input, shape index: {}]   ;;  %s11048_s6 = inlined_call_operand.hbm [shape: f32[2,128,128], index: 6, kind: input, shape index: {}]   ;;  %s11049_s7 = inlined_call_operand.vmem [shape: f32[1,128], index: 7, kind: input, shape index: {}]   ;;  %s11050_s8 = inlined_call_operand.hbm [shape: f32[128,128], index: 8, kind: input, shape index: {}]   ;;  %s11051_s9 = inlined_call_operand.vmem [shape: f32[1,128], index: 9, kind: input, shape index: {}]   ;;  %s11052_s10 = inlined_call_operand.hbm [shape: f32[16,128], index: 10, kind: output, shape index: {0}]   ;;  %s11053_s11 = inlined_call_operand.hbm [shape: f32[16,128], index: 11, kind: output, shape index: {1}]  }
   0x1   :  { %11101 = sst [smem:[#allocation23_spill]] %s11043_s1 }
   0x2   :  { %11102 = sst [smem:[#allocation24_spill]] %s11045_s3 }
   0x3   :  { %11103 = sst [smem:[#allocation25_spill]] %s11047_s5 }
   0x4   :  { %11104 = sst [smem:[#allocation26_spill]] %s11048_s6 }
   0x5   :  { %11105 = sst [smem:[#allocation27_spill]] %s11050_s8 }
   0x6   :  { %17 = vsyncpa [#allocation3], 0 }
   0x7   :  { %19 = vsyncpa [#allocation3 + $0x1], 0 }
   0x8   :  { %20 = vsyncpa [#allocation6], 0 }
   0x9   :  { %21 = vsyncpa [#allocation9], 0 }
   0xa   :  { %22 = vsyncpa [#allocation12], 0 }
   0xb   :  { %23 = vsyncpa [#allocation4], 0 }
   0xc   :  { %25 = vsyncpa [#allocation4 + $0x1], 0 }
   0xd   :  { %26 = vsyncpa [#allocation15], 0 }
   0xe   :  { %28 = vsyncpa [#allocation15 + $0x1], 0  ;;  %s8170_s17 = smov 0   ;;  %s8172_s18 = smov 0  }
   0xf   :  { %s8174_s19 = smov 0   ;;  %s8176_s20 = smov 0  }
  0x10 LB: > { %s8097_s21 = smov [#allocation5]   ;;  %s8191_s23 = sadd.s32 4294967295, %s8095_s20   ;;  %s8095_s20 = sphi %s8176_s20, %s11177_s20   ;;  %s8091_s19 = sphi %s8174_s19, %s11176_s19   ;;  %s8087_s18 = sphi %s8172_s18, %s11175_s18   ;;  %s8083_s17 = sphi %s8170_s17, %s11174_s17  }
  0x11   : > { %s318_s22 = sshll.u32 %s8097_s21, 4  ;;  %p5486_p0 = scmp.ge.s32.totalorder %s8095_s20, 1  ;;  %s319_s22 = int_to_ptr.vmem [resolvable:$true] %s318_s22 }
  0x12   : > { %p11054_p1 = scmp.eq.s32.totalorder %s8191_s23, 0  ;;  %p306_p2 = scmp.lt.s32.totalorder %s8095_s20, 3 }
  0x13   : > { %s8098_s25 = smov [#allocation8]   ;;  %s8099_s28 = smov [#allocation7]  }
  0x14   : > { %p8196_p3 = pnand %p5486_p0, %p306_p2  ;;  %s350_s26 = sshll.u32 %s8098_s25, 4  ;;  %s8209_s26 = int_to_ptr.vmem [resolvable:$true] %s350_s26 }
  0x15   : > { %s334_s29 = sshll.u32 %s8099_s28, 4  ;;  %s7842_s12 = scalar_lea.vmem %s319_s22, 2048  ;;  %s8211_s29 = int_to_ptr.vmem [resolvable:$true] %s334_s29 }
  0x16   : > { %s11106_s24 = scalar_select %p8196_p3, 1, 0 }
  0x17   : > { %p7726_p5 = pneg %p8196_p3  ;;  %p7843_p8 = scmp.ne.s32.totalorder %s319_s22, %s7842_s12 }
  0x18   : > { %p7850_p11 = scmp.lt.s32.totalorder %s319_s22, %s319_s22  ;;  %p7851_p12 = scmp.lt.s32.totalorder %s7842_s12, %s7842_s12 }
  0x19   : > { %p8205_p6 = pnand %p7726_p5, %p11054_p1 }
  0x1a   : > { %p7852_p13 = por %p7851_p12, %p7850_p11 }
  0x1b   : > { %p8215_p7 = pneg %p8205_p6 }
  0x1d   : > { %p7845_p9 = pnand %p7843_p8, %p8215_p7 }
  0x1f   : > { %p7846_p10 = pneg %p7845_p9 }
  0x21   : > { %p7853_p0 = pnand %p7852_p13, %p7846_p10 }
  0x23   : > { %7856 = shalt.err (!%p7853_p0)
}
  0x24   : > { %s8100_s13 = smov 128   ;;  %s8101_s14 = smov 8  }
  0x25   : > { %s11109_s1 = sld [smem:[#allocation23_spill]]  ;;  %s7868_s21 = scalar_lea.vmem %s8209_s26, 2048 }
  0x26   : > { %p7869_p2 = scmp.ne.s32.totalorder %s8209_s26, %s7868_s21  ;;  %p7876_p9 = scmp.lt.s32.totalorder %s8209_s26, %s8209_s26 }
  0x27   : > { %p7877_p10 = scmp.lt.s32.totalorder %s7868_s21, %s7868_s21 }
  0x28   : > { %p7871_p5 = pnand %p7869_p2, %p8215_p7 }
  0x29   : > { %p7878_p11 = por %p7877_p10, %p7876_p9 }
  0x2a   : > { %p7872_p8 = pneg %p7871_p5 }
  0x2b   : > { %7729 = dma.hbm_to_vmem [thread:$0]  (!%p8205_p6), %s11109_s1, 2048, %s319_s22, [#allocation6], %s8100_s13, %s8100_s13, %s8101_s14  }
  0x2c   : > { %p7879_p12 = pnand %p7878_p11, %p7872_p8 }
  0x2e   : > { %7882 = shalt.err (!%p7879_p12)
}
  0x2f   : > { %s11110_s5 = sld [smem:[#allocation25_spill]]  ;;  %s7894_s22 = scalar_lea.vmem %s8211_s29, 4096 }
  0x30   : > { %p7895_p13 = scmp.ne.s32.totalorder %s8211_s29, %s7894_s22  ;;  %p7902_p5 = scmp.lt.s32.totalorder %s8211_s29, %s8211_s29 }
  0x31   : > { %p7903_p8 = scmp.lt.s32.totalorder %s7894_s22, %s7894_s22 }
  0x32   : > { %p7897_p0 = pnand %p7895_p13, %p8215_p7 }
  0x33   : > { %p7904_p9 = por %p7903_p8, %p7902_p5 }
  0x34   : > { %p7898_p2 = pneg %p7897_p0 }
  0x35   : > { %7735 = dma.hbm_to_vmem [thread:$0]  (!%p8205_p6), %s11110_s5, 2048, %s8209_s26, [#allocation9], %s8100_s13, %s8100_s13, %s8101_s14  }
  0x36   : > { %p7905_p10 = pnand %p7904_p9, %p7898_p2 }
  0x38   : > { %7908 = shalt.err (!%p7905_p10)
}
  0x39   : > { %s11111_s3 = sld [smem:[#allocation24_spill]]  ;;  %s8102_s26 = smov [#allocation10]  }
  0x3a   : > { %s363_s16 = sshll.u32 %s8102_s26, 4  ;;  %s8103_s21 = smov [#allocation11]   ;;  %s364_s16 = int_to_ptr.vmem [resolvable:$true] %s363_s16 }
  0x3b   : > { %s379_s25 = sshll.u32 %s8103_s21, 4  ;;  %s7920_s28 = scalar_lea.vmem %s364_s16, 4096  ;;  %s380_s25 = int_to_ptr.vmem [resolvable:$true] %s379_s25 }
  0x3c   : > { %p7921_p11 = scmp.ne.s32.totalorder %s364_s16, %s7920_s28  ;;  %p7928_p0 = scmp.lt.s32.totalorder %s364_s16, %s364_s16 }
  0x3d   : > { %p7929_p2 = scmp.lt.s32.totalorder %s7920_s28, %s7920_s28 }
  0x3e   : > { %p7923_p12 = pnand %p7921_p11, %p8215_p7 }
  0x3f   : > { %7732 = dma.hbm_to_vmem [thread:$0]  (!%p8205_p6), %s11111_s3, 4096, %s8211_s29, [#allocation6], %s8100_s13, %s8100_s13, %s8101_s14  }
  0x40   : > { %p7924_p13 = pneg %p7923_p12  ;;  %p7930_p5 = por %p7929_p2, %p7928_p0 }
  0x42   : > { %p7931_p8 = pnand %p7930_p5, %p7924_p13 }
  0x44   : > { %7934 = shalt.err (!%p7931_p8)
}
  0x45   : > { %s11112_s6 = sld [smem:[#allocation26_spill]]  ;;  %s7946_s12 = scalar_lea.vmem %s380_s25, 2048 }
  0x46   : > { %p7947_p9 = scmp.ne.s32.totalorder %s380_s25, %s7946_s12  ;;  %p7954_p12 = scmp.lt.s32.totalorder %s380_s25, %s380_s25 }
  0x47   : > { %p7955_p0 = scmp.lt.s32.totalorder %s7946_s12, %s7946_s12 }
  0x48   : > { %p7949_p10 = pnand %p7947_p9, %p8215_p7 }
  0x49   : > { %p7956_p13 = por %p7955_p0, %p7954_p12 }
  0x4a   : > { %p7950_p11 = pneg %p7949_p10 }
  0x4b   : > { %7738 = dma.hbm_to_vmem [thread:$0]  (!%p8205_p6), %s11112_s6, 4096, %s364_s16, [#allocation9], %s8100_s13, %s8100_s13, %s8101_s14  }
  0x4c   : > { %p7957_p2 = pnand %p7956_p13, %p7950_p11 }
  0x4e   : > { %7960 = shalt.err (!%p7957_p2)
}
  0x4f   : > { %s11113_s8 = sld [smem:[#allocation27_spill]]  ;;  %s5485_s27 = sadd.s32 4294967294, %s8095_s20  }
  0x50   : > { %s8281_s30 = sadd.s32 1, %s8095_s20   ;;  %s41_s16 = sadd.s32 1, %s8091_s19 }
  0x51   : > { %s38_s21 = ssub.s32 %s8095_s20, %s8281_s30  ;;  %p48_p7 = scmp.ne.s32.totalorder %s8091_s19, %s8087_s18 }
  0x52   : > { %p39_p5 = scmp.eq.s32.totalorder %s38_s21, 0  ;;  %p49_p8 = scmp.eq.s32.totalorder %s8095_s20, 0 }
  0x53   : > { %p54_p9 = scmp.ne.s32.totalorder %s8087_s18, %s8083_s17  ;;  %p267_p10 = scmp.eq.s32.totalorder %s8191_s23, 1 }
  0x54   : > { %s8293_s28 = scalar_select %p39_p5, %s8091_s19, %s41_s16  }
  0x55   : > { %7741 = dma.hbm_to_vmem [thread:$0]  (!%p8205_p6), %s11113_s8, 2048, %s380_s25, [#allocation12], %s8100_s13, %s8100_s13, %s8101_s14  }
  0x56   : > { %11114 = sst [smem:[#allocation22_spill]] %s8293_s28  ;;  %p50_p11 = por %p49_p8, %p48_p7 }
  0x57   : > { %p8297_p12 = por %p11054_p1, %p54_p9  ;;  %p8301_p6 = por %p267_p10, %p48_p7 }
  0x58   : > { %p273_p0 = scmp.eq.s32.totalorder %s5485_s27, 1  ;;  %p7758_p13 = scmp.lt.s32.totalorder %s8095_s20, 2 }
  0x59   : > { %s11115_s29 = scalar_select %p8297_p12, 1, 0 }
  0x5a   : > { %s11116_s13 = scalar_select %p8301_p6, 1, 0 }
  0x5b   : > { %s396_s14 = sand.u32 1, %s8091_s19   ;;  %p8307_p2 = por %p273_p0, %p54_p9 }
  0x5c   : > { %s5493_s22 = sshll.u32 %s396_s14, 3  ;;  %s5494_s12 = sshll.u32 %s8095_s20, 7 }
  0x5d   : > { %s11117_s25 = scalar_select %p8307_p2, 1, 0 }
  0x5e   : > { %s8315_s16 = scalar_lea.hbm %s11042_s0, %s5494_s12  ;;  %s400_s21 = scalar_lea.vmem [#allocation2], %s5493_s22 }
  0x5f   : > { %s407_s1 = sshll.u32 %s400_s21, 4  ;;  %p8317_p7 = pnand %p7758_p13, %p50_p11  ;;  %s408_s1 = int_to_ptr.vmem [resolvable:$true] %s407_s1 }
  0x60   : > { %s397_s3 = scalar_lea.sflag [#allocation3], %s396_s14  ;;  %s7961_s5 = scalar_lea.hbm %s8315_s16, 128 }
  0x61   : > { %p7962_p5 = scmp.ne.s32.totalorder %s8315_s16, %s7961_s5  ;;  %p7963_p8 = pneg %p8317_p7 }
  0x62   : > { %s7966_s26 = scalar_lea.hbm %s11042_s0, 256  ;;  %p7967_p11 = scmp.lt.s32.totalorder %s8315_s16, %s11042_s0 }
  0x63   : > { %p7964_p9 = pnand %p7963_p8, %p7962_p5  ;;  %p7968_p0 = scmp.lt.s32.totalorder %s7966_s26, %s7961_s5 }
  0x65   : > { %p7965_p10 = pneg %p7964_p9  ;;  %p7969_p13 = por %p7968_p0, %p7967_p11 }
  0x67   : > { %p7970_p4 = pnand %p7969_p13, %p7965_p10 }
  0x69   : > { %7973 = shalt.err (!%p7970_p4)
}
  0x6a   : > { %s7974_s21 = scalar_lea.vmem %s408_s1, 128  ;;  %s8104_s14 = smov [#allocation2]  }
  0x6b   : > { %p7975_p1 = scmp.ne.s32.totalorder %s408_s1, %s7974_s21  ;;  %s7979_s8 = sshll.u32 %s8104_s14, 4  ;;  %s7980_s8 = int_to_ptr.vmem [resolvable:$false] %s7979_s8 }
  0x6c   : > { %s7981_s28 = scalar_lea.vmem %s7980_s8, 256  ;;  %p7982_p5 = scmp.lt.s32.totalorder %s408_s1, %s7980_s8 }
  0x6d   : > { %p7977_p2 = pnand %p7975_p1, %p7963_p8  ;;  %p7983_p9 = scmp.lt.s32.totalorder %s7981_s28, %s7974_s21 }
  0x6f   : > { %p7978_p6 = pneg %p7977_p2  ;;  %p7984_p12 = por %p7983_p9, %p7982_p5 }
  0x71   : > { %p7985_p3 = pnand %p7984_p12, %p7978_p6 }
  0x73   : > { %7988 = shalt.err (!%p7985_p3)
}
  0x74   : > { %7745 = dma.hbm_to_vmem [thread:$0]  (!%p8317_p7), %s8315_s16, 128, %s408_s1, %s397_s3  }
  0x75   : > { %p11119_p10 = scmp.ne.s32.totalorder %s11106_s24, 0 }
  0x76   : > { %s8338_s5 = sand.u32 (!%p11119_p10), 1, %s8087_s18   ;;  %p11120_p1 = scmp.ne.s32.totalorder (!%p11119_p10), %s11115_s29, 0 }
  0x77   : > { %416 = sbr.rel (%p11119_p10) target bundleno = 2913 (0xb61), region = 60  ;;  %s8341_s6 = sshll.u32 (!%p11119_p10), %s8338_s5, 3 }
  0x78   : > { %s419_s8 = scalar_lea.sflag (!%p11119_p10), [#allocation3], %s8338_s5  ;;  %s422_s28 = scalar_lea.vmem (!%p11119_p10), [#allocation2], %s8341_s6 }
  0x7c   : > { %8058 = dma.done.wait (%p11120_p1), %s419_s8, 128  }
  0x7d   : > { %8060 = vsyncadd (%p11120_p1), %s419_s8, 4294967168  ;;  %p11121_p3 = scmp.eq.s32.totalorder %s8191_s23, 0 }
  0x7f   : > { %8062 = dma.done.wait (%p11121_p3), [#allocation6], 6144   ;;  %p11122_p4 = pmov %p11121_p3 }
  0x80   : > { %p11123_p12 = pmov %p11121_p3 }
  0x81   : > { %8064 = vsyncadd (%p11122_p4), [#allocation6], 4294961152 }
  0x82   : > { %8066 = dma.done.wait (%p11123_p12), [#allocation9], 6144   ;;  %p11124_p6 = pmov %p11121_p3 }
  0x83   : > { %p11125_p2 = pmov %p11121_p3 }
  0x84   : > { %8068 = vsyncadd (%p11124_p6), [#allocation9], 4294961152 }
  0x85   : > { %8070 = dma.done.wait (%p11125_p2), [#allocation12], 2048   ;;  %p11126_p7 = pmov %p11125_p2 }
  0x86   : > { %v8105_v0 = vmov 0.0   ;;  %vm8106_vm0 = vmmov 0   ;;  %v502_v1 = vld [vmem:[#allocation5 + $0x78] sm:$0xff]  ;;  %v501_v2 = vld [vmem:[#allocation5 + $0x70] sm:$0xff]  ;;  %v500_v3 = vld [vmem:[#allocation5 + $0x68] sm:$0xff]  ;;  %s485_s21 = scalar_lea.vmem [#allocation14], %s8341_s6 }
  0x87   : > { %8072 = vsyncadd (%p11126_p7), [#allocation12], 4294965248  ;;  %6230 = vmatprep.subr.mxu0 %v8105_v0  ;;  %6265 = vmatprep.subr.mxu1 %v8105_v0  ;;  %v8367_v4 = vand.u32 4294901760, %v502_v1  ;;  %v8369_v5 = vand.u32 4294901760, %v501_v2  ;;  %v8371_v6 = vand.u32 4294901760, %v500_v3  ;;  %v499_v7 = vld [vmem:[#allocation5 + $0x60] sm:$0xff] }
  0x88   : > { %6262 = vmatprep.mubr.msk.f32.mxu0 %vm8106_vm0, %v8105_v0  ;;  %6297 = vmatprep.mubr.msk.f32.mxu1 %vm8106_vm0, %v8105_v0  ;;  %v498_v8 = vld [vmem:[#allocation5 + $0x58] sm:$0xff]  ;;  %v497_v9 = vld [vmem:[#allocation5 + $0x50] sm:$0xff]  ;;  %v8373_v10 = vand.u32 4294901760, %v499_v7  ;;  %v496_v13 = vld [vmem:[#allocation5 + $0x48] sm:$0xff]  ;;  %s5512_s14 = sshll.u32 %s8191_s23, 7  ;;  %s5335_s3 = sshll.u32 %s485_s21, 4  ;;  %s5336_s3 = int_to_ptr.vmem [resolvable:$true] %s5335_s3 }
  0x89   : > { %v8375_v11 = vand.u32 4294901760, %v498_v8  ;;  %v8377_v12 = vand.u32 4294901760, %v497_v9  ;;  %v495_v14 = vld [vmem:[#allocation5 + $0x40] sm:$0xff]  ;;  %6231 = vmatpush3.msra.mxu0 %v8367_v4  ;;  %v8381_v15 = vsub.f32 %v502_v1, %v8367_v4  ;;  %v8384_v16 = vsub.f32 %v501_v2, %v8369_v5  ;;  %v494_v19 = vld [vmem:[#allocation5 + $0x38] sm:$0xff]  ;;  %v493_v26 = vld [vmem:[#allocation5 + $0x30] sm:$0xff]  ;;  %s5333_s1 = scalar_lea.hbm %s11053_s11, %s5512_s14  ;;  %s5309_s24 = scalar_lea.sflag [#allocation15], %s8338_s5 }
  0x8a   : > { %v8386_v17 = vand.u32 4294901760, %v496_v13  ;;  %v8389_v18 = vsub.f32 %v500_v3, %v8371_v6  ;;  %6232 = vmatprep.subr.mxu0 %v8105_v0  ;;  %v8393_v20 = vsub.f32 %v499_v7, %v8373_v10  ;;  %v8402_v25 = vand.u32 4294901760, %v495_v14  ;;  %v492_v36 = vld [vmem:[#allocation5 + $0x28] sm:$0xff]  ;;  %v491_v41 = vld [vmem:[#allocation5 + $0x20] sm:$0xff]  ;;  %v490_v49 = vld [vmem:[#allocation5 + $0x18] sm:$0xff]  ;;  %s7989_s29 = scalar_lea.vmem %s5336_s3, 128 }
  0x8b   : > { %v8396_v21 = vsub.f32 %v498_v8, %v8375_v11  ;;  %6233 = vmatpush3.msra.mxu0 %v8369_v5  ;;  %v689_v22 = vand.u32 4294901760, %v8381_v15  ;;  %v696_v23 = vand.u32 4294901760, %v8384_v16  ;;  %v8406_v28 = vand.u32 4294901760, %v494_v19  ;;  %v486_v50 = vld [vmem:[%s422_s28] sm:$0xff]  ;;  %v488_v60 = vld [vmem:[#allocation5 + $0x8] sm:$0xff]  ;;  %v487_v7 = vld [vmem:[#allocation5] sm:$0xff]  ;;  %p7990_p8 = scmp.ne.s32.totalorder %s5336_s3, %s7989_s29 }
  0x8c   : > { %v703_v24 = vand.u32 4294901760, %v8389_v18  ;;  %6234 = vmatprep.subr.mxu0 %v8105_v0  ;;  %v710_v27 = vand.u32 4294901760, %v8393_v20  ;;  %v8410_v30 = vsub.f32 %v497_v9, %v8377_v12  ;;  %v8423_v34 = vsub.f32 %v496_v13, %v8386_v17  ;;  %v489_v54 = vld [vmem:[#allocation5 + $0x10] sm:$0xff]  ;;  %p11170_p11 = scmp.ne.s32.totalorder %s11116_s13, 0  ;;  %s8108_s16 = smov [#allocation14]  }
  0x8d   : > { %v717_v29 = vand.u32 4294901760, %v8396_v21  ;;  %6235 = vmatpush3.msra.mxu0 %v8371_v6  ;;  %v690_v31 = vsub.f32 %v8381_v15, %v689_v22  ;;  %v697_v32 = vsub.f32 %v8384_v16, %v696_v23  ;;  %v8426_v35 = vand.u32 4294901760, %v493_v26  ;;  %s7993_s27 = sshll.u32 %s8108_s16, 4  ;;  %s7994_s27 = int_to_ptr.vmem [resolvable:$false] %s7993_s27 }
  0x8e   : > { %v704_v33 = vsub.f32 %v8389_v18, %v703_v24  ;;  %6236 = vmatprep.subr.mxu0 %v8105_v0  ;;  %v711_v39 = vsub.f32 %v8393_v20, %v710_v27  ;;  %v724_v40 = vand.u32 4294901760, %v8410_v30  ;;  %v8438_v43 = vsub.f32 %v495_v14, %v8402_v25  ;;  %p7991_p0 = pnand %p7990_p8, %p11170_p11  ;;  %s7995_s12 = scalar_lea.vmem %s7994_s27, 256 }
  0x8f   : > { %6237 = vmatpush3.msra.mxu0 %v8373_v10  ;;  %v691_v37 = vand.u32 4294901760, %v690_v31  ;;  %v698_v38 = vand.u32 4294901760, %v697_v32  ;;  %v718_v42 = vsub.f32 %v8396_v21, %v717_v29  ;;  %v8441_v45 = vand.u32 4294901760, %v492_v36  ;;  %p7996_p5 = scmp.lt.s32.totalorder %s5336_s3, %s7994_s27  ;;  %p7997_p9 = scmp.lt.s32.totalorder %s7995_s12, %s7989_s29 }
  0x90   : > { %6238 = vmatprep.subr.mxu0 %v8105_v0  ;;  %v705_v44 = vand.u32 4294901760, %v704_v33  ;;  %v731_v46 = vand.u32 4294901760, %v8423_v34  ;;  %v8445_v47 = vsub.f32 %v494_v19, %v8406_v28  ;;  %v8449_v48 = vand.u32 4294901760, %v491_v41  ;;  %p7992_p13 = pneg %p7991_p0 }
  0x91   : > { %6239 = vmatpush3.msra.mxu0 %v8375_v11  ;;  %6266 = vmatpush3.msra.mxu1 %v691_v37  ;;  %v712_v51 = vand.u32 4294901760, %v711_v39  ;;  %v725_v52 = vsub.f32 %v8410_v30, %v724_v40  ;;  %v738_v53 = vand.u32 4294901760, %v8438_v43  ;;  %v8459_v55 = vsub.f32 %v493_v26, %v8426_v35  ;;  %p7998_p10 = por %p7997_p9, %p7996_p5 }
  0x92   : > { %6240 = vmatprep.subr.mxu0 %v8105_v0  ;;  %6267 = vmatprep.subr.mxu1 %v8105_v0  ;;  %v719_v56 = vand.u32 4294901760, %v718_v42  ;;  %v745_v57 = vand.u32 4294901760, %v8445_v47  ;;  %v732_v58 = vsub.f32 %v8423_v34, %v731_v46  ;;  %v8468_v59 = vand.u32 4294901760, %v490_v49 }
  0x93   : > { %6241 = vmatpush3.msra.mxu0 %v8377_v12  ;;  %6268 = vmatpush3.msra.mxu1 %v698_v38  ;;  %v8471_v61 = vsub.f32 %v492_v36, %v8441_v45  ;;  %v8473_v62 = vand.u32 4294901760, %v486_v50  ;;  %v8477_v63 = vand.u32 4294901760, %v489_v54  ;;  %v726_v1 = vand.u32 4294901760, %v725_v52  ;;  %p7999_p1 = pnand %p7998_p10, %p7992_p13 }
  0x94   : > { %6242 = vmatprep.subr.mxu0 %v8105_v0  ;;  %6269 = vmatprep.subr.mxu1 %v8105_v0  ;;  %v739_v2 = vsub.f32 %v8438_v43, %v738_v53  ;;  %v752_v3 = vand.u32 4294901760, %v8459_v55  ;;  %v8485_v8 = vsub.f32 %v491_v41, %v8449_v48  ;;  %v746_v9 = vsub.f32 %v8445_v47, %v745_v57 }
  0x95   : > { %6243 = vmatpush3.msra.mxu0 %v8386_v17  ;;  %6270 = vmatpush3.msra.mxu1 %v705_v44  ;;  %v8492_v13 = vand.u32 4294901760, %v488_v60  ;;  %v733_v14 = vand.u32 4294901760, %v732_v58  ;;  %v759_v19 = vand.u32 4294901760, %v8471_v61  ;;  %v8497_v26 = vsub.f32 %v486_v50, %v8473_v62 }
  0x96   : > { %6244 = vmatprep.subr.mxu0 %v8105_v0  ;;  %6271 = vmatprep.subr.mxu1 %v8105_v0  ;;  %v8500_v31 = vsub.f32 %v490_v49, %v8468_v59  ;;  %v8504_v32 = vand.u32 4294901760, %v487_v7  ;;  %v740_v33 = vand.u32 4294901760, %v739_v2  ;;  %v753_v36 = vsub.f32 %v8459_v55, %v752_v3 }
  0x97   : > { %6245 = vmatpush3.msra.mxu0 %v8402_v25  ;;  %6272 = vmatpush3.msra.mxu1 %v712_v51  ;;  %v766_v37 = vand.u32 4294901760, %v8485_v8  ;;  %v8512_v38 = vsub.f32 %v489_v54, %v8477_v63  ;;  %v747_v39 = vand.u32 4294901760, %v746_v9  ;;  %v760_v41 = vsub.f32 %v8471_v61, %v759_v19 }
  0x98   : > { %6246 = vmatprep.subr.mxu0 %v8105_v0  ;;  %6273 = vmatprep.subr.mxu1 %v8105_v0  ;;  %v678_v42 = vand.u32 4294901760, %v8497_v26  ;;  %v773_v44 = vand.u32 4294901760, %v8500_v31  ;;  %v8523_v49 = vsub.f32 %v488_v60, %v8492_v13  ;;  %v754_v50 = vand.u32 4294901760, %v753_v36 }
  0x99   : > { %6247 = vmatpush3.msra.mxu0 %v8406_v28  ;;  %6274 = vmatpush3.msra.mxu1 %v719_v56  ;;  %v767_v51 = vsub.f32 %v8485_v8, %v766_v37  ;;  %v780_v52 = vand.u32 4294901760, %v8512_v38  ;;  %v8533_v54 = vsub.f32 %v487_v7, %v8504_v32  ;;  %v761_v56 = vand.u32 4294901760, %v760_v41 }
  0x9a   : > { %6248 = vmatprep.subr.mxu0 %v8105_v0  ;;  %6275 = vmatprep.subr.mxu1 %v8105_v0  ;;  %v679_v58 = vsub.f32 %v8497_v26, %v678_v42  ;;  %v774_v60 = vsub.f32 %v8500_v31, %v773_v44 }
  0x9b   : > { %6249 = vmatpush3.msra.mxu0 %v8426_v35  ;;  %6276 = vmatpush3.msra.mxu1 %v726_v1  ;;  %v787_v1 = vand.u32 4294901760, %v8523_v49  ;;  %v768_v2 = vand.u32 4294901760, %v767_v51  ;;  %v781_v7 = vsub.f32 %v8512_v38, %v780_v52  ;;  %v794_v9 = vand.u32 4294901760, %v8533_v54 }
  0x9c   : > { %6250 = vmatprep.subr.mxu0 %v8105_v0  ;;  %6277 = vmatprep.subr.mxu1 %v8105_v0 }
  0x9d   : > { %6251 = vmatpush3.msra.mxu0 %v8441_v45  ;;  %6278 = vmatpush3.msra.mxu1 %v733_v14  ;;  %v680_v14 = vand.u32 4294901760, %v679_v58  ;;  %v788_v36 = vsub.f32 %v8523_v49, %v787_v1  ;;  %v795_v41 = vsub.f32 %v8533_v54, %v794_v9 }
  0x9e   : > { %6252 = vmatprep.subr.mxu0 %v8105_v0  ;;  %6279 = vmatprep.subr.mxu1 %v8105_v0 }
  0x9f   : > { %6253 = vmatpush3.msra.mxu0 %v8449_v48  ;;  %6280 = vmatpush3.msra.mxu1 %v740_v33  ;;  %v775_v33 = vand.u32 4294901760, %v774_v60  ;;  %v796_v51 = vand.u32 4294901760, %v795_v41 }
  0xa0   : > { %6254 = vmatprep.subr.mxu0 %v8105_v0  ;;  %6281 = vmatprep.subr.mxu1 %v8105_v0 }
  0xa1   : > { %6255 = vmatpush3.msra.mxu0 %v8468_v59  ;;  %6282 = vmatpush3.msra.mxu1 %v747_v39  ;;  %v782_v39 = vand.u32 4294901760, %v781_v7  ;;  %v509_v7 = vld [vmem:[#allocation7 + $0x30] sm:$0xff] }
  0xa2   : > { %6256 = vmatprep.subr.mxu0 %v8105_v0  ;;  %6283 = vmatprep.subr.mxu1 %v8105_v0 }
  0xa3   : > { %6257 = vmatpush3.msra.mxu0 %v8477_v63  ;;  %6284 = vmatpush3.msra.mxu1 %v754_v50  ;;  %v789_v50 = vand.u32 4294901760, %v788_v36 }
  0xa4   : > { %6258 = vmatprep.subr.mxu0 %v8105_v0  ;;  %6285 = vmatprep.subr.mxu1 %v8105_v0 }
  0xa5   : > { %6259 = vmatpush3.msra.mxu0 %v8492_v13  ;;  %6286 = vmatpush3.msra.mxu1 %v761_v56 }
  0xa6   : > { %6260 = vmatprep.subr.mxu0 %v8105_v0  ;;  %6287 = vmatprep.subr.mxu1 %v8105_v0 }
  0xa7   : > { %6261 = vmatpush3.msra.mxu0 %v8504_v32  ;;  %6288 = vmatpush3.msra.mxu1 %v768_v2  ;;  %v510_v2 = vld [vmem:[#allocation7 + $0x38] sm:$0xff] }
  0xa8   : > { %6289 = vmatprep.subr.mxu1 %v8105_v0  ;;  %6300 = vmatprep.subr.mxu0 %v8105_v0 }
  0xa9   : > { %6263 = vmatmul.mubr.f32.vlgmr.msra.gmra.mxu0 %v680_v14  ;;  %6290 = vmatpush3.msra.mxu1 %v775_v33 }
  0xaa   : > { %6301 = vmatpush3.msra.mxu0 %v8381_v15  ;;  %6291 = vmatprep.subr.mxu1 %v8105_v0 }
  0xab   : > { %6302 = vmatprep.subr.mxu0 %v8105_v0  ;;  %6292 = vmatpush3.msra.mxu1 %v782_v39 }
  0xac   : > { %6303 = vmatpush3.msra.mxu0 %v8384_v16  ;;  %6293 = vmatprep.subr.mxu1 %v8105_v0 }
  0xad   : > { %6304 = vmatprep.subr.mxu0 %v8105_v0  ;;  %6294 = vmatpush3.msra.mxu1 %v789_v50  ;;  %v507_v50 = vld [vmem:[#allocation7 + $0x20] sm:$0xff] }
  0xae   : > { %6305 = vmatpush3.msra.mxu0 %v8389_v18  ;;  %6295 = vmatprep.subr.mxu1 %v8105_v0 }
  0xaf   : > { %6306 = vmatprep.subr.mxu0 %v8105_v0  ;;  %6296 = vmatpush3.msra.mxu1 %v796_v51 }
  0xb0   : > { %6307 = vmatpush3.msra.mxu0 %v8393_v20  ;;  %6298 = vmatmul.mubr.f32.vlgmr.msra.gmra.mxu1 %v8473_v62 }
  0xb1   : > { %6308 = vmatprep.subr.mxu0 %v8105_v0  ;;  %6335 = vmatprep.subr.mxu1 %v8105_v0 }
  0xb2   : > { %6309 = vmatpush3.msra.mxu0 %v8396_v21  ;;  %6336 = vmatpush3.msra.mxu1 %v8367_v4 }
  0xb3   : > { %6310 = vmatprep.subr.mxu0 %v8105_v0  ;;  %6337 = vmatprep.subr.mxu1 %v8105_v0 }
  0xb4   : > { %6311 = vmatpush3.msra.mxu0 %v8410_v30  ;;  %6338 = vmatpush3.msra.mxu1 %v8369_v5 }
  0xb5   : > { %6312 = vmatprep.subr.mxu0 %v8105_v0  ;;  %6339 = vmatprep.subr.mxu1 %v8105_v0 }
  0xb6   : > { %6313 = vmatpush3.msra.mxu0 %v8423_v34  ;;  %6340 = vmatpush3.msra.mxu1 %v8371_v6  ;;  %v518_v34 = vld [vmem:[#allocation7 + $0x78] sm:$0xff] }
  0xb7   : > { %6314 = vmatprep.subr.mxu0 %v8105_v0  ;;  %6341 = vmatprep.subr.mxu1 %v8105_v0 }
  0xb8   : > { %6315 = vmatpush3.msra.mxu0 %v8438_v43  ;;  %6342 = vmatpush3.msra.mxu1 %v8373_v10  ;;  %v8740_v43 = vand.u32 4294901760, %v518_v34 }
  0xb9   : > { %6316 = vmatprep.subr.mxu0 %v8105_v0  ;;  %6343 = vmatprep.subr.mxu1 %v8105_v0 }
  0xba   : > { %6317 = vmatpush3.msra.mxu0 %v8445_v47  ;;  %6344 = vmatpush3.msra.mxu1 %v8375_v11  ;;  %v515_v47 = vld [vmem:[#allocation7 + $0x60] sm:$0xff] }
  0xbb   : > { %6318 = vmatprep.subr.mxu0 %v8105_v0  ;;  %6345 = vmatprep.subr.mxu1 %v8105_v0 }
  0xbc   : > { %6319 = vmatpush3.msra.mxu0 %v8459_v55  ;;  %6346 = vmatpush3.msra.mxu1 %v8377_v12  ;;  %v8746_v55 = vand.u32 4294901760, %v515_v47 }
  0xbd   : > { %6320 = vmatprep.subr.mxu0 %v8105_v0  ;;  %6347 = vmatprep.subr.mxu1 %v8105_v0 }
  0xbe   : > { %6321 = vmatpush3.msra.mxu0 %v8471_v61  ;;  %6348 = vmatpush3.msra.mxu1 %v8386_v17  ;;  %v512_v61 = vld [vmem:[#allocation7 + $0x48] sm:$0xff] }
  0xbf   : > { %6322 = vmatprep.subr.mxu0 %v8105_v0  ;;  %6349 = vmatprep.subr.mxu1 %v8105_v0 }
  0xc0   : > { %6323 = vmatpush3.msra.mxu0 %v8485_v8  ;;  %6350 = vmatpush3.msra.mxu1 %v8402_v25 }
  0xc1   : > { %6324 = vmatprep.subr.mxu0 %v8105_v0  ;;  %6351 = vmatprep.subr.mxu1 %v8105_v0 }
  0xc2   : > { %6325 = vmatpush3.msra.mxu0 %v8500_v31  ;;  %6352 = vmatpush3.msra.mxu1 %v8406_v28 }
  0xc3   : > { %6326 = vmatprep.subr.mxu0 %v8105_v0  ;;  %6353 = vmatprep.subr.mxu1 %v8105_v0 }
  0xc4   : > { %6327 = vmatpush3.msra.mxu0 %v8512_v38  ;;  %6354 = vmatpush3.msra.mxu1 %v8426_v35 }
  0xc5   : > { %6328 = vmatprep.subr.mxu0 %v8105_v0  ;;  %6355 = vmatprep.subr.mxu1 %v8105_v0 }
  0xc6   : > { %6329 = vmatpush3.msra.mxu0 %v8523_v49  ;;  %6356 = vmatpush3.msra.mxu1 %v8441_v45 }
  0xc7   : > { %6330 = vmatprep.subr.mxu0 %v8105_v0  ;;  %6357 = vmatprep.subr.mxu1 %v8105_v0 }
  0xc8   : > { %6331 = vmatpush3.msra.mxu0 %v8533_v54  ;;  %6332 = vmatprep.mubr.msk.f32.mxu0 %vm8106_vm0, %v8105_v0 }
  0xc9   : > { %6358 = vmatpush3.msra.mxu1 %v8449_v48  ;;  %6333 = vmatmul.mubr.f32.vlgmr.msra.gmra.mxu0 %v8497_v26 }
  0xca   : > { %6359 = vmatprep.subr.mxu1 %v8105_v0  ;;  %6370 = vmatprep.subr.mxu0 %v8105_v0 }
  0xcb   : > { %6360 = vmatpush3.msra.mxu1 %v8468_v59  ;;  %6371 = vmatpush3.msra.mxu0 %v689_v22 }
  0xcc   : > { %6361 = vmatprep.subr.mxu1 %v8105_v0  ;;  %6372 = vmatprep.subr.mxu0 %v8105_v0 }
  0xcd   : > { %6362 = vmatpush3.msra.mxu1 %v8477_v63  ;;  %6373 = vmatpush3.msra.mxu0 %v696_v23 }
  0xce   : > { %6363 = vmatprep.subr.mxu1 %v8105_v0  ;;  %6374 = vmatprep.subr.mxu0 %v8105_v0 }
  0xcf   : > { %6364 = vmatpush3.msra.mxu1 %v8492_v13  ;;  %6375 = vmatpush3.msra.mxu0 %v703_v24 }
  0xd0   : > { %6365 = vmatprep.subr.mxu1 %v8105_v0  ;;  %6376 = vmatprep.subr.mxu0 %v8105_v0 }
  0xd1   : > { %6366 = vmatpush3.msra.mxu1 %v8504_v32  ;;  %6367 = vmatprep.mubr.msk.f32.mxu1 %vm8106_vm0, %v8105_v0 }
  0xd2   : > { %6377 = vmatpush3.msra.mxu0 %v710_v27  ;;  %6368 = vmatmul.mubr.f32.vlgmr.msra.gmra.mxu1 %v678_v42 }
  0xd3   : > { %6378 = vmatprep.subr.mxu0 %v8105_v0  ;;  %6405 = vmatprep.subr.mxu1 %v8105_v0 }
  0xd4   : > { %6379 = vmatpush3.msra.mxu0 %v717_v29  ;;  %6406 = vmatpush3.msra.mxu1 %v8367_v4 }
  0xd5   : > { %6380 = vmatprep.subr.mxu0 %v8105_v0  ;;  %6407 = vmatprep.subr.mxu1 %v8105_v0 }
  0xd6   : > { %6381 = vmatpush3.msra.mxu0 %v724_v40  ;;  %6408 = vmatpush3.msra.mxu1 %v8369_v5  ;;  %v516_v40 = vld [vmem:[#allocation7 + $0x68] sm:$0xff] }
  0xd7   : > { %6382 = vmatprep.subr.mxu0 %v8105_v0  ;;  %6409 = vmatprep.subr.mxu1 %v8105_v0 }
  0xd8   : > { %6383 = vmatpush3.msra.mxu0 %v731_v46  ;;  %6410 = vmatpush3.msra.mxu1 %v8371_v6  ;;  %v8744_v46 = vand.u32 4294901760, %v516_v40 }
  0xd9   : > { %6384 = vmatprep.subr.mxu0 %v8105_v0  ;;  %6411 = vmatprep.subr.mxu1 %v8105_v0 }
  0xda   : > { %6385 = vmatpush3.msra.mxu0 %v738_v53  ;;  %6412 = vmatpush3.msra.mxu1 %v8373_v10  ;;  %v513_v53 = vld [vmem:[#allocation7 + $0x50] sm:$0xff]  ;;  %v8759_v8 = vsub.f32 %v516_v40, %v8744_v46 }
  0xdb   : > { %6386 = vmatprep.subr.mxu0 %v8105_v0  ;;  %6413 = vmatprep.subr.mxu1 %v8105_v0 }
  0xdc   : > { %6387 = vmatpush3.msra.mxu0 %v745_v57  ;;  %6414 = vmatpush3.msra.mxu1 %v8375_v11  ;;  %v1390_v42 = vand.u32 4294901760, %v8759_v8 }
  0xdd   : > { %6388 = vmatprep.subr.mxu0 %v8105_v0  ;;  %6415 = vmatprep.subr.mxu1 %v8105_v0 }
  0xde   : > { %6389 = vmatpush3.msra.mxu0 %v752_v3  ;;  %6416 = vmatpush3.msra.mxu1 %v8377_v12  ;;  %v1391_v58 = vsub.f32 %v8759_v8, %v1390_v42 }
  0xdf   : > { %6390 = vmatprep.subr.mxu0 %v8105_v0  ;;  %6417 = vmatprep.subr.mxu1 %v8105_v0 }
  0xe0   : > { %6391 = vmatpush3.msra.mxu0 %v759_v19  ;;  %6418 = vmatpush3.msra.mxu1 %v8386_v17  ;;  %v5505_v17 = vld [vmem:[%s11044_s2] ss:$0 sm:$0xff]  ;;  %v8765_v19 = vsub.f32 %v515_v47, %v8746_v55  ;;  %v1392_v51 = vand.u32 4294901760, %v1391_v58 }
  0xe1   : > { %6392 = vmatprep.subr.mxu0 %v8105_v0  ;;  %6419 = vmatprep.subr.mxu1 %v8105_v0 }
  0xe2   : > { %6393 = vmatpush3.msra.mxu0 %v766_v37  ;;  %6420 = vmatpush3.msra.mxu1 %v8402_v25 }
  0xe3   : > { %6394 = vmatprep.subr.mxu0 %v8105_v0  ;;  %6421 = vmatprep.subr.mxu1 %v8105_v0 }
  0xe4   : > { %6395 = vmatpush3.msra.mxu0 %v773_v44  ;;  %6422 = vmatpush3.msra.mxu1 %v8406_v28  ;;  %v1397_v44 = vand.u32 4294901760, %v8765_v19 }
  0xe5   : > { %6396 = vmatprep.subr.mxu0 %v8105_v0  ;;  %6423 = vmatprep.subr.mxu1 %v8105_v0 }
  0xe6   : > { %6397 = vmatpush3.msra.mxu0 %v780_v52  ;;  %6424 = vmatpush3.msra.mxu1 %v8426_v35  ;;  %v517_v35 = vld [vmem:[#allocation7 + $0x70] sm:$0xff]  ;;  %v1398_v36 = vsub.f32 %v8765_v19, %v1397_v44 }
  0xe7   : > { %6398 = vmatprep.subr.mxu0 %v8105_v0  ;;  %6425 = vmatprep.subr.mxu1 %v8105_v0 }
  0xe8   : > { %6399 = vmatpush3.msra.mxu0 %v787_v1  ;;  %6426 = vmatpush3.msra.mxu1 %v8441_v45  ;;  %v8742_v45 = vand.u32 4294901760, %v517_v35 }
  0xe9   : > { %6400 = vmatprep.subr.mxu0 %v8105_v0  ;;  %6427 = vmatprep.subr.mxu1 %v8105_v0 }
  0xea   : > { %6401 = vmatpush3.msra.mxu0 %v794_v9  ;;  %6402 = vmatprep.mubr.msk.f32.mxu0 %vm8106_vm0, %v8105_v0  ;;  %v8756_v3 = vsub.f32 %v517_v35, %v8742_v45  ;;  %v508_v9 = vld [vmem:[#allocation7 + $0x28] sm:$0xff] }
  0xeb   : > { %6428 = vmatpush3.msra.mxu1 %v8449_v48  ;;  %6403 = vmatmul.mubr.f32.vlgmr.msra.gmra.mxu0 %v8473_v62  ;;  %v514_v48 = vld [vmem:[#allocation7 + $0x58] sm:$0xff] }
  0xec   : > { %6429 = vmatprep.subr.mxu1 %v8105_v0  ;;  %6437 = vmatprep.mubr.msk.f32.mxu1 %vm8106_vm0, %v8105_v0  ;;  %v8748_v57 = vand.u32 4294901760, %v514_v48  ;;  %v1383_v38 = vand.u32 4294901760, %v8756_v3 }
  0xed   : > { %6430 = vmatpush3.msra.mxu1 %v8468_v59  ;;  %6440 = vmatprep.subr.mxu0 %v8105_v0  ;;  %v8750_v59 = vand.u32 4294901760, %v513_v53 }
  0xee   : > { %6431 = vmatprep.subr.mxu1 %v8105_v0  ;;  %6472 = vmatprep.mubr.msk.f32.mxu0 %vm8106_vm0, %v8105_v0  ;;  %v8768_v26 = vsub.f32 %v514_v48, %v8748_v57  ;;  %v1384_v56 = vsub.f32 %v8756_v3, %v1383_v38  ;;  %v503_v48 = vld [vmem:[#allocation7] sm:$0xff] }
  0xef   : > { %6432 = vmatpush3.msra.mxu1 %v8477_v63  ;;  %v8753_v63 = vsub.f32 %v518_v34, %v8740_v43  ;;  %6441 = vmatpush3.msra.mxu0 %v8740_v43  ;;  %v8772_v31 = vsub.f32 %v513_v53, %v8750_v59 }
  0xf0   : > { %6433 = vmatprep.subr.mxu1 %v8105_v0  ;;  %6442 = vmatprep.subr.mxu0 %v8105_v0  ;;  %v1404_v49 = vand.u32 4294901760, %v8768_v26  ;;  %v1385_v33 = vand.u32 4294901760, %v1384_v56 }
  0xf1   : > { %6434 = vmatpush3.msra.mxu1 %v8492_v13  ;;  %v8762_v13 = vand.u32 4294901760, %v512_v61  ;;  %v1376_v37 = vand.u32 4294901760, %v8753_v63  ;;  %6443 = vmatpush3.msra.mxu0 %v8742_v45  ;;  %v1411_v60 = vand.u32 4294901760, %v8772_v31 }
  0xf2   : > { %6435 = vmatprep.subr.mxu1 %v8105_v0  ;;  %6444 = vmatprep.subr.mxu0 %v8105_v0  ;;  %v1405_v39 = vsub.f32 %v8768_v26, %v1404_v49 }
  0xf3   : > { %6436 = vmatpush3.msra.mxu1 %v8504_v32  ;;  %v8784_v52 = vsub.f32 %v512_v61, %v8762_v13  ;;  %v1377_v54 = vsub.f32 %v8753_v63, %v1376_v37  ;;  %6445 = vmatpush3.msra.mxu0 %v8744_v46 }
  0xf4   : > { %6438 = vmatmul.mubr.f32.vlgmr.msra.gmra.mxu1 %v8473_v62  ;;  %6475 = vmatprep.subr.mxu1 %v8105_v0  ;;  %v511_v62 = vld [vmem:[#allocation7 + $0x40] sm:$0xff] }
  0xf5   : > { %6507 = vmatprep.mubr.msk.f32.mxu1 %vm8106_vm0, %v8105_v0  ;;  %v8774_v32 = vand.u32 4294901760, %v511_v62  ;;  %6446 = vmatprep.subr.mxu0 %v8105_v0  ;;  %v1378_v14 = vand.u32 4294901760, %v1377_v54  ;;  %v1418_v41 = vand.u32 4294901760, %v8784_v52 }
  0xf6   : > { %6447 = vmatpush3.msra.mxu0 %v8746_v55 }
  0xf7   : > { %v8799_v1 = vsub.f32 %v511_v62, %v8774_v32  ;;  %6448 = vmatprep.subr.mxu0 %v8105_v0  ;;  %6476 = vmatpush3.msra.mxu1 %v1378_v14 }
  0xf8   : > { %6449 = vmatpush3.msra.mxu0 %v8748_v57  ;;  %6477 = vmatprep.subr.mxu1 %v8105_v0 }
  0xf9   : > { %6450 = vmatprep.subr.mxu0 %v8105_v0  ;;  %6478 = vmatpush3.msra.mxu1 %v1385_v33 }
  0xfa   : > { %6451 = vmatpush3.msra.mxu0 %v8750_v59  ;;  %6479 = vmatprep.subr.mxu1 %v8105_v0 }
  0xfb   : > { %6452 = vmatprep.subr.mxu0 %v8105_v0  ;;  %6480 = vmatpush3.msra.mxu1 %v1392_v51 }
  0xfc   : > { %6453 = vmatpush3.msra.mxu0 %v8762_v13  ;;  %6481 = vmatprep.subr.mxu1 %v8105_v0 }
  0xfd   : > { %6454 = vmatprep.subr.mxu0 %v8105_v0 }
  0xfe   : > { %6455 = vmatpush3.msra.mxu0 %v8774_v32 }
  0xff   : > { %6456 = vmatprep.subr.mxu0 %v8105_v0 }
 0x169   : > { %v682_v4 = vpop.f32.mrf.mxu0 }
 0x16a   : > { %v683_v18 = vadd.f32 %v5505_v17, %v682_v4  ;;  %v8811_v4 = vand.u32 4294901760, %v510_v2 }
 0x16b   : > { %v6264_v5 = vpop.f32.mrf.mxu0 }
 0x16c   : > { %v8813_v5 = vand.u32 4294901760, %v509_v7  ;;  %6457 = vmatpush3.msra.mxu0 %v8811_v4 }
 0x16d   : > { %6458 = vmatprep.subr.mxu0 %v8105_v0 }
 0x16e   : > { %v8828_v17 = vsub.f32 %v509_v7, %v8813_v5  ;;  %6459 = vmatpush3.msra.mxu0 %v8813_v5 }
 0x16f   : > { %6460 = vmatprep.subr.mxu0 %v8105_v0 }
 0x170   : > { %v833_v6 = vpop.f32.mrf.mxu1  ;;  %v11064_v34 = vand.u32 4294901760, %v8828_v17 }
 0x171   : > { %v834_v21 = vadd.f32 %v833_v6, %v683_v18  ;;  %v8815_v6 = vand.u32 4294901760, %v508_v9  ;;  %v8830_v18 = vand.u32 4294901760, %v507_v50 }
 0x172   : > { %v6299_v10 = vpop.f32.mrf.mxu1  ;;  %v1440_v58 = vsub.f32 %v8828_v17, %v11064_v34 }
 0x173   : > { %v1412_v10 = vsub.f32 %v8772_v31, %v1411_v60  ;;  %v8852_v35 = vsub.f32 %v507_v50, %v8830_v18  ;;  %6461 = vmatpush3.msra.mxu0 %v8815_v6 }
 0x174   : > { %6462 = vmatprep.subr.mxu0 %v8105_v0  ;;  %v1441_v50 = vand.u32 4294901760, %v1440_v58 }
 0x175   : > { %6463 = vmatpush3.msra.mxu0 %v8830_v18 }
 0x176   : > { %6464 = vmatprep.subr.mxu0 %v8105_v0 }
 0x189   : > { %v937_v11 = vpop.f32.mrf.mxu0 }
 0x18a   : > { %v938_v23 = vadd.f32 %v937_v11, %v834_v21  ;;  %v1425_v11 = vand.u32 4294901760, %v8799_v1  ;;  %v505_v21 = vld [vmem:[#allocation7 + $0x10] sm:$0xff] }
 0x18b   : > { %v6334_v12 = vpop.f32.mrf.mxu0  ;;  %v8854_v40 = vand.u32 4294901760, %v505_v21 }
 0x18c   : > { %v506_v12 = vld [vmem:[#allocation7 + $0x18] sm:$0xff] }
 0x18d   : > { %v8876_v7 = vsub.f32 %v505_v21, %v8854_v40 }
 0x192   : > { %v1026_v15 = vpop.f32.mrf.mxu1 }
 0x193   : > { %v1027_v24 = vadd.f32 %v1026_v15, %v938_v23  ;;  %v1399_v15 = vand.u32 4294901760, %v1398_v36 }
 0x194   : > { %v6369_v16 = vpop.f32.mrf.mxu1 }
 0x195   : > { %v8824_v16 = vsub.f32 %v510_v2, %v8811_v4  ;;  %6482 = vmatpush3.msra.mxu1 %v1399_v15  ;;  %v11062_v2 = vand.u32 4294901760, %v8852_v35 }
 0x196   : > { %6483 = vmatprep.subr.mxu1 %v8105_v0 }
 0x197   : > { %v11065_v23 = vand.u32 4294901760, %v8824_v16  ;;  %v1454_v51 = vsub.f32 %v8852_v35, %v11062_v2 }
 0x199   : > { %v1433_v53 = vsub.f32 %v8824_v16, %v11065_v23 }
 0x19b   : > { %v1434_v14 = vand.u32 4294901760, %v1433_v53 }
 0x1ab   : > { %v1145_v20 = vpop.f32.mrf.mxu0 }
 0x1ac   : > { %v1146_v25 = vadd.f32 %v1145_v20, %v1027_v24  ;;  %v1419_v20 = vsub.f32 %v8784_v52, %v1418_v41  ;;  %v8840_v24 = vsub.f32 %v508_v9, %v8815_v6  ;;  %v8878_v9 = vand.u32 4294901760, %v503_v48 }
 0x1ad   : > { %v6404_v22 = vpop.f32.mrf.mxu0 }
 0x1ae   : > { %v1406_v22 = vand.u32 4294901760, %v1405_v39  ;;  %v1420_v47 = vand.u32 4294901760, %v1419_v20  ;;  %v11063_v61 = vand.u32 4294901760, %v8840_v24 }
 0x1b0   : > { %6484 = vmatpush3.msra.mxu1 %v1406_v22  ;;  %v1447_v33 = vsub.f32 %v8840_v24, %v11063_v61  ;;  %v1455_v22 = vand.u32 4294901760, %v1454_v51 }
 0x1b1   : > { %6485 = vmatprep.subr.mxu1 %v8105_v0 }
 0x1b2   : > { %v1448_v15 = vand.u32 4294901760, %v1447_v33 }
 0x1b4   : > { %v1232_v27 = vpop.f32.mrf.mxu1 }
 0x1b5   : > { %v8735_v28 = vadd.f32 %v1232_v27, %v1146_v25  ;;  %v8842_v25 = vand.u32 4294901760, %v506_v12  ;;  %v1426_v27 = vsub.f32 %v8799_v1, %v1425_v11 }
 0x1b6   : > { %v6439_v29 = vpop.f32.mrf.mxu1 }
 0x1b7   : > { %1236 = vadd.xlane.f32.xlu0 %v8735_v28  ;;  %v1239_v30 = vmul.f32 %v8735_v28, %v8735_v28  ;;  %v504_v29 = vld [vmem:[#allocation7 + $0x8] sm:$0xff]  ;;  %v8864_v62 = vsub.f32 %v506_v12, %v8842_v25  ;;  %v1427_v56 = vand.u32 4294901760, %v1426_v27  ;;  %v8898_v12 = vsub.f32 %v503_v48, %v8878_v9  ;;  %6465 = vmatpush3.msra.mxu0 %v8842_v25 }
 0x1b8   : > { %v8866_v54 = vand.u32 4294901760, %v504_v29  ;;  %6466 = vmatprep.subr.mxu0 %v8105_v0 }
 0x1b9   : > { %v11061_v36 = vand.u32 4294901760, %v8864_v62  ;;  %6467 = vmatpush3.msra.mxu0 %v8854_v40 }
 0x1ba   : > { %v8888_v39 = vsub.f32 %v504_v29, %v8866_v54  ;;  %v11058_v29 = vand.u32 4294901760, %v8898_v12  ;;  %6468 = vmatprep.subr.mxu0 %v8105_v0 }
 0x1bb   : > { %1240 = vadd.xlane.f32.xlu0 %v1239_v30  ;;  %v1413_v30 = vand.u32 4294901760, %v1412_v10  ;;  %v11060_v10 = vand.u32 4294901760, %v8876_v7  ;;  %v1461_v20 = vsub.f32 %v8864_v62, %v11061_v36  ;;  %6469 = vmatpush3.msra.mxu0 %v8866_v54 }
 0x1bc   : > { %v11059_v21 = vand.u32 4294901760, %v8888_v39  ;;  %6470 = vmatprep.subr.mxu0 %v8105_v0  ;;  %v1482_v53 = vsub.f32 %v8898_v12, %v11058_v29 }
 0x1bd   : > { %6486 = vmatpush3.msra.mxu1 %v1413_v30  ;;  %v1468_v27 = vsub.f32 %v8876_v7, %v11060_v10  ;;  %v1462_v30 = vand.u32 4294901760, %v1461_v20  ;;  %6471 = vmatpush3.msra.mxu0 %v8878_v9 }
 0x1be   : > { %6487 = vmatprep.subr.mxu1 %v8105_v0  ;;  %6510 = vmatprep.subr.mxu0 %v8105_v0  ;;  %v1483_v58 = vand.u32 4294901760, %v1482_v53 }
 0x1bf   : > { %6488 = vmatpush3.msra.mxu1 %v1420_v47  ;;  %v1475_v47 = vsub.f32 %v8888_v39, %v11059_v21  ;;  %v1469_v48 = vand.u32 4294901760, %v1468_v27 }
 0x1c0   : > { %6489 = vmatprep.subr.mxu1 %v8105_v0 }
 0x1c1   : > { %6490 = vmatpush3.msra.mxu1 %v1427_v56  ;;  %v1476_v56 = vand.u32 4294901760, %v1475_v47 }
 0x1c2   : > { %6491 = vmatprep.subr.mxu1 %v8105_v0 }
 0x1c3   : > { %6492 = vmatpush3.msra.mxu1 %v1434_v14 }
 0x1c4   : > { %6493 = vmatprep.subr.mxu1 %v8105_v0 }
 0x1c5   : > { %6494 = vmatpush3.msra.mxu1 %v1441_v50 }
 0x1c6   : > { %6495 = vmatprep.subr.mxu1 %v8105_v0 }
 0x1c7   : > { %6496 = vmatpush3.msra.mxu1 %v1448_v15 }
 0x1c8   : > { %6497 = vmatprep.subr.mxu1 %v8105_v0 }
 0x1c9   : > { %6498 = vmatpush3.msra.mxu1 %v1455_v22 }
 0x1ca   : > { %6499 = vmatprep.subr.mxu1 %v8105_v0 }
 0x1cb   : > { %6500 = vmatpush3.msra.mxu1 %v1462_v30 }
 0x1cc   : > { %6501 = vmatprep.subr.mxu1 %v8105_v0 }
 0x1cd   : > { %6502 = vmatpush3.msra.mxu1 %v1469_v48 }
 0x1ce   : > { %6503 = vmatprep.subr.mxu1 %v8105_v0 }
 0x1cf   : > { %6504 = vmatpush3.msra.mxu1 %v1476_v56 }
 0x1d0   : > { %6505 = vmatprep.subr.mxu1 %v8105_v0 }
 0x1d1   : > { %6506 = vmatpush3.msra.mxu1 %v1483_v58 }
 0x1d2   : > { %6545 = vmatprep.subr.mxu1 %v8105_v0 }
 0x240   : > { %v1237_v14 = vpop.xlane.xlu0 %1236 }
 0x241   : > { %v1238_v33 = vmul.f32 0.03125, %v1237_v14 }
 0x243   : > { %v1243_v51 = vmul.f32 %v1238_v33, %v1238_v33  ;;  %v1247_v27 = vsub.f32 %v8735_v28, %v1238_v33 }
 0x244   : > { %v1241_v50 = vpop.xlane.xlu0 %1240 }
 0x245   : > { %v1242_v15 = vmul.f32 0.03125, %v1241_v50 }
 0x247   : > { %v1244_v20 = vsub.f32 %v1242_v15, %v1243_v51 }
 0x249   : > { %v1245_v22 = vadd.f32 1e-05, %v1244_v20 }
 0x24b   : > { %7807 = vrsqrt.f32 %v1245_v22 }
 0x258   : > { %v8933_v30 = vpop.eup %7807 }
 0x259   : > { %v8936_v47 = vmul.f32 %v8933_v30, %v1247_v27 }
 0x25b   : > { %v1249_v48 = vmul.f32 0.70710677, %v8936_v47 }
 0x25d   : > { %v1252_v53 = vand.u32 2147483647, %v1249_v48  ;;  %vm1250_vm1 = vcmp.ge.f32.partialorder %v1249_v48, 0.0 }
 0x25f   : > { %v1253_v56 = vmul.f32 0.3275911, %v1252_v53  ;;  %v1266_v14 = vsub.f32 0.0, %v1252_v53 }
 0x261   : > { %v1254_v58 = vadd.f32 1.0, %v1253_v56  ;;  %v1267_v29 = vmul.f32 %v1266_v14, %v1252_v53  ;;  %v8107_v56 = vmov -1.0  }
 0x263   : > { %7809 = vrcp.f32 %v1254_v58  ;;  %v1268_v51 = vmul.f32 1.442695, %v1267_v29  ;;  %v1251_v58 = vsel %vm1250_vm1, 1.0, %v8107_v56 }
 0x265   : > { %7811 = vpow2.f32 %v1268_v51 }
 0x270   : > { %v7810_v21 = vpop.eup %7809 }
 0x271   : > { %v1257_v50 = vmul.f32 1.0614054, %v7810_v21 }
 0x272   : > { %v7812_v2 = vpop.eup %7811 }
 0x273   : > { %v1258_v15 = vadd.f32 -1.4531521, %v1257_v50 }
 0x275   : > { %v1259_v20 = vmul.f32 %v7810_v21, %v1258_v15 }
 0x277   : > { %v1260_v28 = vadd.f32 1.4214138, %v1259_v20 }
 0x279   : > { %v1261_v33 = vmul.f32 %v7810_v21, %v1260_v28 }
 0x27b   : > { %v1262_v22 = vadd.f32 -0.28449672, %v1261_v33 }
 0x27d   : > { %v1263_v10 = vmul.f32 %v7810_v21, %v1262_v22 }
 0x27f   : > { %v1264_v27 = vadd.f32 0.2548296, %v1263_v10  ;;  %v529_v10 = vld [vmem:[#allocation7 + $0xc8] sm:$0xff] }
 0x280   : > { %v9141_v20 = vand.u32 4294901760, %v529_v10 }
 0x281   : > { %v1265_v36 = vmul.f32 %v7810_v21, %v1264_v27 }
 0x283   : > { %v1270_v61 = vmul.f32 %v7812_v2, %v1265_v36 }
 0x285   : > { %v1271_v34 = vsub.f32 1.0, %v1270_v61 }
 0x287   : > { %v1272_v53 = vmul.f32 %v1271_v34, %v1251_v58 }
 0x289   : > { %v1273_v14 = vadd.f32 1.0, %v1272_v53 }
 0x28b   : > { %v8940_v23 = vmul.f32 0.5, %v1273_v14 }
 0x28d   : > { %v1275_v29 = vmul.f32 %v8940_v23, %v8936_v47 }
 0x28f   : > { %v8944_v50 = vand.u32 4294901760, %v1275_v29 }
 0x291   : > { %v8947_v51 = vsub.f32 %v1275_v29, %v8944_v50  ;;  %6508 = vmatmul.mubr.f32.vlgmr.msra.gmra.mxu1 %v8944_v50 }
 0x292   : > { %6546 = vmatpush3.msra.mxu1 %v8740_v43  ;;  %6577 = vmatprep.mubr.msk.f32.mxu1 %vm8106_vm0, %v8105_v0 }
 0x293   : > { %6547 = vmatprep.subr.mxu1 %v8105_v0  ;;  %v1365_v34 = vand.u32 4294901760, %v8947_v51 }
 0x294   : > { %6548 = vmatpush3.msra.mxu1 %v8742_v45 }
 0x295   : > { %6549 = vmatprep.subr.mxu1 %v8105_v0  ;;  %v1366_v61 = vsub.f32 %v8947_v51, %v1365_v34 }
 0x296   : > { %6550 = vmatpush3.msra.mxu1 %v8744_v46 }
 0x297   : > { %6551 = vmatprep.subr.mxu1 %v8105_v0  ;;  %v1367_v2 = vand.u32 4294901760, %v1366_v61 }
 0x298   : > { %6552 = vmatpush3.msra.mxu1 %v8746_v55 }
 0x299   : > { %6553 = vmatprep.subr.mxu1 %v8105_v0  ;;  %6473 = vmatmul.mubr.f32.vlgmr.msra.gmra.mxu0 %v1367_v2 }
 0x29a   : > { %6511 = vmatpush3.msra.mxu0 %v8753_v63  ;;  %6554 = vmatpush3.msra.mxu1 %v8748_v57  ;;  %v11133_v63 = vand.u32 4294901760, %v8888_v39 }
 0x29b   : > { %6512 = vmatprep.subr.mxu0 %v8105_v0  ;;  %6555 = vmatprep.subr.mxu1 %v8105_v0 }
 0x29c   : > { %6513 = vmatpush3.msra.mxu0 %v8756_v3  ;;  %6556 = vmatpush3.msra.mxu1 %v8750_v59  ;;  %v11134_v3 = vand.u32 4294901760, %v8898_v12 }
 0x29d   : > { %6514 = vmatprep.subr.mxu0 %v8105_v0  ;;  %6557 = vmatprep.subr.mxu1 %v8105_v0 }
 0x29e   : > { %6515 = vmatpush3.msra.mxu0 %v8759_v8  ;;  %6558 = vmatpush3.msra.mxu1 %v8762_v13 }
 0x29f   : > { %6516 = vmatprep.subr.mxu0 %v8105_v0  ;;  %6559 = vmatprep.subr.mxu1 %v8105_v0 }
 0x2a0   : > { %6517 = vmatpush3.msra.mxu0 %v8765_v19  ;;  %6560 = vmatpush3.msra.mxu1 %v8774_v32 }
 0x2a1   : > { %6518 = vmatprep.subr.mxu0 %v8105_v0  ;;  %6561 = vmatprep.subr.mxu1 %v8105_v0 }
 0x2a2   : > { %6519 = vmatpush3.msra.mxu0 %v8768_v26  ;;  %6562 = vmatpush3.msra.mxu1 %v8811_v4 }
 0x2a3   : > { %6520 = vmatprep.subr.mxu0 %v8105_v0  ;;  %6563 = vmatprep.subr.mxu1 %v8105_v0 }
 0x2a4   : > { %6521 = vmatpush3.msra.mxu0 %v8772_v31  ;;  %6564 = vmatpush3.msra.mxu1 %v8813_v5 }
 0x2a5   : > { %6522 = vmatprep.subr.mxu0 %v8105_v0  ;;  %6565 = vmatprep.subr.mxu1 %v8105_v0 }
 0x2a6   : > { %6523 = vmatpush3.msra.mxu0 %v8784_v52  ;;  %6566 = vmatpush3.msra.mxu1 %v8815_v6 }
 0x2a7   : > { %6524 = vmatprep.subr.mxu0 %v8105_v0  ;;  %6567 = vmatprep.subr.mxu1 %v8105_v0 }
 0x2a8   : > { %6525 = vmatpush3.msra.mxu0 %v8799_v1  ;;  %6568 = vmatpush3.msra.mxu1 %v8830_v18 }
 0x2a9   : > { %6526 = vmatprep.subr.mxu0 %v8105_v0  ;;  %6569 = vmatprep.subr.mxu1 %v8105_v0 }
 0x2aa   : > { %6527 = vmatpush3.msra.mxu0 %v8824_v16  ;;  %6570 = vmatpush3.msra.mxu1 %v8842_v25 }
 0x2ab   : > { %6528 = vmatprep.subr.mxu0 %v8105_v0  ;;  %6571 = vmatprep.subr.mxu1 %v8105_v0 }
 0x2ac   : > { %6529 = vmatpush3.msra.mxu0 %v8828_v17  ;;  %6572 = vmatpush3.msra.mxu1 %v8854_v40 }
 0x2ad   : > { %6530 = vmatprep.subr.mxu0 %v8105_v0  ;;  %6573 = vmatprep.subr.mxu1 %v8105_v0 }
 0x2ae   : > { %6531 = vmatpush3.msra.mxu0 %v8840_v24  ;;  %6574 = vmatpush3.msra.mxu1 %v8866_v54 }
 0x2af   : > { %6532 = vmatprep.subr.mxu0 %v8105_v0  ;;  %6575 = vmatprep.subr.mxu1 %v8105_v0 }
 0x2b0   : > { %6533 = vmatpush3.msra.mxu0 %v8852_v35  ;;  %6576 = vmatpush3.msra.mxu1 %v8878_v9 }
 0x2b1   : > { %6534 = vmatprep.subr.mxu0 %v8105_v0  ;;  %6578 = vmatmul.mubr.f32.vlgmr.msra.gmra.mxu1 %v1365_v34 }
 0x2b2   : > { %6615 = vmatprep.subr.mxu1 %v8105_v0  ;;  %6535 = vmatpush3.msra.mxu0 %v8864_v62 }
 0x2b3   : > { %6616 = vmatpush3.msra.mxu1 %v8740_v43  ;;  %6536 = vmatprep.subr.mxu0 %v8105_v0  ;;  %v11127_v43 = vand.u32 4294901760, %v8824_v16 }
 0x2b4   : > { %6617 = vmatprep.subr.mxu1 %v8105_v0  ;;  %6537 = vmatpush3.msra.mxu0 %v8876_v7 }
 0x2b5   : > { %6618 = vmatpush3.msra.mxu1 %v8742_v45  ;;  %6538 = vmatprep.subr.mxu0 %v8105_v0  ;;  %v11128_v45 = vand.u32 4294901760, %v8828_v17  ;;  %v535_v17 = vld [vmem:[#allocation7 + $0xf8] sm:$0xff] }
 0x2b6   : > { %6619 = vmatprep.subr.mxu1 %v8105_v0  ;;  %6539 = vmatpush3.msra.mxu0 %v8888_v39 }
 0x2b7   : > { %6620 = vmatpush3.msra.mxu1 %v8744_v46  ;;  %6540 = vmatprep.subr.mxu0 %v8105_v0  ;;  %v11129_v46 = vand.u32 4294901760, %v8840_v24  ;;  %v533_v24 = vld [vmem:[#allocation7 + $0xe8] sm:$0xff] }
 0x2b8   : > { %6621 = vmatprep.subr.mxu1 %v8105_v0  ;;  %6541 = vmatpush3.msra.mxu0 %v8898_v12  ;;  %v528_v12 = vld [vmem:[#allocation7 + $0xc0] sm:$0xff] }
 0x2b9   : > { %6542 = vmatprep.mubr.msk.f32.mxu0 %vm8106_vm0, %v8105_v0  ;;  %6622 = vmatpush3.msra.mxu1 %v8746_v55  ;;  %v11130_v55 = vand.u32 4294901760, %v8852_v35  ;;  %v9153_v27 = vand.u32 4294901760, %v528_v12 }
 0x2ba   : > { %6543 = vmatmul.mubr.f32.vlgmr.msra.gmra.mxu0 %v8947_v51  ;;  %6580 = vmatprep.subr.mxu0 %v8105_v0  ;;  %v9163_v51 = vsub.f32 %v529_v10, %v9141_v20 }
 0x2bb   : > { %6623 = vmatprep.subr.mxu1 %v8105_v0  ;;  %6581 = vmatpush3.msra.mxu0 %v1376_v37 }
 0x2bc   : > { %6624 = vmatpush3.msra.mxu1 %v8748_v57  ;;  %6582 = vmatprep.subr.mxu0 %v8105_v0  ;;  %v11131_v57 = vand.u32 4294901760, %v8864_v62  ;;  %v532_v62 = vld [vmem:[#allocation7 + $0xe0] sm:$0xff] }
 0x2bd   : > { %6625 = vmatprep.subr.mxu1 %v8105_v0  ;;  %6583 = vmatpush3.msra.mxu0 %v1383_v38 }
 0x2be   : > { %6626 = vmatpush3.msra.mxu1 %v8750_v59  ;;  %6584 = vmatprep.subr.mxu0 %v8105_v0  ;;  %v11132_v59 = vand.u32 4294901760, %v8876_v7  ;;  %v530_v7 = vld [vmem:[#allocation7 + $0xd0] sm:$0xff] }
 0x2bf   : > { %6627 = vmatprep.subr.mxu1 %v8105_v0  ;;  %6585 = vmatpush3.msra.mxu0 %v1390_v42  ;;  %v5506_v42 = vld [vmem:[%s11046_s4] ss:$0 sm:$0xff]  ;;  %v9129_v39 = vand.u32 4294901760, %v530_v7 }
 0x2c0   : > { %6628 = vmatpush3.msra.mxu1 %v8762_v13  ;;  %6586 = vmatprep.subr.mxu0 %v8105_v0 }
 0x2c1   : > { %6629 = vmatprep.subr.mxu1 %v8105_v0  ;;  %6587 = vmatpush3.msra.mxu0 %v1397_v44  ;;  %v9151_v22 = vsub.f32 %v530_v7, %v9129_v39 }
 0x2c2   : > { %6630 = vmatpush3.msra.mxu1 %v8774_v32  ;;  %6588 = vmatprep.subr.mxu0 %v8105_v0 }
 0x2c3   : > { %6631 = vmatprep.subr.mxu1 %v8105_v0  ;;  %6589 = vmatpush3.msra.mxu0 %v1404_v49 }
 0x2c4   : > { %6632 = vmatpush3.msra.mxu1 %v8811_v4  ;;  %6590 = vmatprep.subr.mxu0 %v8105_v0 }
 0x2c5   : > { %6633 = vmatprep.subr.mxu1 %v8105_v0  ;;  %6591 = vmatpush3.msra.mxu0 %v1411_v60 }
 0x2c6   : > { %6634 = vmatpush3.msra.mxu1 %v8813_v5  ;;  %6592 = vmatprep.subr.mxu0 %v8105_v0 }
 0x2c7   : > { %6635 = vmatprep.subr.mxu1 %v8105_v0  ;;  %6593 = vmatpush3.msra.mxu0 %v1418_v41 }
 0x2c8   : > { %6636 = vmatpush3.msra.mxu1 %v8815_v6  ;;  %6594 = vmatprep.subr.mxu0 %v8105_v0 }
 0x2c9   : > { %6637 = vmatprep.subr.mxu1 %v8105_v0  ;;  %6595 = vmatpush3.msra.mxu0 %v1425_v11 }
 0x2ca   : > { %6638 = vmatpush3.msra.mxu1 %v8830_v18  ;;  %6596 = vmatprep.subr.mxu0 %v8105_v0  ;;  %v534_v18 = vld [vmem:[#allocation7 + $0xf0] sm:$0xff] }
 0x2cb   : > { %6639 = vmatprep.subr.mxu1 %v8105_v0  ;;  %6597 = vmatpush3.msra.mxu0 %v11127_v43  ;;  %v9121_v35 = vand.u32 4294901760, %v534_v18  ;;  %v11076_v43 = vand.u32 4294901760, %v9151_v22 }
 0x2cc   : > { %6640 = vmatpush3.msra.mxu1 %v8842_v25  ;;  %6598 = vmatprep.subr.mxu0 %v8105_v0  ;;  %v9119_v25 = vand.u32 4294901760, %v535_v17 }
 0x2cd   : > { %6641 = vmatprep.subr.mxu1 %v8105_v0  ;;  %6599 = vmatpush3.msra.mxu0 %v11128_v45  ;;  %v9135_v48 = vsub.f32 %v534_v18, %v9121_v35  ;;  %v9178_v45 = vsub.f32 %v528_v12, %v9153_v27 }
 0x2ce   : > { %6642 = vmatpush3.msra.mxu1 %v8854_v40  ;;  %6600 = vmatprep.subr.mxu0 %v8105_v0  ;;  %v9123_v40 = vand.u32 4294901760, %v533_v24  ;;  %v9132_v21 = vsub.f32 %v535_v17, %v9119_v25 }
 0x2cf   : > { %6643 = vmatprep.subr.mxu1 %v8105_v0  ;;  %6601 = vmatpush3.msra.mxu0 %v11129_v46  ;;  %v2070_v53 = vand.u32 4294901760, %v9135_v48  ;;  %v527_v46 = vld [vmem:[#allocation7 + $0xb8] sm:$0xff] }
 0x2d0   : > { %6644 = vmatpush3.msra.mxu1 %v8866_v54  ;;  %6602 = vmatprep.subr.mxu0 %v8105_v0  ;;  %v531_v54 = vld [vmem:[#allocation7 + $0xd8] sm:$0xff]  ;;  %v9138_v15 = vsub.f32 %v533_v24, %v9123_v40  ;;  %v2063_v58 = vand.u32 4294901760, %v9132_v21  ;;  %v521_v24 = vld [vmem:[#allocation7 + $0x88] sm:$0xff] }
 0x2d1   : > { %6645 = vmatprep.subr.mxu1 %v8105_v0  ;;  %6603 = vmatpush3.msra.mxu0 %v11130_v55  ;;  %v9127_v36 = vand.u32 4294901760, %v531_v54  ;;  %v2071_v61 = vsub.f32 %v9135_v48, %v2070_v53  ;;  %v526_v55 = vld [vmem:[#allocation7 + $0xb0] sm:$0xff] }
 0x2d2   : > { %6646 = vmatpush3.msra.mxu1 %v8878_v9  ;;  %6647 = vmatprep.mubr.msk.f32.mxu1 %vm8106_vm0, %v8105_v0  ;;  %v9125_v9 = vand.u32 4294901760, %v532_v62  ;;  %v2077_v14 = vand.u32 4294901760, %v9138_v15  ;;  %v2064_v34 = vsub.f32 %v9132_v21, %v2063_v58 }
 0x2d3   : > { %6604 = vmatprep.subr.mxu0 %v8105_v0  ;;  %6648 = vmatmul.mubr.f32.vlgmr.msra.gmra.mxu1 %v8944_v50  ;;  %v9147_v33 = vsub.f32 %v531_v54, %v9127_v36 }
 0x2d4   : > { %6605 = vmatpush3.msra.mxu0 %v11131_v57  ;;  %6612 = vmatprep.mubr.msk.f32.mxu0 %vm8106_vm0, %v8105_v0  ;;  %v9144_v28 = vsub.f32 %v532_v62, %v9125_v9  ;;  %v2078_v2 = vsub.f32 %v9138_v15, %v2077_v14  ;;  %v525_v57 = vld [vmem:[#allocation7 + $0xa8] sm:$0xff] }
 0x2d5   : > { %6606 = vmatprep.subr.mxu0 %v8105_v0  ;;  %6685 = vmatprep.subr.mxu1 %v8105_v0 }
 0x2d6   : > { %6607 = vmatpush3.msra.mxu0 %v11132_v59  ;;  %6717 = vmatprep.mubr.msk.f32.mxu1 %vm8106_vm0, %v8105_v0  ;;  %v2084_v29 = vand.u32 4294901760, %v9144_v28  ;;  %v2065_v59 = vand.u32 4294901760, %v2064_v34  ;;  %v520_v34 = vld [vmem:[#allocation7 + $0x80] sm:$0xff] }
 0x2d7   : > { %6608 = vmatprep.subr.mxu0 %v8105_v0 }
 0x2d8   : > { %6609 = vmatpush3.msra.mxu0 %v11133_v63  ;;  %v2072_v63 = vand.u32 4294901760, %v2071_v61  ;;  %6686 = vmatpush3.msra.mxu1 %v2065_v59 }
 0x2d9   : > { %6610 = vmatprep.subr.mxu0 %v8105_v0  ;;  %6687 = vmatprep.subr.mxu1 %v8105_v0 }
 0x2da   : > { %6611 = vmatpush3.msra.mxu0 %v11134_v3  ;;  %v2085_v3 = vsub.f32 %v9144_v28, %v2084_v29  ;;  %6688 = vmatpush3.msra.mxu1 %v2072_v63 }
 0x2db   : > { %6613 = vmatmul.mubr.f32.vlgmr.msra.gmra.mxu0 %v8944_v50  ;;  %6650 = vmatprep.subr.mxu0 %v8105_v0  ;;  %v2091_v50 = vand.u32 4294901760, %v9147_v33 }
 0x2dc   : > { %6682 = vmatprep.mubr.msk.f32.mxu0 %vm8106_vm0, %v8105_v0  ;;  %6651 = vmatpush3.msra.mxu0 %v9119_v25 }
 0x2dd   : > { %6652 = vmatprep.subr.mxu0 %v8105_v0  ;;  %6689 = vmatprep.subr.mxu1 %v8105_v0 }
 0x2de   : > { %6653 = vmatpush3.msra.mxu0 %v9121_v35 }
 0x2df   : > { %6654 = vmatprep.subr.mxu0 %v8105_v0 }
 0x2e0   : > { %6655 = vmatpush3.msra.mxu0 %v9123_v40 }
 0x2e1   : > { %6656 = vmatprep.subr.mxu0 %v8105_v0 }
 0x2e2   : > { %6657 = vmatpush3.msra.mxu0 %v9125_v9 }
 0x2e3   : > { %6658 = vmatprep.subr.mxu0 %v8105_v0 }
 0x2e4   : > { %6659 = vmatpush3.msra.mxu0 %v9127_v36 }
 0x2e5   : > { %6660 = vmatprep.subr.mxu0 %v8105_v0 }
 0x2e6   : > { %6661 = vmatpush3.msra.mxu0 %v9129_v39 }
 0x2e7   : > { %6662 = vmatprep.subr.mxu0 %v8105_v0 }
 0x2e8   : > { %6663 = vmatpush3.msra.mxu0 %v9141_v20 }
 0x2e9   : > { %6664 = vmatprep.subr.mxu0 %v8105_v0 }
 0x2ea   : > { %6665 = vmatpush3.msra.mxu0 %v9153_v27 }
 0x2eb   : > { %6666 = vmatprep.subr.mxu0 %v8105_v0 }
 0x351   : > { %v1520_v8 = vpop.f32.mrf.mxu1 }
 0x353   : > { %v6509_v13 = vpop.f32.mrf.mxu1 }
 0x354   : > { %v11075_v13 = vand.u32 4294901760, %v9163_v51 }
 0x359   : > { %v1369_v19 = vpop.f32.mrf.mxu0 }
 0x35a   : > { %v1370_v44 = vadd.f32 %v5506_v42, %v1369_v19  ;;  %v524_v19 = vld [vmem:[#allocation7 + $0xa0] sm:$0xff]  ;;  %v11074_v42 = vand.u32 4294901760, %v9178_v45 }
 0x35b   : > { %v6474_v26 = vpop.f32.mrf.mxu0 }
 0x35c   : > { %v1521_v52 = vadd.f32 %v1520_v8, %v1370_v44  ;;  %v2092_v8 = vsub.f32 %v9147_v33, %v2091_v50  ;;  %v2079_v26 = vand.u32 4294901760, %v2078_v2  ;;  %v523_v44 = vld [vmem:[#allocation7 + $0x98] sm:$0xff]  ;;  %v2113_v18 = vsub.f32 %v9178_v45, %v11074_v42 }
 0x35d   : > { %v9221_v17 = vand.u32 4294901760, %v523_v44 }
 0x35e   : > { %6690 = vmatpush3.msra.mxu1 %v2079_v26 }
 0x35f   : > { %6691 = vmatprep.subr.mxu1 %v8105_v0 }
 0x371   : > { %v1713_v31 = vpop.f32.mrf.mxu1 }
 0x373   : > { %v6579_v32 = vpop.f32.mrf.mxu1 }
 0x374   : > { %v9192_v32 = vand.u32 4294901760, %v526_v55 }
 0x37a   : > { %v1624_v37 = vpop.f32.mrf.mxu0 }
 0x37b   : > { %v1625_v1 = vadd.f32 %v1624_v37, %v1521_v52  ;;  %v9194_v37 = vand.u32 4294901760, %v525_v57 }
 0x37c   : > { %v6544_v38 = vpop.f32.mrf.mxu0 }
 0x37d   : > { %v1714_v41 = vadd.f32 %v1713_v31, %v1625_v1  ;;  %v9190_v31 = vand.u32 4294901760, %v527_v46  ;;  %v2099_v38 = vsub.f32 %v9151_v22, %v11076_v43  ;;  %v9209_v1 = vand.u32 4294901760, %v524_v19 }
 0x37f   : > { %v9203_v52 = vsub.f32 %v527_v46, %v9190_v31  ;;  %v2100_v62 = vand.u32 4294901760, %v2099_v38  ;;  %v9231_v7 = vsub.f32 %v524_v19, %v9209_v1  ;;  %6667 = vmatpush3.msra.mxu0 %v9190_v31  ;;  %v9243_v46 = vsub.f32 %v523_v44, %v9221_v17 }
 0x380   : > { %6668 = vmatprep.subr.mxu0 %v8105_v0 }
 0x381   : > { %v11070_v63 = vand.u32 4294901760, %v9231_v7  ;;  %6669 = vmatpush3.msra.mxu0 %v9192_v32  ;;  %v11069_v38 = vand.u32 4294901760, %v9243_v46 }
 0x382   : > { %6670 = vmatprep.subr.mxu0 %v8105_v0 }
 0x383   : > { %6671 = vmatpush3.msra.mxu0 %v9194_v37 }
 0x384   : > { %6672 = vmatprep.subr.mxu0 %v8105_v0 }
 0x385   : > { %6673 = vmatpush3.msra.mxu0 %v9209_v1 }
 0x386   : > { %6674 = vmatprep.subr.mxu0 %v8105_v0 }
 0x387   : > { %6675 = vmatpush3.msra.mxu0 %v9221_v17 }
 0x388   : > { %6676 = vmatprep.subr.mxu0 %v8105_v0 }
 0x393   : > { %v1919_v49 = vpop.f32.mrf.mxu1 }
 0x395   : > { %v6649_v60 = vpop.f32.mrf.mxu1 }
 0x396   : > { %v9207_v60 = vsub.f32 %v526_v55, %v9192_v32  ;;  %v9245_v55 = vand.u32 4294901760, %v521_v24 }
 0x398   : > { %v11072_v54 = vand.u32 4294901760, %v9207_v60  ;;  %v9267_v44 = vsub.f32 %v521_v24, %v9245_v55  ;;  %v2148_v24 = vsub.f32 %v9243_v46, %v11069_v38 }
 0x39a   : > { %v2127_v59 = vsub.f32 %v9207_v60, %v11072_v54 }
 0x39b   : > { %v1832_v4 = vpop.f32.mrf.mxu0 }
 0x39c   : > { %v1833_v5 = vadd.f32 %v1832_v4, %v1714_v41  ;;  %v2106_v41 = vsub.f32 %v9163_v51, %v11075_v13  ;;  %v522_v4 = vld [vmem:[#allocation7 + $0x90] sm:$0xff] }
 0x39d   : > { %v6614_v6 = vpop.f32.mrf.mxu0  ;;  %v9233_v10 = vand.u32 4294901760, %v522_v4 }
 0x39e   : > { %v9114_v11 = vadd.f32 %v1919_v49, %v1833_v5  ;;  %v2086_v49 = vand.u32 4294901760, %v2085_v3  ;;  %v2093_v5 = vand.u32 4294901760, %v2092_v8  ;;  %v11073_v6 = vand.u32 4294901760, %v9203_v52 }
 0x39f   : > { %v2107_v12 = vand.u32 4294901760, %v2106_v41  ;;  %v9255_v3 = vsub.f32 %v522_v4, %v9233_v10  ;;  %v9257_v8 = vand.u32 4294901760, %v520_v34  ;;  %v2141_v41 = vsub.f32 %v9231_v7, %v11070_v63  ;;  %6677 = vmatpush3.msra.mxu0 %v9233_v10 }
 0x3a0   : > { %1923 = vadd.xlane.f32.xlu1 %v9114_v11  ;;  %v1926_v16 = vmul.f32 %v9114_v11, %v9114_v11  ;;  %6692 = vmatpush3.msra.mxu1 %v2086_v49  ;;  %v2120_v61 = vsub.f32 %v9203_v52, %v11073_v6  ;;  %v2128_v49 = vand.u32 4294901760, %v2127_v59 }
 0x3a1   : > { %6693 = vmatprep.subr.mxu1 %v8105_v0  ;;  %v11068_v4 = vand.u32 4294901760, %v9255_v3  ;;  %6678 = vmatprep.subr.mxu0 %v8105_v0 }
 0x3a2   : > { %6694 = vmatpush3.msra.mxu1 %v2093_v5  ;;  %v2121_v19 = vand.u32 4294901760, %v2120_v61  ;;  %v9277_v5 = vsub.f32 %v520_v34, %v9257_v8  ;;  %6679 = vmatpush3.msra.mxu0 %v9245_v55 }
 0x3a3   : > { %6695 = vmatprep.subr.mxu1 %v8105_v0  ;;  %v2155_v34 = vsub.f32 %v9255_v3, %v11068_v4  ;;  %6680 = vmatprep.subr.mxu0 %v8105_v0 }
 0x3a4   : > { %1927 = vadd.xlane.f32.xlu1 %v1926_v16  ;;  %v9219_v16 = vsub.f32 %v525_v57, %v9194_v37  ;;  %v2114_v57 = vand.u32 4294901760, %v2113_v18  ;;  %6696 = vmatpush3.msra.mxu1 %v2100_v62  ;;  %v11067_v62 = vand.u32 4294901760, %v9267_v44  ;;  %v11066_v61 = vand.u32 4294901760, %v9277_v5 }
 0x3a5   : > { %6697 = vmatprep.subr.mxu1 %v8105_v0  ;;  %6681 = vmatpush3.msra.mxu0 %v9257_v8 }
 0x3a6   : > { %v11071_v2 = vand.u32 4294901760, %v9219_v16  ;;  %6698 = vmatpush3.msra.mxu1 %v2107_v12  ;;  %v2142_v12 = vand.u32 4294901760, %v2141_v41  ;;  %v2162_v59 = vsub.f32 %v9267_v44, %v11067_v62  ;;  %6720 = vmatprep.subr.mxu0 %v8105_v0 }
 0x3a7   : > { %6699 = vmatprep.subr.mxu1 %v8105_v0 }
 0x3a8   : > { %v2134_v26 = vsub.f32 %v9219_v16, %v11071_v2  ;;  %6700 = vmatpush3.msra.mxu1 %v2114_v57  ;;  %v2149_v57 = vand.u32 4294901760, %v2148_v24 }
 0x3a9   : > { %6701 = vmatprep.subr.mxu1 %v8105_v0 }
 0x3aa   : > { %6702 = vmatpush3.msra.mxu1 %v2121_v19  ;;  %v2135_v18 = vand.u32 4294901760, %v2134_v26  ;;  %v2156_v19 = vand.u32 4294901760, %v2155_v34  ;;  %v2169_v26 = vsub.f32 %v9277_v5, %v11066_v61 }
 0x3ab   : > { %6703 = vmatprep.subr.mxu1 %v8105_v0 }
 0x3ac   : > { %6704 = vmatpush3.msra.mxu1 %v2128_v49  ;;  %v2163_v49 = vand.u32 4294901760, %v2162_v59  ;;  %v2170_v41 = vand.u32 4294901760, %v2169_v26 }
 0x3ad   : > { %6705 = vmatprep.subr.mxu1 %v8105_v0 }
 0x3ae   : > { %6706 = vmatpush3.msra.mxu1 %v2135_v18 }
 0x3af   : > { %6707 = vmatprep.subr.mxu1 %v8105_v0 }
 0x3b0   : > { %6708 = vmatpush3.msra.mxu1 %v2142_v12 }
 0x3b1   : > { %6709 = vmatprep.subr.mxu1 %v8105_v0 }
 0x3b2   : > { %6710 = vmatpush3.msra.mxu1 %v2149_v57 }
 0x3b3   : > { %6711 = vmatprep.subr.mxu1 %v8105_v0 }
 0x3b4   : > { %6712 = vmatpush3.msra.mxu1 %v2156_v19 }
 0x3b5   : > { %6713 = vmatprep.subr.mxu1 %v8105_v0 }
 0x3b6   : > { %6714 = vmatpush3.msra.mxu1 %v2163_v49 }
 0x3b7   : > { %6715 = vmatprep.subr.mxu1 %v8105_v0 }
 0x3b8   : > { %6716 = vmatpush3.msra.mxu1 %v2170_v41 }
 0x3b9   : > { %6755 = vmatprep.subr.mxu1 %v8105_v0 }
 0x429   : > { %v1924_v18 = vpop.xlane.xlu1 %1923 }
 0x42a   : > { %v1925_v24 = vmul.f32 0.03125, %v1924_v18 }
 0x42c   : > { %v1930_v34 = vmul.f32 %v1925_v24, %v1925_v24  ;;  %v1934_v59 = vsub.f32 %v9114_v11, %v1925_v24 }
 0x42d   : > { %v1928_v12 = vpop.xlane.xlu1 %1927 }
 0x42e   : > { %v1929_v61 = vmul.f32 0.03125, %v1928_v12 }
 0x430   : > { %v1931_v62 = vsub.f32 %v1929_v61, %v1930_v34 }
 0x432   : > { %v1932_v57 = vadd.f32 1e-05, %v1931_v62 }
 0x434   : > { %7813 = vrsqrt.f32 %v1932_v57 }
 0x441   : > { %v9312_v19 = vpop.eup %7813 }
 0x442   : > { %v9315_v26 = vmul.f32 %v9312_v19, %v1934_v59 }
 0x444   : > { %v1936_v49 = vmul.f32 0.70710677, %v9315_v26 }
 0x446   : > { %v1939_v41 = vand.u32 2147483647, %v1936_v49  ;;  %vm1937_vm2 = vcmp.ge.f32.partialorder %v1936_v49, 0.0 }
 0x448   : > { %v1940_v4 = vmul.f32 0.3275911, %v1939_v41  ;;  %v1953_v18 = vsub.f32 0.0, %v1939_v41 }
 0x44a   : > { %v1941_v38 = vadd.f32 1.0, %v1940_v4  ;;  %v1954_v63 = vmul.f32 %v1953_v18, %v1939_v41 }
 0x44c   : > { %7815 = vrcp.f32 %v1941_v38  ;;  %v1955_v61 = vmul.f32 1.442695, %v1954_v63  ;;  %v1938_v38 = vsel %vm1937_vm2, 1.0, %v8107_v56 }
 0x44e   : > { %7817 = vpow2.f32 %v1955_v61 }
 0x459   : > { %v7816_v2 = vpop.eup %7815 }
 0x45a   : > { %v1944_v12 = vmul.f32 1.0614054, %v7816_v2 }
 0x45b   : > { %v7818_v42 = vpop.eup %7817 }
 0x45c   : > { %v1945_v62 = vadd.f32 -1.4531521, %v1944_v12 }
 0x45e   : > { %v1946_v34 = vmul.f32 %v7816_v2, %v1945_v62 }
 0x460   : > { %v1947_v11 = vadd.f32 1.4214138, %v1946_v34 }
 0x462   : > { %v1948_v24 = vmul.f32 %v7816_v2, %v1947_v11  ;;  %v2659_v11 = vld [vmem:[#allocation11 + $0x48] sm:$0xff] }
 0x464   : > { %v1949_v57 = vadd.f32 -0.28449672, %v1948_v24  ;;  %v2658_v24 = vld [vmem:[#allocation11 + $0x40] sm:$0xff] }
 0x466   : > { %v1950_v54 = vmul.f32 %v7816_v2, %v1949_v57 }
 0x468   : > { %v1951_v59 = vadd.f32 0.2548296, %v1950_v54 }
 0x46a   : > { %v1952_v6 = vmul.f32 %v7816_v2, %v1951_v59  ;;  %v2663_v2 = vld [vmem:[#allocation11 + $0x68] sm:$0xff] }
 0x46c   : > { %v1957_v13 = vmul.f32 %v7818_v42, %v1952_v6 }
 0x46e   : > { %v1958_v43 = vsub.f32 1.0, %v1957_v13 }
 0x470   : > { %v1959_v4 = vmul.f32 %v1958_v43, %v1938_v38 }
 0x472   : > { %v1960_v41 = vadd.f32 1.0, %v1959_v4  ;;  %v9520_v4 = vand.u32 4294901760, %v2659_v11 }
 0x474   : > { %v9319_v18 = vmul.f32 0.5, %v1960_v41 }
 0x476   : > { %v1962_v63 = vmul.f32 %v9319_v18, %v9315_v26 }
 0x478   : > { %v9323_v12 = vand.u32 4294901760, %v1962_v63 }
 0x47a   : > { %v9326_v61 = vsub.f32 %v1962_v63, %v9323_v12  ;;  %6718 = vmatmul.mubr.f32.vlgmr.msra.gmra.mxu1 %v9323_v12 }
 0x47b   : > { %6756 = vmatpush3.msra.mxu1 %v9119_v25  ;;  %6787 = vmatprep.mubr.msk.f32.mxu1 %vm8106_vm0, %v8105_v0 }
 0x47c   : > { %6757 = vmatprep.subr.mxu1 %v8105_v0  ;;  %v2052_v43 = vand.u32 4294901760, %v9326_v61 }
 0x47d   : > { %6758 = vmatpush3.msra.mxu1 %v9121_v35 }
 0x47e   : > { %6759 = vmatprep.subr.mxu1 %v8105_v0  ;;  %v2053_v13 = vsub.f32 %v9326_v61, %v2052_v43 }
 0x47f   : > { %6760 = vmatpush3.msra.mxu1 %v9123_v40 }
 0x480   : > { %6761 = vmatprep.subr.mxu1 %v8105_v0  ;;  %v2054_v42 = vand.u32 4294901760, %v2053_v13 }
 0x481   : > { %6762 = vmatpush3.msra.mxu1 %v9125_v9 }
 0x482   : > { %6763 = vmatprep.subr.mxu1 %v8105_v0  ;;  %6683 = vmatmul.mubr.f32.vlgmr.msra.gmra.mxu0 %v2054_v42 }
 0x483   : > { %6721 = vmatpush3.msra.mxu0 %v9132_v21  ;;  %6764 = vmatpush3.msra.mxu1 %v9127_v36  ;;  %v11141_v21 = vand.u32 4294901760, %v9231_v7 }
 0x484   : > { %6722 = vmatprep.subr.mxu0 %v8105_v0  ;;  %6765 = vmatprep.subr.mxu1 %v8105_v0 }
 0x485   : > { %6723 = vmatpush3.msra.mxu0 %v9135_v48  ;;  %6766 = vmatpush3.msra.mxu1 %v9129_v39  ;;  %v11142_v48 = vand.u32 4294901760, %v9243_v46 }
 0x486   : > { %6724 = vmatprep.subr.mxu0 %v8105_v0  ;;  %6767 = vmatprep.subr.mxu1 %v8105_v0 }
 0x487   : > { %6725 = vmatpush3.msra.mxu0 %v9138_v15  ;;  %6768 = vmatpush3.msra.mxu1 %v9141_v20  ;;  %v11143_v15 = vand.u32 4294901760, %v9255_v3 }
 0x488   : > { %6726 = vmatprep.subr.mxu0 %v8105_v0  ;;  %6769 = vmatprep.subr.mxu1 %v8105_v0 }
 0x489   : > { %6727 = vmatpush3.msra.mxu0 %v9144_v28  ;;  %6770 = vmatpush3.msra.mxu1 %v9153_v27  ;;  %v11145_v28 = vand.u32 4294901760, %v9277_v5 }
 0x48a   : > { %6728 = vmatprep.subr.mxu0 %v8105_v0  ;;  %6771 = vmatprep.subr.mxu1 %v8105_v0 }
 0x48b   : > { %6729 = vmatpush3.msra.mxu0 %v9147_v33  ;;  %6772 = vmatpush3.msra.mxu1 %v9190_v31 }
 0x48c   : > { %6730 = vmatprep.subr.mxu0 %v8105_v0  ;;  %6773 = vmatprep.subr.mxu1 %v8105_v0 }
 0x48d   : > { %6731 = vmatpush3.msra.mxu0 %v9151_v22  ;;  %6774 = vmatpush3.msra.mxu1 %v9192_v32 }
 0x48e   : > { %6732 = vmatprep.subr.mxu0 %v8105_v0  ;;  %6775 = vmatprep.subr.mxu1 %v8105_v0 }
 0x48f   : > { %6733 = vmatpush3.msra.mxu0 %v9163_v51  ;;  %6776 = vmatpush3.msra.mxu1 %v9194_v37 }
 0x490   : > { %6734 = vmatprep.subr.mxu0 %v8105_v0  ;;  %6777 = vmatprep.subr.mxu1 %v8105_v0 }
 0x491   : > { %6735 = vmatpush3.msra.mxu0 %v9178_v45  ;;  %6778 = vmatpush3.msra.mxu1 %v9209_v1 }
 0x492   : > { %6736 = vmatprep.subr.mxu0 %v8105_v0  ;;  %6779 = vmatprep.subr.mxu1 %v8105_v0 }
 0x493   : > { %6737 = vmatpush3.msra.mxu0 %v9203_v52  ;;  %6780 = vmatpush3.msra.mxu1 %v9221_v17 }
 0x494   : > { %6738 = vmatprep.subr.mxu0 %v8105_v0  ;;  %6781 = vmatprep.subr.mxu1 %v8105_v0 }
 0x495   : > { %6739 = vmatpush3.msra.mxu0 %v9207_v60  ;;  %6782 = vmatpush3.msra.mxu1 %v9233_v10 }
 0x496   : > { %6740 = vmatprep.subr.mxu0 %v8105_v0  ;;  %6783 = vmatprep.subr.mxu1 %v8105_v0 }
 0x497   : > { %6741 = vmatpush3.msra.mxu0 %v9219_v16  ;;  %6784 = vmatpush3.msra.mxu1 %v9245_v55 }
 0x498   : > { %6742 = vmatprep.subr.mxu0 %v8105_v0  ;;  %6785 = vmatprep.subr.mxu1 %v8105_v0 }
 0x499   : > { %6743 = vmatpush3.msra.mxu0 %v9231_v7  ;;  %6786 = vmatpush3.msra.mxu1 %v9257_v8  ;;  %v2665_v7 = vld [vmem:[#allocation11 + $0x78] sm:$0xff] }
 0x49a   : > { %6744 = vmatprep.subr.mxu0 %v8105_v0  ;;  %6788 = vmatmul.mubr.f32.vlgmr.msra.gmra.mxu1 %v2052_v43 }
 0x49b   : > { %6825 = vmatprep.subr.mxu1 %v8105_v0  ;;  %6745 = vmatpush3.msra.mxu0 %v9243_v46  ;;  %v9498_v46 = vand.u32 4294901760, %v2665_v7 }
 0x49c   : > { %6826 = vmatpush3.msra.mxu1 %v9119_v25  ;;  %6746 = vmatprep.subr.mxu0 %v8105_v0  ;;  %v11135_v25 = vand.u32 4294901760, %v9151_v22 }
 0x49d   : > { %6827 = vmatprep.subr.mxu1 %v8105_v0  ;;  %6747 = vmatpush3.msra.mxu0 %v9255_v3  ;;  %v9502_v3 = vand.u32 4294901760, %v2663_v2  ;;  %v9511_v57 = vsub.f32 %v2665_v7, %v9498_v46 }
 0x49e   : > { %6828 = vmatpush3.msra.mxu1 %v9121_v35  ;;  %6748 = vmatprep.subr.mxu0 %v8105_v0  ;;  %v11136_v35 = vand.u32 4294901760, %v9163_v51  ;;  %v5507_v51 = vld [vmem:[%s11046_s4 + $0x1] ss:$0 sm:$0xff] }
 0x49f   : > { %6829 = vmatprep.subr.mxu1 %v8105_v0  ;;  %6749 = vmatpush3.msra.mxu0 %v9267_v44  ;;  %v9517_v38 = vsub.f32 %v2663_v2, %v9502_v3  ;;  %v2767_v43 = vand.u32 4294901760, %v9511_v57 }
 0x4a0   : > { %6830 = vmatpush3.msra.mxu1 %v9123_v40  ;;  %6750 = vmatprep.subr.mxu0 %v8105_v0  ;;  %v11137_v40 = vand.u32 4294901760, %v9178_v45 }
 0x4a1   : > { %6831 = vmatprep.subr.mxu1 %v8105_v0  ;;  %6751 = vmatpush3.msra.mxu0 %v9277_v5  ;;  %v2660_v5 = vld [vmem:[#allocation11 + $0x50] sm:$0xff]  ;;  %v11090_v42 = vand.u32 4294901760, %v9517_v38 }
 0x4a2   : > { %6752 = vmatprep.mubr.msk.f32.mxu0 %vm8106_vm0, %v8105_v0  ;;  %6832 = vmatpush3.msra.mxu1 %v9125_v9  ;;  %v11138_v9 = vand.u32 4294901760, %v9203_v52  ;;  %v9508_v34 = vand.u32 4294901760, %v2660_v5 }
 0x4a3   : > { %6753 = vmatmul.mubr.f32.vlgmr.msra.gmra.mxu0 %v9326_v61  ;;  %6790 = vmatprep.subr.mxu0 %v8105_v0  ;;  %v9532_v61 = vand.u32 4294901760, %v2658_v24 }
 0x4a4   : > { %6833 = vmatprep.subr.mxu1 %v8105_v0  ;;  %6791 = vmatpush3.msra.mxu0 %v2063_v58 }
 0x4a5   : > { %6834 = vmatpush3.msra.mxu1 %v9127_v36  ;;  %6792 = vmatprep.subr.mxu0 %v8105_v0  ;;  %v11139_v36 = vand.u32 4294901760, %v9207_v60 }
 0x4a6   : > { %6835 = vmatprep.subr.mxu1 %v8105_v0  ;;  %6793 = vmatpush3.msra.mxu0 %v2070_v53 }
 0x4a7   : > { %6836 = vmatpush3.msra.mxu1 %v9129_v39  ;;  %6794 = vmatprep.subr.mxu0 %v8105_v0  ;;  %v11140_v39 = vand.u32 4294901760, %v9219_v16 }
 0x4a8   : > { %6837 = vmatprep.subr.mxu1 %v8105_v0  ;;  %6795 = vmatpush3.msra.mxu0 %v2077_v14 }
 0x4a9   : > { %6838 = vmatpush3.msra.mxu1 %v9141_v20  ;;  %6796 = vmatprep.subr.mxu0 %v8105_v0  ;;  %v11144_v20 = vand.u32 4294901760, %v9267_v44  ;;  %v2661_v44 = vld [vmem:[#allocation11 + $0x58] sm:$0xff] }
 0x4aa   : > { %6839 = vmatprep.subr.mxu1 %v8105_v0  ;;  %6797 = vmatpush3.msra.mxu0 %v2084_v29  ;;  %v9506_v62 = vand.u32 4294901760, %v2661_v44 }
 0x4ab   : > { %6840 = vmatpush3.msra.mxu1 %v9153_v27  ;;  %6798 = vmatprep.subr.mxu0 %v8105_v0 }
 0x4ac   : > { %6841 = vmatprep.subr.mxu1 %v8105_v0  ;;  %6799 = vmatpush3.msra.mxu0 %v2091_v50  ;;  %v9526_v63 = vsub.f32 %v2661_v44, %v9506_v62 }
 0x4ad   : > { %6842 = vmatpush3.msra.mxu1 %v9190_v31  ;;  %6800 = vmatprep.subr.mxu0 %v8105_v0 }
 0x4ae   : > { %6843 = vmatprep.subr.mxu1 %v8105_v0  ;;  %6801 = vmatpush3.msra.mxu0 %v11135_v25 }
 0x4af   : > { %6844 = vmatpush3.msra.mxu1 %v9192_v32  ;;  %6802 = vmatprep.subr.mxu0 %v8105_v0 }
 0x4b0   : > { %6845 = vmatprep.subr.mxu1 %v8105_v0  ;;  %6803 = vmatpush3.msra.mxu0 %v11136_v35  ;;  %v11088_v35 = vand.u32 4294901760, %v9526_v63 }
 0x4b1   : > { %6846 = vmatpush3.msra.mxu1 %v9194_v37  ;;  %6804 = vmatprep.subr.mxu0 %v8105_v0 }
 0x4b2   : > { %6847 = vmatprep.subr.mxu1 %v8105_v0  ;;  %6805 = vmatpush3.msra.mxu0 %v11137_v40  ;;  %v9542_v40 = vsub.f32 %v2659_v11, %v9520_v4 }
 0x4b3   : > { %6848 = vmatpush3.msra.mxu1 %v9209_v1  ;;  %6806 = vmatprep.subr.mxu0 %v8105_v0 }
 0x4b4   : > { %6849 = vmatprep.subr.mxu1 %v8105_v0  ;;  %6807 = vmatpush3.msra.mxu0 %v11138_v9  ;;  %v2768_v9 = vsub.f32 %v9511_v57, %v2767_v43 }
 0x4b5   : > { %6850 = vmatpush3.msra.mxu1 %v9221_v17  ;;  %6808 = vmatprep.subr.mxu0 %v8105_v0 }
 0x4b6   : > { %6851 = vmatprep.subr.mxu1 %v8105_v0  ;;  %6809 = vmatpush3.msra.mxu0 %v11139_v36 }
 0x4b7   : > { %6852 = vmatpush3.msra.mxu1 %v9233_v10  ;;  %6810 = vmatprep.subr.mxu0 %v8105_v0  ;;  %v2664_v10 = vld [vmem:[#allocation11 + $0x70] sm:$0xff] }
 0x4b8   : > { %6853 = vmatprep.subr.mxu1 %v8105_v0  ;;  %6811 = vmatpush3.msra.mxu0 %v11140_v39  ;;  %v2782_v39 = vsub.f32 %v9517_v38, %v11090_v42 }
 0x4b9   : > { %6854 = vmatpush3.msra.mxu1 %v9245_v55  ;;  %6812 = vmatprep.subr.mxu0 %v8105_v0  ;;  %v9500_v55 = vand.u32 4294901760, %v2664_v10 }
 0x4ba   : > { %6855 = vmatprep.subr.mxu1 %v8105_v0  ;;  %6813 = vmatpush3.msra.mxu0 %v11141_v21 }
 0x4bb   : > { %6856 = vmatpush3.msra.mxu1 %v9257_v8  ;;  %6857 = vmatprep.mubr.msk.f32.mxu1 %vm8106_vm0, %v8105_v0  ;;  %v2662_v8 = vld [vmem:[#allocation11 + $0x60] sm:$0xff]  ;;  %v9514_v59 = vsub.f32 %v2664_v10, %v9500_v55 }
 0x4bc   : > { %6814 = vmatprep.subr.mxu0 %v8105_v0  ;;  %6858 = vmatmul.mubr.f32.vlgmr.msra.gmra.mxu1 %v9323_v12  ;;  %v9504_v49 = vand.u32 4294901760, %v2662_v8 }
 0x4bd   : > { %6815 = vmatpush3.msra.mxu0 %v11142_v48  ;;  %6822 = vmatprep.mubr.msk.f32.mxu0 %vm8106_vm0, %v8105_v0  ;;  %v11091_v13 = vand.u32 4294901760, %v9514_v59  ;;  %v9557_v48 = vsub.f32 %v2658_v24, %v9532_v61 }
 0x4be   : > { %6816 = vmatprep.subr.mxu0 %v8105_v0  ;;  %6895 = vmatprep.subr.mxu1 %v8105_v0  ;;  %v9523_v41 = vsub.f32 %v2662_v8, %v9504_v49 }
 0x4bf   : > { %6817 = vmatpush3.msra.mxu0 %v11143_v15  ;;  %6927 = vmatprep.mubr.msk.f32.mxu1 %vm8106_vm0, %v8105_v0  ;;  %v2775_v36 = vsub.f32 %v9514_v59, %v11091_v13  ;;  %v2657_v15 = vld [vmem:[#allocation11 + $0x38] sm:$0xff] }
 0x4c0   : > { %6818 = vmatprep.subr.mxu0 %v8105_v0  ;;  %v11089_v25 = vand.u32 4294901760, %v9523_v41 }
 0x4c1   : > { %6819 = vmatpush3.msra.mxu0 %v11144_v20  ;;  %v2656_v20 = vld [vmem:[#allocation11 + $0x30] sm:$0xff] }
 0x4c2   : > { %6820 = vmatprep.subr.mxu0 %v8105_v0 }
 0x4c3   : > { %6821 = vmatpush3.msra.mxu0 %v11145_v28  ;;  %v2655_v28 = vld [vmem:[#allocation11 + $0x28] sm:$0xff] }
 0x4c4   : > { %6823 = vmatmul.mubr.f32.vlgmr.msra.gmra.mxu0 %v9323_v12  ;;  %6860 = vmatprep.subr.mxu0 %v8105_v0  ;;  %v9530_v12 = vsub.f32 %v2660_v5, %v9508_v34  ;;  %v2651_v5 = vld [vmem:[#allocation11 + $0x8] sm:$0xff] }
 0x4c5   : > { %6892 = vmatprep.mubr.msk.f32.mxu0 %vm8106_vm0, %v8105_v0  ;;  %6861 = vmatpush3.msra.mxu0 %v9498_v46 }
 0x4c6   : > { %6862 = vmatprep.subr.mxu0 %v8105_v0  ;;  %v11087_v21 = vand.u32 4294901760, %v9530_v12 }
 0x4c7   : > { %6863 = vmatpush3.msra.mxu0 %v9500_v55 }
 0x4c8   : > { %6864 = vmatprep.subr.mxu0 %v8105_v0 }
 0x4c9   : > { %6865 = vmatpush3.msra.mxu0 %v9502_v3 }
 0x4ca   : > { %6866 = vmatprep.subr.mxu0 %v8105_v0 }
 0x4cb   : > { %6867 = vmatpush3.msra.mxu0 %v9504_v49 }
 0x4cc   : > { %6868 = vmatprep.subr.mxu0 %v8105_v0 }
 0x4cd   : > { %6869 = vmatpush3.msra.mxu0 %v9506_v62 }
 0x4ce   : > { %6870 = vmatprep.subr.mxu0 %v8105_v0 }
 0x4cf   : > { %6871 = vmatpush3.msra.mxu0 %v9508_v34 }
 0x4d0   : > { %6872 = vmatprep.subr.mxu0 %v8105_v0 }
 0x4d1   : > { %6873 = vmatpush3.msra.mxu0 %v9520_v4 }
 0x4d2   : > { %6874 = vmatprep.subr.mxu0 %v8105_v0 }
 0x4d3   : > { %6875 = vmatpush3.msra.mxu0 %v9532_v61 }
 0x4d4   : > { %6876 = vmatprep.subr.mxu0 %v8105_v0 }
 0x53a   : > { %v2207_v33 = vpop.f32.mrf.mxu1 }
 0x53c   : > { %v6719_v22 = vpop.f32.mrf.mxu1 }
 0x53d   : > { %v2776_v22 = vand.u32 4294901760, %v2775_v36 }
 0x542   : > { %v2056_v27 = vpop.f32.mrf.mxu0 }
 0x543   : > { %v2057_v45 = vadd.f32 %v5507_v51, %v2056_v27  ;;  %v2789_v27 = vsub.f32 %v9523_v41, %v11089_v25  ;;  %v9571_v51 = vand.u32 4294901760, %v2656_v20 }
 0x544   : > { %v6684_v58 = vpop.f32.mrf.mxu0 }
 0x545   : > { %v2208_v32 = vadd.f32 %v2207_v33, %v2057_v45  ;;  %v2769_v33 = vand.u32 4294901760, %v2768_v9  ;;  %v2796_v58 = vsub.f32 %v9526_v63, %v11088_v35  ;;  %v9573_v45 = vand.u32 4294901760, %v2655_v28 }
 0x547   : > { %6896 = vmatpush3.msra.mxu1 %v2769_v33  ;;  %v2797_v7 = vand.u32 4294901760, %v2796_v58  ;;  %v9598_v2 = vsub.f32 %v2655_v28, %v9573_v45 }
 0x548   : > { %6897 = vmatprep.subr.mxu1 %v8105_v0 }
 0x549   : > { %6898 = vmatpush3.msra.mxu1 %v2776_v22  ;;  %v11082_v28 = vand.u32 4294901760, %v9598_v2  ;;  %v9624_v22 = vand.u32 4294901760, %v2651_v5 }
 0x54a   : > { %6899 = vmatprep.subr.mxu1 %v8105_v0 }
 0x55a   : > { %v2400_v53 = vpop.f32.mrf.mxu1 }
 0x55c   : > { %v6789_v14 = vpop.f32.mrf.mxu1 }
 0x55d   : > { %v2654_v14 = vld [vmem:[#allocation11 + $0x20] sm:$0xff] }
 0x563   : > { %v2311_v29 = vpop.f32.mrf.mxu0 }
 0x564   : > { %v2312_v52 = vadd.f32 %v2311_v29, %v2208_v32  ;;  %v2783_v29 = vand.u32 4294901760, %v2782_v39  ;;  %v11085_v32 = vand.u32 4294901760, %v9557_v48 }
 0x565   : > { %v6754_v50 = vpop.f32.mrf.mxu0 }
 0x566   : > { %v2401_v60 = vadd.f32 %v2400_v53, %v2312_v52  ;;  %v11086_v53 = vand.u32 4294901760, %v9542_v40  ;;  %v9569_v50 = vand.u32 4294901760, %v2657_v15  ;;  %v2790_v52 = vand.u32 4294901760, %v2789_v27  ;;  %6900 = vmatpush3.msra.mxu1 %v2783_v29 }
 0x567   : > { %6901 = vmatprep.subr.mxu1 %v8105_v0  ;;  %v2817_v44 = vsub.f32 %v9557_v48, %v11085_v32 }
 0x568   : > { %6902 = vmatpush3.msra.mxu1 %v2790_v52  ;;  %6877 = vmatpush3.msra.mxu0 %v9569_v50  ;;  %v2838_v52 = vsub.f32 %v9598_v2, %v11082_v28 }
 0x569   : > { %6903 = vmatprep.subr.mxu1 %v8105_v0  ;;  %v2818_v27 = vand.u32 4294901760, %v2817_v44  ;;  %6878 = vmatprep.subr.mxu0 %v8105_v0 }
 0x56a   : > { %6904 = vmatpush3.msra.mxu1 %v2797_v7  ;;  %6879 = vmatpush3.msra.mxu0 %v9571_v51  ;;  %v9646_v7 = vsub.f32 %v2651_v5, %v9624_v22  ;;  %v2839_v5 = vand.u32 4294901760, %v2838_v52 }
 0x56b   : > { %6905 = vmatprep.subr.mxu1 %v8105_v0  ;;  %6880 = vmatprep.subr.mxu0 %v8105_v0 }
 0x56c   : > { %6881 = vmatpush3.msra.mxu0 %v9573_v45 }
 0x56d   : > { %6882 = vmatprep.subr.mxu0 %v8105_v0 }
 0x57c   : > { %v2606_v31 = vpop.f32.mrf.mxu1 }
 0x57e   : > { %v6859_v37 = vpop.f32.mrf.mxu1 }
 0x57f   : > { %v2653_v37 = vld [vmem:[#allocation11 + $0x18] sm:$0xff] }
 0x580   : > { %v9600_v8 = vand.u32 4294901760, %v2653_v37 }
 0x582   : > { %v9622_v33 = vsub.f32 %v2653_v37, %v9600_v8 }
 0x584   : > { %v2519_v1 = vpop.f32.mrf.mxu0 }
 0x585   : > { %v2520_v6 = vadd.f32 %v2519_v1, %v2401_v60  ;;  %v9582_v60 = vsub.f32 %v2657_v15, %v9569_v50  ;;  %v9586_v1 = vsub.f32 %v2656_v20, %v9571_v51  ;;  %v2650_v15 = vld [vmem:[#allocation11] sm:$0xff] }
 0x586   : > { %v6824_v16 = vpop.f32.mrf.mxu0 }
 0x587   : > { %v9493_v17 = vadd.f32 %v2606_v31, %v2520_v6  ;;  %v2803_v31 = vsub.f32 %v9530_v12, %v11087_v21  ;;  %v9588_v6 = vand.u32 4294901760, %v2654_v14  ;;  %v2810_v16 = vsub.f32 %v9542_v40, %v11086_v53 }
 0x588   : > { %v11084_v10 = vand.u32 4294901760, %v9582_v60  ;;  %v11083_v24 = vand.u32 4294901760, %v9586_v1 }
 0x589   : > { %2610 = vadd.xlane.f32.xlu0 %v9493_v17  ;;  %v2613_v54 = vmul.f32 %v9493_v17, %v9493_v17  ;;  %v2804_v11 = vand.u32 4294901760, %v2803_v31  ;;  %v9610_v9 = vsub.f32 %v2654_v14, %v9588_v6  ;;  %v2811_v39 = vand.u32 4294901760, %v2810_v16  ;;  %6883 = vmatpush3.msra.mxu0 %v9588_v6 }
 0x58a   : > { %v2824_v20 = vsub.f32 %v9582_v60, %v11084_v10  ;;  %v2831_v58 = vsub.f32 %v9586_v1, %v11083_v24  ;;  %v9636_v31 = vand.u32 4294901760, %v2650_v15  ;;  %v11077_v16 = vand.u32 4294901760, %v9622_v33  ;;  %6884 = vmatprep.subr.mxu0 %v8105_v0 }
 0x58b   : > { %2614 = vadd.xlane.f32.xlu1 %v2613_v54  ;;  %v2652_v54 = vld [vmem:[#allocation11 + $0x10] sm:$0xff]  ;;  %6906 = vmatpush3.msra.mxu1 %v2804_v11  ;;  %v11081_v14 = vand.u32 4294901760, %v9610_v9 }
 0x58c   : > { %v9612_v36 = vand.u32 4294901760, %v2652_v54  ;;  %6907 = vmatprep.subr.mxu1 %v8105_v0  ;;  %v2825_v37 = vand.u32 4294901760, %v2824_v20  ;;  %v2852_v20 = vsub.f32 %v9622_v33, %v11077_v16  ;;  %6885 = vmatpush3.msra.mxu0 %v9600_v8 }
 0x58d   : > { %6908 = vmatpush3.msra.mxu1 %v2811_v39  ;;  %v2845_v44 = vsub.f32 %v9610_v9, %v11081_v14  ;;  %v9656_v39 = vsub.f32 %v2650_v15, %v9636_v31  ;;  %6886 = vmatprep.subr.mxu0 %v8105_v0 }
 0x58e   : > { %v9634_v29 = vsub.f32 %v2652_v54, %v9612_v36  ;;  %6909 = vmatprep.subr.mxu1 %v8105_v0  ;;  %v2832_v54 = vand.u32 4294901760, %v2831_v58  ;;  %6887 = vmatpush3.msra.mxu0 %v9612_v36  ;;  %v2853_v52 = vand.u32 4294901760, %v2852_v20 }
 0x58f   : > { %6910 = vmatpush3.msra.mxu1 %v2818_v27  ;;  %v11079_v27 = vand.u32 4294901760, %v9646_v7  ;;  %v2846_v15 = vand.u32 4294901760, %v2845_v44  ;;  %6888 = vmatprep.subr.mxu0 %v8105_v0 }
 0x590   : > { %v11080_v11 = vand.u32 4294901760, %v9634_v29  ;;  %6911 = vmatprep.subr.mxu1 %v8105_v0  ;;  %6889 = vmatpush3.msra.mxu0 %v9624_v22 }
 0x591   : > { %6912 = vmatpush3.msra.mxu1 %v2825_v37  ;;  %v11078_v37 = vand.u32 4294901760, %v9656_v39  ;;  %v2866_v16 = vsub.f32 %v9646_v7, %v11079_v27  ;;  %6890 = vmatprep.subr.mxu0 %v8105_v0 }
 0x592   : > { %6913 = vmatprep.subr.mxu1 %v8105_v0  ;;  %v2859_v58 = vsub.f32 %v9634_v29, %v11080_v11  ;;  %6891 = vmatpush3.msra.mxu0 %v9636_v31 }
 0x593   : > { %6914 = vmatpush3.msra.mxu1 %v2832_v54  ;;  %v2873_v44 = vsub.f32 %v9656_v39, %v11078_v37  ;;  %6930 = vmatprep.subr.mxu0 %v8105_v0 }
 0x594   : > { %6915 = vmatprep.subr.mxu1 %v8105_v0  ;;  %v2860_v54 = vand.u32 4294901760, %v2859_v58 }
 0x595   : > { %6916 = vmatpush3.msra.mxu1 %v2839_v5  ;;  %v2867_v5 = vand.u32 4294901760, %v2866_v16  ;;  %v2874_v20 = vand.u32 4294901760, %v2873_v44 }
 0x596   : > { %6917 = vmatprep.subr.mxu1 %v8105_v0 }
 0x597   : > { %6918 = vmatpush3.msra.mxu1 %v2846_v15 }
 0x598   : > { %6919 = vmatprep.subr.mxu1 %v8105_v0 }
 0x599   : > { %6920 = vmatpush3.msra.mxu1 %v2853_v52 }
 0x59a   : > { %6921 = vmatprep.subr.mxu1 %v8105_v0 }
 0x59b   : > { %6922 = vmatpush3.msra.mxu1 %v2860_v54 }
 0x59c   : > { %6923 = vmatprep.subr.mxu1 %v8105_v0 }
 0x59d   : > { %6924 = vmatpush3.msra.mxu1 %v2867_v5 }
 0x59e   : > { %6925 = vmatprep.subr.mxu1 %v8105_v0 }
 0x59f   : > { %6926 = vmatpush3.msra.mxu1 %v2874_v20 }
 0x5a0   : > { %6965 = vmatprep.subr.mxu1 %v8105_v0 }
 0x612   : > { %v2611_v15 = vpop.xlane.xlu0 %2610 }
 0x613   : > { %v2612_v58 = vmul.f32 0.03125, %v2611_v15 }
 0x614   : > { %v2615_v37 = vpop.xlane.xlu1 %2614 }
 0x615   : > { %v2617_v27 = vmul.f32 %v2612_v58, %v2612_v58  ;;  %v2616_v11 = vmul.f32 0.03125, %v2615_v37  ;;  %v2621_v16 = vsub.f32 %v9493_v17, %v2612_v58 }
 0x617   : > { %v2618_v14 = vsub.f32 %v2616_v11, %v2617_v27 }
 0x619   : > { %v2619_v52 = vadd.f32 1e-05, %v2618_v14 }
 0x61b   : > { %7819 = vrsqrt.f32 %v2619_v52 }
 0x628   : > { %v9691_v54 = vpop.eup %7819 }
 0x629   : > { %v9694_v44 = vmul.f32 %v9691_v54, %v2621_v16 }
 0x62b   : > { %v2623_v5 = vmul.f32 0.70710677, %v9694_v44  ;;  %v3322_v10 = vmul.f32 -0.5, %v9694_v44 }
 0x62d   : > { %v2626_v20 = vand.u32 2147483647, %v2623_v5  ;;  %v3323_v14 = vmul.f32 %v3322_v10, %v9694_v44  ;;  %vm2624_vm3 = vcmp.ge.f32.partialorder %v2623_v5, 0.0 }
 0x62e   : > { %v2625_v10 = vsel %vm2624_vm3, 1.0, %v8107_v56 }
 0x62f   : > { %v2627_v28 = vmul.f32 0.3275911, %v2626_v20  ;;  %v2640_v15 = vsub.f32 0.0, %v2626_v20  ;;  %v3324_v52 = vmul.f32 1.442695, %v3323_v14 }
 0x631   : > { %v2628_v24 = vadd.f32 1.0, %v2627_v28  ;;  %v2641_v37 = vmul.f32 %v2640_v15, %v2626_v20 }
 0x633   : > { %7821 = vrcp.f32 %v2628_v24  ;;  %v2642_v17 = vmul.f32 1.442695, %v2641_v37 }
 0x635   : > { %7823 = vpow2.f32 %v2642_v17 }
 0x636   : > { %7825 = vpow2.f32 %v3324_v52  ;;  %v583_v52 = vld [vmem:[#allocation10 + $0xd0] sm:$0xff] }
 0x640   : > { %v7822_v11 = vpop.eup %7821 }
 0x641   : > { %v2631_v27 = vmul.f32 1.0614054, %v7822_v11 }
 0x642   : > { %v7824_v25 = vpop.eup %7823 }
 0x643   : > { %v2632_v58 = vadd.f32 -1.4531521, %v2631_v27  ;;  %v7826_v20 = vpop.eup %7825 }
 0x644   : > { %v3326_v37 = vmul.f32 0.3989423, %v7826_v20  ;;  %v9863_v20 = vand.u32 4294901760, %v583_v52 }
 0x645   : > { %v2633_v32 = vmul.f32 %v7822_v11, %v2632_v58  ;;  %v11152_v58 = vand.u32 4294901760, %v9557_v48 }
 0x646   : > { %v3327_v17 = vmul.f32 %v3326_v37, %v9694_v44 }
 0x647   : > { %v2634_v16 = vadd.f32 1.4214138, %v2633_v32 }
 0x649   : > { %v2635_v53 = vmul.f32 %v7822_v11, %v2634_v16 }
 0x64b   : > { %v2636_v21 = vadd.f32 -0.28449672, %v2635_v53  ;;  %v5509_v53 = vld [vmem:[%s11049_s7] ss:$0 sm:$0xff] }
 0x64d   : > { %v2637_v35 = vmul.f32 %v7822_v11, %v2636_v21 }
 0x64f   : > { %v2638_v28 = vadd.f32 0.2548296, %v2637_v35 }
 0x651   : > { %v2639_v24 = vmul.f32 %v7822_v11, %v2638_v28  ;;  %v11153_v28 = vand.u32 4294901760, %v9582_v60 }
 0x653   : > { %v2644_v42 = vmul.f32 %v7824_v25, %v2639_v24  ;;  %v582_v24 = vld [vmem:[#allocation10 + $0xc8] sm:$0xff] }
 0x655   : > { %v2645_v15 = vsub.f32 1.0, %v2644_v42 }
 0x657   : > { %v2646_v13 = vmul.f32 %v2645_v15, %v2625_v10  ;;  %v581_v15 = vld [vmem:[#allocation10 + $0xc0] sm:$0xff]  ;;  %v11154_v10 = vand.u32 4294901760, %v9586_v1 }
 0x659   : > { %v2647_v27 = vadd.f32 1.0, %v2646_v13 }
 0x65b   : > { %v2648_v14 = vmul.f32 0.5, %v2647_v27  ;;  %v9877_v27 = vand.u32 4294901760, %v582_v24 }
 0x65d   : > { %v3328_v21 = vadd.f32 %v3327_v17, %v2648_v14  ;;  %v2649_v35 = vmul.f32 %v2648_v14, %v9694_v44  ;;  %v580_v14 = vld [vmem:[#allocation10 + $0xb8] sm:$0xff] }
 0x65f   : > { %v9705_v32 = vmul.f32 %v5509_v53, %v3328_v21  ;;  %v9707_v25 = vand.u32 4294901760, %v2649_v35  ;;  %v9891_v21 = vsub.f32 %v583_v52, %v9863_v20 }
 0x661   : > { %3330 = vadd.xlane.f32.xlu0 %v9705_v32  ;;  %v9711_v56 = vsub.f32 %v2649_v35, %v9707_v25  ;;  %6928 = vmatmul.mubr.f32.vlgmr.msra.gmra.mxu1 %v9707_v25  ;;  %v3333_v13 = vmul.f32 %v9705_v32, %v9694_v44  ;;  %v9896_v35 = vand.u32 4294901760, %v580_v14 }
 0x662   : > { %6966 = vmatpush3.msra.mxu1 %v9498_v46  ;;  %6997 = vmatprep.mubr.msk.f32.mxu1 %vm8106_vm0, %v8105_v0 }
 0x663   : > { %6967 = vmatprep.subr.mxu1 %v8105_v0  ;;  %3334 = vadd.xlane.f32.xlu1 %v3333_v13  ;;  %v2756_v42 = vand.u32 4294901760, %v9711_v56 }
 0x664   : > { %6968 = vmatpush3.msra.mxu1 %v9500_v55 }
 0x665   : > { %6969 = vmatprep.subr.mxu1 %v8105_v0  ;;  %v2757_v5 = vsub.f32 %v9711_v56, %v2756_v42 }
 0x666   : > { %6970 = vmatpush3.msra.mxu1 %v9502_v3 }
 0x667   : > { %6971 = vmatprep.subr.mxu1 %v8105_v0  ;;  %v2758_v11 = vand.u32 4294901760, %v2757_v5  ;;  %v9906_v5 = vsub.f32 %v582_v24, %v9877_v27 }
 0x668   : > { %6972 = vmatpush3.msra.mxu1 %v9504_v49 }
 0x669   : > { %6973 = vmatprep.subr.mxu1 %v8105_v0  ;;  %6893 = vmatmul.mubr.f32.vlgmr.msra.gmra.mxu0 %v2758_v11  ;;  %v11157_v11 = vand.u32 4294901760, %v9622_v33 }
 0x66a   : > { %6931 = vmatpush3.msra.mxu0 %v9511_v57  ;;  %6974 = vmatpush3.msra.mxu1 %v9506_v62  ;;  %v11149_v57 = vand.u32 4294901760, %v9526_v63 }
 0x66b   : > { %6932 = vmatprep.subr.mxu0 %v8105_v0  ;;  %6975 = vmatprep.subr.mxu1 %v8105_v0 }
 0x66c   : > { %6933 = vmatpush3.msra.mxu0 %v9514_v59  ;;  %6976 = vmatpush3.msra.mxu1 %v9508_v34 }
 0x66d   : > { %6934 = vmatprep.subr.mxu0 %v8105_v0  ;;  %6977 = vmatprep.subr.mxu1 %v8105_v0 }
 0x66e   : > { %6935 = vmatpush3.msra.mxu0 %v9517_v38  ;;  %6978 = vmatpush3.msra.mxu1 %v9520_v4 }
 0x66f   : > { %6936 = vmatprep.subr.mxu0 %v8105_v0  ;;  %6979 = vmatprep.subr.mxu1 %v8105_v0 }
 0x670   : > { %6937 = vmatpush3.msra.mxu0 %v9523_v41  ;;  %6980 = vmatpush3.msra.mxu1 %v9532_v61 }
 0x671   : > { %6938 = vmatprep.subr.mxu0 %v8105_v0  ;;  %6981 = vmatprep.subr.mxu1 %v8105_v0 }
 0x672   : > { %6939 = vmatpush3.msra.mxu0 %v9526_v63  ;;  %6982 = vmatpush3.msra.mxu1 %v9569_v50 }
 0x673   : > { %6940 = vmatprep.subr.mxu0 %v8105_v0  ;;  %6983 = vmatprep.subr.mxu1 %v8105_v0 }
 0x674   : > { %6941 = vmatpush3.msra.mxu0 %v9530_v12  ;;  %6984 = vmatpush3.msra.mxu1 %v9571_v51 }
 0x675   : > { %6942 = vmatprep.subr.mxu0 %v8105_v0  ;;  %6985 = vmatprep.subr.mxu1 %v8105_v0 }
 0x676   : > { %6943 = vmatpush3.msra.mxu0 %v9542_v40  ;;  %6986 = vmatpush3.msra.mxu1 %v9573_v45 }
 0x677   : > { %6944 = vmatprep.subr.mxu0 %v8105_v0  ;;  %6987 = vmatprep.subr.mxu1 %v8105_v0 }
 0x678   : > { %6945 = vmatpush3.msra.mxu0 %v9557_v48  ;;  %6988 = vmatpush3.msra.mxu1 %v9588_v6 }
 0x679   : > { %6946 = vmatprep.subr.mxu0 %v8105_v0  ;;  %6989 = vmatprep.subr.mxu1 %v8105_v0 }
 0x67a   : > { %6947 = vmatpush3.msra.mxu0 %v9582_v60  ;;  %6990 = vmatpush3.msra.mxu1 %v9600_v8 }
 0x67b   : > { %6948 = vmatprep.subr.mxu0 %v8105_v0  ;;  %6991 = vmatprep.subr.mxu1 %v8105_v0 }
 0x67c   : > { %6949 = vmatpush3.msra.mxu0 %v9586_v1  ;;  %6992 = vmatpush3.msra.mxu1 %v9612_v36  ;;  %v11155_v1 = vand.u32 4294901760, %v9598_v2 }
 0x67d   : > { %6950 = vmatprep.subr.mxu0 %v8105_v0  ;;  %6993 = vmatprep.subr.mxu1 %v8105_v0 }
 0x67e   : > { %6951 = vmatpush3.msra.mxu0 %v9598_v2  ;;  %6994 = vmatpush3.msra.mxu1 %v9624_v22  ;;  %v11156_v2 = vand.u32 4294901760, %v9610_v9 }
 0x67f   : > { %6952 = vmatprep.subr.mxu0 %v8105_v0  ;;  %6995 = vmatprep.subr.mxu1 %v8105_v0 }
 0x680   : > { %6953 = vmatpush3.msra.mxu0 %v9610_v9  ;;  %6996 = vmatpush3.msra.mxu1 %v9636_v31 }
 0x681   : > { %6954 = vmatprep.subr.mxu0 %v8105_v0  ;;  %6998 = vmatmul.mubr.f32.vlgmr.msra.gmra.mxu1 %v2756_v42 }
 0x682   : > { %7035 = vmatprep.subr.mxu1 %v8105_v0  ;;  %6955 = vmatpush3.msra.mxu0 %v9622_v33  ;;  %v577_v33 = vld [vmem:[#allocation10 + $0xa0] sm:$0xff] }
 0x683   : > { %7036 = vmatpush3.msra.mxu1 %v9498_v46  ;;  %6956 = vmatprep.subr.mxu0 %v8105_v0  ;;  %v11146_v46 = vand.u32 4294901760, %v9514_v59  ;;  %v586_v59 = vld [vmem:[#allocation10 + $0xe8] sm:$0xff] }
 0x684   : > { %7037 = vmatprep.subr.mxu1 %v8105_v0  ;;  %6957 = vmatpush3.msra.mxu0 %v9634_v29 }
 0x685   : > { %7038 = vmatpush3.msra.mxu1 %v9500_v55  ;;  %6958 = vmatprep.subr.mxu0 %v8105_v0  ;;  %v11147_v55 = vand.u32 4294901760, %v9517_v38 }
 0x686   : > { %7039 = vmatprep.subr.mxu1 %v8105_v0  ;;  %6959 = vmatpush3.msra.mxu0 %v9646_v7 }
 0x687   : > { %7040 = vmatpush3.msra.mxu1 %v9502_v3  ;;  %6960 = vmatprep.subr.mxu0 %v8105_v0  ;;  %v588_v3 = vld [vmem:[#allocation10 + $0xf8] sm:$0xff] }
 0x688   : > { %7041 = vmatprep.subr.mxu1 %v8105_v0  ;;  %6961 = vmatpush3.msra.mxu0 %v9656_v39 }
 0x689   : > { %6962 = vmatprep.mubr.msk.f32.mxu0 %vm8106_vm0, %v8105_v0  ;;  %7042 = vmatpush3.msra.mxu1 %v9504_v49  ;;  %v11148_v49 = vand.u32 4294901760, %v9523_v41  ;;  %v585_v41 = vld [vmem:[#allocation10 + $0xe0] sm:$0xff] }
 0x68a   : > { %6963 = vmatmul.mubr.f32.vlgmr.msra.gmra.mxu0 %v9711_v56  ;;  %7000 = vmatprep.subr.mxu0 %v8105_v0  ;;  %v579_v56 = vld [vmem:[#allocation10 + $0xb0] sm:$0xff] }
 0x68b   : > { %7043 = vmatprep.subr.mxu1 %v8105_v0  ;;  %7001 = vmatpush3.msra.mxu0 %v2767_v43  ;;  %v11151_v43 = vand.u32 4294901760, %v9542_v40 }
 0x68c   : > { %7044 = vmatpush3.msra.mxu1 %v9506_v62  ;;  %7002 = vmatprep.subr.mxu0 %v8105_v0  ;;  %v587_v62 = vld [vmem:[#allocation10 + $0xf0] sm:$0xff] }
 0x68d   : > { %7045 = vmatprep.subr.mxu1 %v8105_v0  ;;  %7003 = vmatpush3.msra.mxu0 %v11146_v46  ;;  %v9821_v38 = vand.u32 4294901760, %v587_v62 }
 0x68e   : > { %7046 = vmatpush3.msra.mxu1 %v9508_v34  ;;  %7004 = vmatprep.subr.mxu0 %v8105_v0  ;;  %v9814_v34 = vand.u32 4294901760, %v588_v3 }
 0x68f   : > { %7047 = vmatprep.subr.mxu1 %v8105_v0  ;;  %7005 = vmatpush3.msra.mxu0 %v11147_v55 }
 0x690   : > { %7048 = vmatpush3.msra.mxu1 %v9520_v4  ;;  %7006 = vmatprep.subr.mxu0 %v8105_v0  ;;  %v11150_v4 = vand.u32 4294901760, %v9530_v12  ;;  %v9829_v63 = vsub.f32 %v588_v3, %v9814_v34  ;;  %v9839_v12 = vsub.f32 %v587_v62, %v9821_v38  ;;  %v3470_v3 = vand.u32 4294901760, %v9891_v21 }
 0x691   : > { %7049 = vmatprep.subr.mxu1 %v8105_v0  ;;  %7007 = vmatpush3.msra.mxu0 %v11148_v49  ;;  %v9921_v49 = vand.u32 4294901760, %v579_v56  ;;  %v9926_v62 = vsub.f32 %v580_v14, %v9896_v35 }
 0x692   : > { %7050 = vmatpush3.msra.mxu1 %v9532_v61  ;;  %7008 = vmatprep.subr.mxu0 %v8105_v0  ;;  %v9831_v61 = vand.u32 4294901760, %v586_v59  ;;  %v3435_v40 = vand.u32 4294901760, %v9829_v63  ;;  %v3442_v48 = vand.u32 4294901760, %v9839_v12 }
 0x693   : > { %7051 = vmatprep.subr.mxu1 %v8105_v0  ;;  %7009 = vmatpush3.msra.mxu0 %v11149_v57  ;;  %v11158_v57 = vand.u32 4294901760, %v9634_v29  ;;  %v11159_v29 = vand.u32 4294901760, %v9646_v7  ;;  %v9945_v24 = vsub.f32 %v579_v56, %v9921_v49  ;;  %v11160_v7 = vand.u32 4294901760, %v9656_v39  ;;  %v574_v56 = vld [vmem:[#allocation10 + $0x88] sm:$0xff] }
 0x694   : > { %7052 = vmatpush3.msra.mxu1 %v9569_v50  ;;  %7010 = vmatprep.subr.mxu0 %v8105_v0  ;;  %v584_v50 = vld [vmem:[#allocation10 + $0xd8] sm:$0xff]  ;;  %v3436_v60 = vsub.f32 %v9829_v63, %v3435_v40  ;;  %v3443_v17 = vsub.f32 %v9839_v12, %v3442_v48 }
 0x695   : > { %7053 = vmatprep.subr.mxu1 %v8105_v0  ;;  %7011 = vmatpush3.msra.mxu0 %v11150_v4  ;;  %v9852_v16 = vand.u32 4294901760, %v584_v50 }
 0x696   : > { %7054 = vmatpush3.msra.mxu1 %v9571_v51  ;;  %7012 = vmatprep.subr.mxu0 %v8105_v0  ;;  %v9841_v51 = vand.u32 4294901760, %v585_v41  ;;  %v3444_v46 = vand.u32 4294901760, %v3443_v17 }
 0x697   : > { %7055 = vmatprep.subr.mxu1 %v8105_v0  ;;  %7013 = vmatpush3.msra.mxu0 %v11151_v43  ;;  %v9875_v37 = vsub.f32 %v584_v50, %v9852_v16 }
 0x698   : > { %7056 = vmatpush3.msra.mxu1 %v9573_v45  ;;  %7014 = vmatprep.subr.mxu0 %v8105_v0  ;;  %v9850_v45 = vsub.f32 %v586_v59, %v9831_v61 }
 0x699   : > { %7057 = vmatprep.subr.mxu1 %v8105_v0  ;;  %7015 = vmatpush3.msra.mxu0 %v11152_v58  ;;  %v3463_v42 = vand.u32 4294901760, %v9875_v37  ;;  %v576_v58 = vld [vmem:[#allocation10 + $0x98] sm:$0xff] }
 0x69a   : > { %7058 = vmatpush3.msra.mxu1 %v9588_v6  ;;  %7016 = vmatprep.subr.mxu0 %v8105_v0  ;;  %v9861_v6 = vsub.f32 %v585_v41, %v9841_v51  ;;  %v3477_v41 = vand.u32 4294901760, %v9906_v5 }
 0x69b   : > { %7059 = vmatprep.subr.mxu1 %v8105_v0  ;;  %7017 = vmatpush3.msra.mxu0 %v11153_v28  ;;  %v3464_v4 = vsub.f32 %v9875_v37, %v3463_v42  ;;  %v3471_v28 = vsub.f32 %v9891_v21, %v3470_v3 }
 0x69c   : > { %7060 = vmatpush3.msra.mxu1 %v9600_v8  ;;  %7018 = vmatprep.subr.mxu0 %v8105_v0  ;;  %v3449_v8 = vand.u32 4294901760, %v9850_v45  ;;  %v3456_v53 = vand.u32 4294901760, %v9861_v6 }
 0x69d   : > { %7061 = vmatprep.subr.mxu1 %v8105_v0  ;;  %7019 = vmatpush3.msra.mxu0 %v11154_v10  ;;  %v3491_v10 = vand.u32 4294901760, %v9926_v62  ;;  %v3465_v14 = vand.u32 4294901760, %v3464_v4 }
 0x69e   : > { %7062 = vmatpush3.msra.mxu1 %v9612_v36  ;;  %7020 = vmatprep.subr.mxu0 %v8105_v0  ;;  %v9882_v36 = vand.u32 4294901760, %v581_v15  ;;  %v3450_v13 = vsub.f32 %v9850_v45, %v3449_v8  ;;  %v3457_v55 = vsub.f32 %v9861_v6, %v3456_v53 }
 0x69f   : > { %7063 = vmatprep.subr.mxu1 %v8105_v0  ;;  %7021 = vmatpush3.msra.mxu0 %v11155_v1  ;;  %v3478_v1 = vsub.f32 %v9906_v5, %v3477_v41 }
 0x6a0   : > { %7064 = vmatpush3.msra.mxu1 %v9624_v22  ;;  %7022 = vmatprep.subr.mxu0 %v8105_v0  ;;  %v3437_v22 = vand.u32 4294901760, %v3436_v60  ;;  %v9911_v9 = vsub.f32 %v581_v15, %v9882_v36  ;;  %v3451_v59 = vand.u32 4294901760, %v3450_v13  ;;  %v3458_v52 = vand.u32 4294901760, %v3457_v55  ;;  %v575_v60 = vld [vmem:[#allocation10 + $0x90] sm:$0xff] }
 0x6a1   : > { %7065 = vmatprep.subr.mxu1 %v8105_v0  ;;  %7023 = vmatpush3.msra.mxu0 %v11156_v2  ;;  %v9947_v15 = vand.u32 4294901760, %v577_v33  ;;  %v9960_v2 = vand.u32 4294901760, %v576_v58  ;;  %v3498_v13 = vand.u32 4294901760, %v9945_v24  ;;  %v3479_v55 = vand.u32 4294901760, %v3478_v1 }
 0x6a2   : > { %7066 = vmatpush3.msra.mxu1 %v9636_v31  ;;  %7067 = vmatprep.mubr.msk.f32.mxu1 %vm8106_vm0, %v8105_v0  ;;  %v578_v31 = vld [vmem:[#allocation10 + $0xa8] sm:$0xff]  ;;  %v3484_v50 = vand.u32 4294901760, %v9911_v9 }
 0x6a3   : > { %7024 = vmatprep.subr.mxu0 %v8105_v0  ;;  %7068 = vmatmul.mubr.f32.vlgmr.msra.gmra.mxu1 %v9707_v25  ;;  %v9934_v43 = vand.u32 4294901760, %v578_v31 }
 0x6a4   : > { %7025 = vmatpush3.msra.mxu0 %v11157_v11  ;;  %7032 = vmatprep.mubr.msk.f32.mxu0 %vm8106_vm0, %v8105_v0  ;;  %v3485_v39 = vsub.f32 %v9911_v9, %v3484_v50  ;;  %v9972_v11 = vand.u32 4294901760, %v575_v60 }
 0x6a5   : > { %7026 = vmatprep.subr.mxu0 %v8105_v0  ;;  %7105 = vmatprep.subr.mxu1 %v8105_v0  ;;  %v9958_v17 = vsub.f32 %v578_v31, %v9934_v43  ;;  %v9970_v31 = vsub.f32 %v577_v33, %v9947_v15  ;;  %v9982_v33 = vsub.f32 %v576_v58, %v9960_v2 }
 0x6a6   : > { %7027 = vmatpush3.msra.mxu0 %v11158_v57  ;;  %7106 = vmatpush3.msra.mxu1 %v3437_v22  ;;  %v3472_v22 = vand.u32 4294901760, %v3471_v28  ;;  %v3486_v4 = vand.u32 4294901760, %v3485_v39  ;;  %v9994_v28 = vsub.f32 %v575_v60, %v9972_v11 }
 0x6a7   : > { %7028 = vmatprep.subr.mxu0 %v8105_v0  ;;  %7107 = vmatprep.subr.mxu1 %v8105_v0  ;;  %v3505_v57 = vand.u32 4294901760, %v9958_v17  ;;  %v11092_v1 = vand.u32 4294901760, %v9982_v33 }
 0x6a8   : > { %7029 = vmatpush3.msra.mxu0 %v11159_v29  ;;  %7108 = vmatpush3.msra.mxu1 %v3444_v46  ;;  %v573_v46 = vld [vmem:[#allocation10 + $0x80] sm:$0xff]  ;;  %v3499_v29 = vsub.f32 %v9945_v24, %v3498_v13 }
 0x6a9   : > { %7030 = vmatprep.subr.mxu0 %v8105_v0  ;;  %7109 = vmatprep.subr.mxu1 %v8105_v0  ;;  %v9996_v58 = vand.u32 4294901760, %v573_v46 }
 0x6aa   : > { %7031 = vmatpush3.msra.mxu0 %v11160_v7  ;;  %7110 = vmatpush3.msra.mxu1 %v3451_v59  ;;  %v9984_v59 = vand.u32 4294901760, %v574_v56  ;;  %v3500_v60 = vand.u32 4294901760, %v3499_v29 }
 0x6ab   : > { %7033 = vmatmul.mubr.f32.vlgmr.msra.gmra.mxu0 %v9707_v25  ;;  %7111 = vmatprep.subr.mxu1 %v8105_v0  ;;  %v3492_v25 = vsub.f32 %v9926_v62, %v3491_v10 }
 0x6ac   : > { %7112 = vmatpush3.msra.mxu1 %v3458_v52  ;;  %7070 = vmatprep.subr.mxu0 %v8105_v0  ;;  %v3512_v52 = vand.u32 4294901760, %v9970_v31  ;;  %v10006_v39 = vsub.f32 %v574_v56, %v9984_v59 }
 0x6ad   : > { %7113 = vmatprep.subr.mxu1 %v8105_v0  ;;  %7071 = vmatpush3.msra.mxu0 %v9814_v34  ;;  %v3493_v7 = vand.u32 4294901760, %v3492_v25  ;;  %v11093_v25 = vand.u32 4294901760, %v9994_v28 }
 0x6ae   : > { %7114 = vmatpush3.msra.mxu1 %v3465_v14  ;;  %7072 = vmatprep.subr.mxu0 %v8105_v0  ;;  %v3506_v14 = vsub.f32 %v9958_v17, %v3505_v57  ;;  %v11095_v29 = vand.u32 4294901760, %v10006_v39 }
 0x6af   : > { %7115 = vmatprep.subr.mxu1 %v8105_v0  ;;  %7073 = vmatpush3.msra.mxu0 %v9821_v38 }
 0x6b0   : > { %7116 = vmatpush3.msra.mxu1 %v3472_v22  ;;  %7074 = vmatprep.subr.mxu0 %v8105_v0  ;;  %v3513_v22 = vsub.f32 %v9970_v31, %v3512_v52  ;;  %v3507_v56 = vand.u32 4294901760, %v3506_v14 }
 0x6b1   : > { %7117 = vmatprep.subr.mxu1 %v8105_v0  ;;  %7075 = vmatpush3.msra.mxu0 %v9831_v61 }
 0x6b2   : > { %7118 = vmatpush3.msra.mxu1 %v3479_v55  ;;  %7076 = vmatprep.subr.mxu0 %v8105_v0  ;;  %v10016_v55 = vsub.f32 %v573_v46, %v9996_v58  ;;  %v3514_v46 = vand.u32 4294901760, %v3513_v22 }
 0x6b3   : > { %7119 = vmatprep.subr.mxu1 %v8105_v0  ;;  %7077 = vmatpush3.msra.mxu0 %v9841_v51 }
 0x6b4   : > { %7120 = vmatpush3.msra.mxu1 %v3486_v4  ;;  %7078 = vmatprep.subr.mxu0 %v8105_v0  ;;  %v3520_v4 = vsub.f32 %v9982_v33, %v11092_v1  ;;  %v11094_v14 = vand.u32 4294901760, %v10016_v55 }
 0x6b5   : > { %7121 = vmatprep.subr.mxu1 %v8105_v0  ;;  %7079 = vmatpush3.msra.mxu0 %v9852_v16 }
 0x6b6   : > { %7122 = vmatpush3.msra.mxu1 %v3493_v7  ;;  %7080 = vmatprep.subr.mxu0 %v8105_v0  ;;  %v3527_v7 = vsub.f32 %v9994_v28, %v11093_v25  ;;  %v3521_v1 = vand.u32 4294901760, %v3520_v4  ;;  %v3541_v25 = vsub.f32 %v10016_v55, %v11094_v14 }
 0x6b7   : > { %7123 = vmatprep.subr.mxu1 %v8105_v0  ;;  %7081 = vmatpush3.msra.mxu0 %v9863_v20 }
 0x6b8   : > { %7124 = vmatpush3.msra.mxu1 %v3500_v60  ;;  %7082 = vmatprep.subr.mxu0 %v8105_v0  ;;  %v3534_v60 = vsub.f32 %v10006_v39, %v11095_v29  ;;  %v3528_v22 = vand.u32 4294901760, %v3527_v7  ;;  %v3542_v4 = vand.u32 4294901760, %v3541_v25 }
 0x6b9   : > { %7125 = vmatprep.subr.mxu1 %v8105_v0  ;;  %7083 = vmatpush3.msra.mxu0 %v9877_v27 }
 0x6ba   : > { %7126 = vmatpush3.msra.mxu1 %v3507_v56  ;;  %7084 = vmatprep.subr.mxu0 %v8105_v0  ;;  %v3535_v56 = vand.u32 4294901760, %v3534_v60 }
 0x6bb   : > { %7127 = vmatprep.subr.mxu1 %v8105_v0  ;;  %7085 = vmatpush3.msra.mxu0 %v9882_v36 }
 0x6bc   : > { %7128 = vmatpush3.msra.mxu1 %v3514_v46  ;;  %7086 = vmatprep.subr.mxu0 %v8105_v0 }
 0x6bd   : > { %7129 = vmatprep.subr.mxu1 %v8105_v0  ;;  %7087 = vmatpush3.msra.mxu0 %v9896_v35 }
 0x6be   : > { %7130 = vmatpush3.msra.mxu1 %v3521_v1  ;;  %7088 = vmatprep.subr.mxu0 %v8105_v0 }
 0x6bf   : > { %7131 = vmatprep.subr.mxu1 %v8105_v0  ;;  %7089 = vmatpush3.msra.mxu0 %v9921_v49 }
 0x6c0   : > { %7132 = vmatpush3.msra.mxu1 %v3528_v22  ;;  %7090 = vmatprep.subr.mxu0 %v8105_v0 }
 0x6c1   : > { %7133 = vmatprep.subr.mxu1 %v8105_v0  ;;  %7091 = vmatpush3.msra.mxu0 %v9934_v43 }
 0x6c2   : > { %7134 = vmatpush3.msra.mxu1 %v3535_v56  ;;  %7092 = vmatprep.subr.mxu0 %v8105_v0 }
 0x6c3   : > { %7135 = vmatprep.subr.mxu1 %v8105_v0  ;;  %7093 = vmatpush3.msra.mxu0 %v9947_v15 }
 0x6c4   : > { %7136 = vmatpush3.msra.mxu1 %v3542_v4  ;;  %7094 = vmatprep.subr.mxu0 %v8105_v0 }
 0x6c5   : > { %7137 = vmatprep.mubr.msk.f32.mxu1 %vm8106_vm0, %v8105_v0  ;;  %7175 = vmatprep.subr.mxu1 %v8105_v0 }
 0x6c6   : > { %7095 = vmatpush3.msra.mxu0 %v9960_v2  ;;  %7102 = vmatprep.mubr.msk.f32.mxu0 %vm8106_vm0, %v8105_v0 }
 0x6c7   : > { %7096 = vmatprep.subr.mxu0 %v8105_v0 }
 0x6c8   : > { %7097 = vmatpush3.msra.mxu0 %v9972_v11 }
 0x6c9   : > { %7098 = vmatprep.subr.mxu0 %v8105_v0 }
 0x6ca   : > { %7099 = vmatpush3.msra.mxu0 %v9984_v59 }
 0x6cb   : > { %7100 = vmatprep.subr.mxu0 %v8105_v0 }
 0x6cc   : > { %7101 = vmatpush3.msra.mxu0 %v9996_v58 }
 0x6cd   : > { %7140 = vmatprep.subr.mxu0 %v8105_v0 }
 0x6ea   : > { %v3331_v1 = vpop.xlane.xlu0 %3330 }
 0x6eb   : > { %v3332_v25 = vmul.f32 0.03125, %v3331_v1 }
 0x6ec   : > { %v3335_v46 = vpop.xlane.xlu1 %3334 }
 0x6ed   : > { %v3336_v7 = vmul.f32 0.03125, %v3335_v46  ;;  %v3337_v60 = vsub.f32 %v9705_v32, %v3332_v25 }
 0x6ef   : > { %v3338_v22 = vmul.f32 %v3336_v7, %v9694_v44 }
 0x6f1   : > { %v3339_v56 = vsub.f32 %v3337_v60, %v3338_v22 }
 0x6f3   : > { %v3340_v4 = vmul.f32 %v9691_v54, %v3339_v56 }
 0x6f5   : > { %v10072_v14 = vand.u32 4294901760, %v3340_v4 }
 0x6f7   : > { %7138 = vmatmul.mubr.f32.vlgmr.msra.gmra.mxu1 %v10072_v14  ;;  %v10076_v29 = vsub.f32 %v3340_v4, %v10072_v14 }
 0x6f8   : > { %7176 = vmatpush3.msra.mxu1 %v9814_v34  ;;  %7207 = vmatprep.mubr.msk.f32.mxu1 %vm8106_vm0, %v8105_v0 }
 0x6f9   : > { %7177 = vmatprep.subr.mxu1 %v8105_v0  ;;  %v3424_v32 = vand.u32 4294901760, %v10076_v29 }
 0x6fa   : > { %7178 = vmatpush3.msra.mxu1 %v9821_v38 }
 0x6fb   : > { %7179 = vmatprep.subr.mxu1 %v8105_v0  ;;  %v3425_v54 = vsub.f32 %v10076_v29, %v3424_v32 }
 0x6fc   : > { %7180 = vmatpush3.msra.mxu1 %v9831_v61 }
 0x6fd   : > { %7181 = vmatprep.subr.mxu1 %v8105_v0  ;;  %v3426_v44 = vand.u32 4294901760, %v3425_v54  ;;  %v563_v54 = vld [vmem:[#allocation10 + $0x38] sm:$0xff] }
 0x6fe   : > { %7182 = vmatpush3.msra.mxu1 %v9841_v51 }
 0x6ff   : > { %7183 = vmatprep.subr.mxu1 %v8105_v0  ;;  %7103 = vmatmul.mubr.f32.vlgmr.msra.gmra.mxu0 %v3426_v44  ;;  %v562_v44 = vld [vmem:[#allocation10 + $0x30] sm:$0xff] }
 0x700   : > { %7141 = vmatpush3.msra.mxu0 %v9829_v63  ;;  %7184 = vmatpush3.msra.mxu1 %v9852_v16 }
 0x701   : > { %7142 = vmatprep.subr.mxu0 %v8105_v0  ;;  %7185 = vmatprep.subr.mxu1 %v8105_v0 }
 0x702   : > { %7143 = vmatpush3.msra.mxu0 %v9839_v12  ;;  %7186 = vmatpush3.msra.mxu1 %v9863_v20  ;;  %v11161_v12 = vand.u32 4294901760, %v9982_v33 }
 0x703   : > { %7144 = vmatprep.subr.mxu0 %v8105_v0  ;;  %7187 = vmatprep.subr.mxu1 %v8105_v0 }
 0x704   : > { %7145 = vmatpush3.msra.mxu0 %v9850_v45  ;;  %7188 = vmatpush3.msra.mxu1 %v9877_v27  ;;  %v11164_v45 = vand.u32 4294901760, %v10016_v55 }
 0x705   : > { %7146 = vmatprep.subr.mxu0 %v8105_v0  ;;  %7189 = vmatprep.subr.mxu1 %v8105_v0 }
 0x706   : > { %7147 = vmatpush3.msra.mxu0 %v9861_v6  ;;  %7190 = vmatpush3.msra.mxu1 %v9882_v36 }
 0x707   : > { %7148 = vmatprep.subr.mxu0 %v8105_v0  ;;  %7191 = vmatprep.subr.mxu1 %v8105_v0 }
 0x708   : > { %7149 = vmatpush3.msra.mxu0 %v9875_v37  ;;  %7192 = vmatpush3.msra.mxu1 %v9896_v35 }
 0x709   : > { %7150 = vmatprep.subr.mxu0 %v8105_v0  ;;  %7193 = vmatprep.subr.mxu1 %v8105_v0 }
 0x70a   : > { %7151 = vmatpush3.msra.mxu0 %v9891_v21  ;;  %7194 = vmatpush3.msra.mxu1 %v9921_v49 }
 0x70b   : > { %7152 = vmatprep.subr.mxu0 %v8105_v0  ;;  %7195 = vmatprep.subr.mxu1 %v8105_v0 }
 0x70c   : > { %7153 = vmatpush3.msra.mxu0 %v9906_v5  ;;  %7196 = vmatpush3.msra.mxu1 %v9934_v43 }
 0x70d   : > { %7154 = vmatprep.subr.mxu0 %v8105_v0  ;;  %7197 = vmatprep.subr.mxu1 %v8105_v0 }
 0x70e   : > { %7155 = vmatpush3.msra.mxu0 %v9911_v9  ;;  %7198 = vmatpush3.msra.mxu1 %v9947_v15 }
 0x70f   : > { %7156 = vmatprep.subr.mxu0 %v8105_v0  ;;  %7199 = vmatprep.subr.mxu1 %v8105_v0 }
 0x710   : > { %7157 = vmatpush3.msra.mxu0 %v9926_v62  ;;  %7200 = vmatpush3.msra.mxu1 %v9960_v2  ;;  %v570_v62 = vld [vmem:[#allocation10 + $0x70] sm:$0xff] }
 0x711   : > { %7158 = vmatprep.subr.mxu0 %v8105_v0  ;;  %7201 = vmatprep.subr.mxu1 %v8105_v0 }
 0x712   : > { %7159 = vmatpush3.msra.mxu0 %v9945_v24  ;;  %7202 = vmatpush3.msra.mxu1 %v9972_v11 }
 0x713   : > { %7160 = vmatprep.subr.mxu0 %v8105_v0  ;;  %7203 = vmatprep.subr.mxu1 %v8105_v0 }
 0x714   : > { %7161 = vmatpush3.msra.mxu0 %v9958_v17  ;;  %7204 = vmatpush3.msra.mxu1 %v9984_v59  ;;  %v566_v17 = vld [vmem:[#allocation10 + $0x50] sm:$0xff] }
 0x715   : > { %7162 = vmatprep.subr.mxu0 %v8105_v0  ;;  %7205 = vmatprep.subr.mxu1 %v8105_v0 }
 0x716   : > { %7163 = vmatpush3.msra.mxu0 %v9970_v31  ;;  %7206 = vmatpush3.msra.mxu1 %v9996_v58  ;;  %v10258_v31 = vand.u32 4294901760, %v566_v17 }
 0x717   : > { %7164 = vmatprep.subr.mxu0 %v8105_v0  ;;  %7208 = vmatmul.mubr.f32.vlgmr.msra.gmra.mxu1 %v3424_v32 }
 0x718   : > { %7245 = vmatprep.subr.mxu1 %v8105_v0  ;;  %7165 = vmatpush3.msra.mxu0 %v9982_v33 }
 0x719   : > { %7246 = vmatpush3.msra.mxu1 %v9814_v34  ;;  %7166 = vmatprep.subr.mxu0 %v8105_v0 }
 0x71a   : > { %7247 = vmatprep.subr.mxu1 %v8105_v0  ;;  %7167 = vmatpush3.msra.mxu0 %v9994_v28 }
 0x71b   : > { %7248 = vmatpush3.msra.mxu1 %v9821_v38  ;;  %7168 = vmatprep.subr.mxu0 %v8105_v0 }
 0x71c   : > { %7249 = vmatprep.subr.mxu1 %v8105_v0  ;;  %7169 = vmatpush3.msra.mxu0 %v10006_v39 }
 0x71d   : > { %7250 = vmatpush3.msra.mxu1 %v9831_v61  ;;  %7170 = vmatprep.subr.mxu0 %v8105_v0 }
 0x71e   : > { %7251 = vmatprep.subr.mxu1 %v8105_v0  ;;  %7171 = vmatpush3.msra.mxu0 %v10016_v55  ;;  %v10280_v55 = vsub.f32 %v566_v17, %v10258_v31 }
 0x71f   : > { %7172 = vmatprep.mubr.msk.f32.mxu0 %vm8106_vm0, %v8105_v0  ;;  %7252 = vmatpush3.msra.mxu1 %v9841_v51  ;;  %v11162_v51 = vand.u32 4294901760, %v9994_v28 }
 0x720   : > { %7173 = vmatmul.mubr.f32.vlgmr.msra.gmra.mxu0 %v10076_v29  ;;  %7210 = vmatprep.subr.mxu0 %v8105_v0  ;;  %v4130_v32 = vand.u32 4294901760, %v10280_v55 }
 0x721   : > { %7253 = vmatprep.subr.mxu1 %v8105_v0  ;;  %7211 = vmatpush3.msra.mxu0 %v3435_v40  ;;  %v10159_v34 = vpop.f32.mrf.mxu1  ;;  %v11163_v40 = vand.u32 4294901760, %v10006_v39 }
 0x722   : > { %7254 = vmatpush3.msra.mxu1 %v9852_v16  ;;  %7212 = vmatprep.subr.mxu0 %v8105_v0 }
 0x723   : > { %7255 = vmatprep.subr.mxu1 %v8105_v0  ;;  %7213 = vmatpush3.msra.mxu0 %v3442_v48  ;;  %v6929_v38 = vpop.f32.mrf.mxu1 }
 0x724   : > { %7256 = vmatpush3.msra.mxu1 %v9863_v20  ;;  %7214 = vmatprep.subr.mxu0 %v8105_v0 }
 0x725   : > { %7257 = vmatprep.subr.mxu1 %v8105_v0  ;;  %7215 = vmatpush3.msra.mxu0 %v3449_v8  ;;  %v5508_v8 = vld [vmem:[%s11051_s9] ss:$0 sm:$0xff] }
 0x726   : > { %7258 = vmatpush3.msra.mxu1 %v9877_v27  ;;  %7216 = vmatprep.subr.mxu0 %v8105_v0 }
 0x727   : > { %7259 = vmatprep.subr.mxu1 %v8105_v0  ;;  %7217 = vmatpush3.msra.mxu0 %v3456_v53 }
 0x728   : > { %7260 = vmatpush3.msra.mxu1 %v9882_v36  ;;  %7218 = vmatprep.subr.mxu0 %v8105_v0 }
 0x729   : > { %7261 = vmatprep.subr.mxu1 %v8105_v0  ;;  %7219 = vmatpush3.msra.mxu0 %v3463_v42  ;;  %v2760_v63 = vpop.f32.mrf.mxu0 }
 0x72a   : > { %7262 = vmatpush3.msra.mxu1 %v9896_v35  ;;  %7220 = vmatprep.subr.mxu0 %v8105_v0  ;;  %v2761_v37 = vadd.f32 %v5508_v8, %v2760_v63 }
 0x72b   : > { %7263 = vmatprep.subr.mxu1 %v8105_v0  ;;  %7221 = vmatpush3.msra.mxu0 %v3470_v3  ;;  %v6894_v61 = vpop.f32.mrf.mxu0 }
 0x72c   : > { %7264 = vmatpush3.msra.mxu1 %v9921_v49  ;;  %7222 = vmatprep.subr.mxu0 %v8105_v0  ;;  %v2912_v36 = vadd.f32 %v10159_v34, %v2761_v37  ;;  %v571_v49 = vld [vmem:[#allocation10 + $0x78] sm:$0xff] }
 0x72d   : > { %7265 = vmatprep.subr.mxu1 %v8105_v0  ;;  %7223 = vmatpush3.msra.mxu0 %v3477_v41  ;;  %v569_v41 = vld [vmem:[#allocation10 + $0x68] sm:$0xff] }
 0x72e   : > { %7266 = vmatpush3.msra.mxu1 %v9934_v43  ;;  %7224 = vmatprep.subr.mxu0 %v8105_v0  ;;  %v10248_v43 = vand.u32 4294901760, %v571_v49  ;;  %v10252_v24 = vand.u32 4294901760, %v569_v41 }
 0x72f   : > { %7267 = vmatprep.subr.mxu1 %v8105_v0  ;;  %7225 = vmatpush3.msra.mxu0 %v3484_v50  ;;  %v10250_v50 = vand.u32 4294901760, %v570_v62 }
 0x730   : > { %7268 = vmatpush3.msra.mxu1 %v9947_v15  ;;  %7226 = vmatprep.subr.mxu0 %v8105_v0  ;;  %v568_v15 = vld [vmem:[#allocation10 + $0x60] sm:$0xff]  ;;  %v10261_v33 = vsub.f32 %v571_v49, %v10248_v43 }
 0x731   : > { %7269 = vmatprep.subr.mxu1 %v8105_v0  ;;  %7227 = vmatpush3.msra.mxu0 %v3491_v10  ;;  %v567_v10 = vld [vmem:[#allocation10 + $0x58] sm:$0xff] }
 0x732   : > { %7270 = vmatpush3.msra.mxu1 %v9960_v2  ;;  %7228 = vmatprep.subr.mxu0 %v8105_v0  ;;  %v10254_v2 = vand.u32 4294901760, %v568_v15  ;;  %v4095_v29 = vand.u32 4294901760, %v10261_v33 }
 0x733   : > { %7271 = vmatprep.subr.mxu1 %v8105_v0  ;;  %7229 = vmatpush3.msra.mxu0 %v3498_v13  ;;  %v10256_v13 = vand.u32 4294901760, %v567_v10 }
 0x734   : > { %7272 = vmatpush3.msra.mxu1 %v9972_v11  ;;  %7230 = vmatprep.subr.mxu0 %v8105_v0  ;;  %v565_v11 = vld [vmem:[#allocation10 + $0x48] sm:$0xff]  ;;  %v4096_v60 = vsub.f32 %v10261_v33, %v4095_v29 }
 0x735   : > { %7273 = vmatprep.subr.mxu1 %v8105_v0  ;;  %7231 = vmatpush3.msra.mxu0 %v3505_v57  ;;  %v564_v57 = vld [vmem:[#allocation10 + $0x40] sm:$0xff]  ;;  %v10270_v28 = vand.u32 4294901760, %v565_v11  ;;  %v10276_v39 = vsub.f32 %v567_v10, %v10256_v13 }
 0x736   : > { %7274 = vmatpush3.msra.mxu1 %v9984_v59  ;;  %7232 = vmatprep.subr.mxu0 %v8105_v0  ;;  %v10264_v59 = vsub.f32 %v570_v62, %v10250_v50  ;;  %v10286_v25 = vand.u32 4294901760, %v564_v57  ;;  %v4097_v34 = vand.u32 4294901760, %v4096_v60 }
 0x737   : > { %7275 = vmatprep.subr.mxu1 %v8105_v0  ;;  %7233 = vmatpush3.msra.mxu0 %v3512_v52  ;;  %v10267_v52 = vsub.f32 %v569_v41, %v10252_v24  ;;  %v10291_v7 = vsub.f32 %v565_v11, %v10270_v28  ;;  %v4123_v4 = vand.u32 4294901760, %v10276_v39 }
 0x738   : > { %7276 = vmatpush3.msra.mxu1 %v9996_v58  ;;  %7277 = vmatprep.mubr.msk.f32.mxu1 %vm8106_vm0, %v8105_v0  ;;  %v10273_v58 = vsub.f32 %v568_v15, %v10254_v2  ;;  %v10311_v61 = vsub.f32 %v564_v57, %v10286_v25 }
 0x739   : > { %7234 = vmatprep.subr.mxu0 %v8105_v0  ;;  %7278 = vmatmul.mubr.f32.vlgmr.msra.gmra.mxu1 %v10072_v14  ;;  %v4109_v1 = vand.u32 4294901760, %v10267_v52 }
 0x73a   : > { %7235 = vmatpush3.msra.mxu0 %v11161_v12  ;;  %7242 = vmatprep.mubr.msk.f32.mxu0 %vm8106_vm0, %v8105_v0  ;;  %v4116_v46 = vand.u32 4294901760, %v10273_v58  ;;  %v4137_v12 = vand.u32 4294901760, %v10291_v7 }
 0x73b   : > { %7236 = vmatprep.subr.mxu0 %v8105_v0  ;;  %7315 = vmatprep.subr.mxu1 %v8105_v0  ;;  %v4110_v56 = vsub.f32 %v10267_v52, %v4109_v1 }
 0x73c   : > { %7237 = vmatpush3.msra.mxu0 %v11162_v51  ;;  %7347 = vmatprep.mubr.msk.f32.mxu1 %vm8106_vm0, %v8105_v0  ;;  %v4117_v63 = vsub.f32 %v10273_v58, %v4116_v46 }
 0x73d   : > { %7238 = vmatprep.subr.mxu0 %v8105_v0  ;;  %7316 = vmatpush3.msra.mxu1 %v4097_v34  ;;  %v4111_v51 = vand.u32 4294901760, %v4110_v56 }
 0x73e   : > { %7239 = vmatpush3.msra.mxu0 %v11163_v40  ;;  %v4124_v40 = vsub.f32 %v10276_v39, %v4123_v4  ;;  %7317 = vmatprep.subr.mxu1 %v8105_v0 }
 0x73f   : > { %7240 = vmatprep.subr.mxu0 %v8105_v0 }
 0x740   : > { %7241 = vmatpush3.msra.mxu0 %v11164_v45  ;;  %v10319_v45 = vand.u32 4294901760, %v563_v54 }
 0x741   : > { %7243 = vmatmul.mubr.f32.vlgmr.msra.gmra.mxu0 %v10072_v14  ;;  %v3104_v16 = vpop.f32.mrf.mxu1  ;;  %7280 = vmatprep.subr.mxu0 %v8105_v0  ;;  %v4102_v14 = vand.u32 4294901760, %v10264_v59 }
 0x742   : > { %7312 = vmatprep.mubr.msk.f32.mxu0 %vm8106_vm0, %v8105_v0  ;;  %7281 = vmatpush3.msra.mxu0 %v10248_v43  ;;  %v10330_v8 = vsub.f32 %v563_v54, %v10319_v45  ;;  %v3982_v54 = vmul.f32 -0.5, %v9315_v26 }
 0x743   : > { %v6999_v48 = vpop.f32.mrf.mxu1  ;;  %7282 = vmatprep.subr.mxu0 %v8105_v0  ;;  %v4103_v22 = vsub.f32 %v10264_v59, %v4102_v14 }
 0x744   : > { %7283 = vmatpush3.msra.mxu0 %v10250_v50  ;;  %v4131_v48 = vsub.f32 %v10280_v55, %v4130_v32 }
 0x745   : > { %7284 = vmatprep.subr.mxu0 %v8105_v0  ;;  %v4104_v38 = vand.u32 4294901760, %v4103_v22 }
 0x746   : > { %7285 = vmatpush3.msra.mxu0 %v10252_v24 }
 0x747   : > { %7286 = vmatprep.subr.mxu0 %v8105_v0  ;;  %7318 = vmatpush3.msra.mxu1 %v4104_v38 }
 0x748   : > { %7287 = vmatpush3.msra.mxu0 %v10254_v2  ;;  %7319 = vmatprep.subr.mxu1 %v8105_v0 }
 0x749   : > { %7288 = vmatprep.subr.mxu0 %v8105_v0  ;;  %7320 = vmatpush3.msra.mxu1 %v4111_v51 }
 0x74a   : > { %v3015_v6 = vpop.f32.mrf.mxu0  ;;  %7289 = vmatpush3.msra.mxu0 %v10256_v13  ;;  %7321 = vmatprep.subr.mxu1 %v8105_v0 }
 0x74b   : > { %v3016_v21 = vadd.f32 %v3015_v6, %v2912_v36  ;;  %7290 = vmatprep.subr.mxu0 %v8105_v0  ;;  %v4118_v6 = vand.u32 4294901760, %v4117_v63  ;;  %v4138_v36 = vsub.f32 %v10291_v7, %v4137_v12 }
 0x74c   : > { %v6964_v20 = vpop.f32.mrf.mxu0  ;;  %7291 = vmatpush3.msra.mxu0 %v10258_v31 }
 0x74d   : > { %v3105_v35 = vadd.f32 %v3104_v16, %v3016_v21  ;;  %v10321_v16 = vand.u32 4294901760, %v562_v44  ;;  %v4144_v20 = vand.u32 4294901760, %v10311_v61  ;;  %7292 = vmatprep.subr.mxu0 %v8105_v0  ;;  %7322 = vmatpush3.msra.mxu1 %v4118_v6  ;;  %v4132_v21 = vand.u32 4294901760, %v4131_v48 }
 0x74e   : > { %7293 = vmatpush3.msra.mxu0 %v10270_v28  ;;  %7323 = vmatprep.subr.mxu1 %v8105_v0 }
 0x74f   : > { %v10334_v37 = vsub.f32 %v562_v44, %v10321_v16  ;;  %7294 = vmatprep.subr.mxu0 %v8105_v0  ;;  %v3983_v44 = vmul.f32 %v3982_v54, %v9315_v26 }
 0x750   : > { %7295 = vmatpush3.msra.mxu0 %v10286_v25 }
 0x751   : > { %7296 = vmatprep.subr.mxu0 %v8105_v0  ;;  %v3984_v34 = vmul.f32 1.442695, %v3983_v44 }
 0x752   : > { %7297 = vmatpush3.msra.mxu0 %v10319_v45 }
 0x753   : > { %7298 = vmatprep.subr.mxu0 %v8105_v0  ;;  %7827 = vpow2.f32 %v3984_v34 }
 0x754   : > { %7299 = vmatpush3.msra.mxu0 %v10321_v16 }
 0x755   : > { %7300 = vmatprep.subr.mxu0 %v8105_v0 }
 0x760   : > { %v7828_v51 = vpop.eup %7827 }
 0x761   : > { %v3986_v6 = vmul.f32 0.3989423, %v7828_v51 }
 0x763   : > { %v3310_v27 = vpop.f32.mrf.mxu1 }
 0x765   : > { %v7069_v53 = vpop.f32.mrf.mxu1 }
 0x766   : > { %v4151_v53 = vand.u32 4294901760, %v10330_v8 }
 0x76b   : > { %v3223_v42 = vpop.f32.mrf.mxu0 }
 0x76c   : > { %v3224_v5 = vadd.f32 %v3223_v42, %v3105_v35  ;;  %v4145_v35 = vsub.f32 %v10311_v61, %v4144_v20  ;;  %v4158_v42 = vand.u32 4294901760, %v10334_v37 }
 0x76d   : > { %v7034_v9 = vpop.f32.mrf.mxu0 }
 0x76e   : > { %v3311_v3 = vadd.f32 %v3310_v27, %v3224_v5  ;;  %v4125_v27 = vand.u32 4294901760, %v4124_v40  ;;  %v4139_v5 = vand.u32 4294901760, %v4138_v36  ;;  %v4152_v9 = vsub.f32 %v10330_v8, %v4151_v53 }
 0x76f   : > { %v4159_v49 = vsub.f32 %v10334_v37, %v4158_v42 }
 0x770   : > { %3314 = vst [vmem:[%s485_s21] sm:$0xff] %v3311_v3  ;;  %7324 = vmatpush3.msra.mxu1 %v4125_v27  ;;  %v4146_v3 = vand.u32 4294901760, %v4145_v35  ;;  %v4153_v62 = vand.u32 4294901760, %v4152_v9  ;;  %v3987_v35 = vmul.f32 %v3986_v6, %v9315_v26 }
 0x771   : > { %7325 = vmatprep.subr.mxu1 %v8105_v0  ;;  %v4160_v41 = vand.u32 4294901760, %v4159_v49 }
 0x772   : > { %7326 = vmatpush3.msra.mxu1 %v4132_v21 }
 0x773   : > { %7327 = vmatprep.subr.mxu1 %v8105_v0 }
 0x774   : > { %7328 = vmatpush3.msra.mxu1 %v4139_v5 }
 0x775   : > { %7329 = vmatprep.subr.mxu1 %v8105_v0 }
 0x776   : > { %7330 = vmatpush3.msra.mxu1 %v4146_v3  ;;  %v3988_v3 = vadd.f32 %v3987_v35, %v9319_v18  ;;  %v559_v18 = vld [vmem:[#allocation10 + $0x18] sm:$0xff] }
 0x777   : > { %7331 = vmatprep.subr.mxu1 %v8105_v0 }
 0x778   : > { %7332 = vmatpush3.msra.mxu1 %v4153_v62  ;;  %v561_v62 = vld [vmem:[#allocation10 + $0x28] sm:$0xff] }
 0x779   : > { %7333 = vmatprep.subr.mxu1 %v8105_v0 }
 0x77a   : > { %7334 = vmatpush3.msra.mxu1 %v4160_v41 }
 0x77b   : > { %7335 = vmatprep.subr.mxu1 %v8105_v0 }
 0x7b7   : > { %v3579_v15 = vpop.f32.mrf.mxu1 }
 0x7b9   : > { %v7139_v10 = vpop.f32.mrf.mxu1 }
 0x7ba   : > { %v560_v10 = vld [vmem:[#allocation10 + $0x20] sm:$0xff] }
 0x7bf   : > { %v3428_v17 = vpop.f32.mrf.mxu0 }
 0x7c0   : > { %v3580_v63 = vadd.f32 %v3579_v15, %v3428_v17  ;;  %v10377_v15 = vand.u32 4294901760, %v561_v62 }
 0x7c1   : > { %v7104_v11 = vpop.f32.mrf.mxu0 }
 0x7c2   : > { %v10380_v17 = vsub.f32 %v561_v62, %v10377_v15  ;;  %v10382_v11 = vand.u32 4294901760, %v560_v10  ;;  %7301 = vmatpush3.msra.mxu0 %v10377_v15 }
 0x7c3   : > { %7302 = vmatprep.subr.mxu0 %v8105_v0 }
 0x7c4   : > { %7303 = vmatpush3.msra.mxu0 %v10382_v11 }
 0x7c5   : > { %7304 = vmatprep.subr.mxu0 %v8105_v0 }
 0x7d7   : > { %v3772_v57 = vpop.f32.mrf.mxu1 }
 0x7d9   : > { %v7209_v60 = vpop.f32.mrf.mxu1 }
 0x7da   : > { %v10388_v60 = vsub.f32 %v560_v10, %v10382_v11 }
 0x7dc   : > { %v4172_v44 = vand.u32 4294901760, %v10388_v60 }
 0x7e0   : > { %v3683_v22 = vpop.f32.mrf.mxu0 }
 0x7e1   : > { %v3684_v48 = vadd.f32 %v3683_v22, %v3580_v63  ;;  %v10390_v22 = vand.u32 4294901760, %v559_v18  ;;  %v557_v63 = vld [vmem:[#allocation10 + $0x8] sm:$0xff] }
 0x7e2   : > { %v7174_v56 = vpop.f32.mrf.mxu0 }
 0x7e3   : > { %v3773_v27 = vadd.f32 %v3772_v57, %v3684_v48  ;;  %v4165_v57 = vand.u32 4294901760, %v10380_v17  ;;  %v558_v56 = vld [vmem:[#allocation10 + $0x10] sm:$0xff]  ;;  %v10399_v34 = vsub.f32 %v559_v18, %v10390_v22  ;;  %7305 = vmatpush3.msra.mxu0 %v10390_v22 }
 0x7e4   : > { %7306 = vmatprep.subr.mxu0 %v8105_v0 }
 0x7e5   : > { %v4166_v54 = vsub.f32 %v10380_v17, %v4165_v57  ;;  %v11099_v48 = vand.u32 4294901760, %v10399_v34 }
 0x7e7   : > { %v4167_v51 = vand.u32 4294901760, %v4166_v54  ;;  %v4180_v35 = vsub.f32 %v10399_v34, %v11099_v48 }
 0x7e9   : > { %7336 = vmatpush3.msra.mxu1 %v4167_v51  ;;  %v4181_v62 = vand.u32 4294901760, %v4180_v35 }
 0x7ea   : > { %7337 = vmatprep.subr.mxu1 %v8105_v0 }
 0x7f9   : > { %v3978_v38 = vpop.f32.mrf.mxu1 }
 0x7fb   : > { %v7279_v40 = vpop.f32.mrf.mxu1 }
 0x7fc   : > { %v4173_v40 = vsub.f32 %v10388_v60, %v4172_v44 }
 0x801   : > { %v3891_v36 = vpop.f32.mrf.mxu0 }
 0x802   : > { %v3892_v21 = vadd.f32 %v3891_v36, %v3773_v27  ;;  %v10413_v27 = vand.u32 4294901760, %v557_v63  ;;  %v556_v36 = vld [vmem:[#allocation10] sm:$0xff] }
 0x803   : > { %v7244_v5 = vpop.f32.mrf.mxu0 }
 0x804   : > { %v3979_v9 = vadd.f32 %v3978_v38, %v3892_v21  ;;  %v10401_v38 = vand.u32 4294901760, %v558_v56  ;;  %v4174_v21 = vand.u32 4294901760, %v4173_v40 }
 0x806   : > { %v10372_v49 = vmul.f32 %v3988_v3, %v3979_v9  ;;  %v10410_v6 = vsub.f32 %v558_v56, %v10401_v38  ;;  %7307 = vmatpush3.msra.mxu0 %v10401_v38  ;;  %v10420_v9 = vand.u32 4294901760, %v556_v36  ;;  %v10424_v3 = vsub.f32 %v557_v63, %v10413_v27  ;;  %7338 = vmatpush3.msra.mxu1 %v4174_v21 }
 0x807   : > { %7308 = vmatprep.subr.mxu0 %v8105_v0  ;;  %7339 = vmatprep.subr.mxu1 %v8105_v0 }
 0x808   : > { %3990 = vadd.xlane.f32.xlu0 %v10372_v49  ;;  %v3993_v41 = vmul.f32 %v10372_v49, %v9315_v26  ;;  %v11097_v5 = vand.u32 4294901760, %v10410_v6  ;;  %7309 = vmatpush3.msra.mxu0 %v10413_v27  ;;  %v10431_v10 = vsub.f32 %v556_v36, %v10420_v9  ;;  %v11096_v18 = vand.u32 4294901760, %v10424_v3 }
 0x809   : > { %7310 = vmatprep.subr.mxu0 %v8105_v0  ;;  %7340 = vmatpush3.msra.mxu1 %v4181_v62 }
 0x80a   : > { %3994 = vadd.xlane.f32.xlu1 %v3993_v41  ;;  %v4187_v41 = vsub.f32 %v10410_v6, %v11097_v5  ;;  %7311 = vmatpush3.msra.mxu0 %v10420_v9  ;;  %v11098_v54 = vand.u32 4294901760, %v10431_v10  ;;  %v4194_v63 = vsub.f32 %v10424_v3, %v11096_v18 }
 0x80b   : > { %7350 = vmatprep.subr.mxu0 %v8105_v0  ;;  %7341 = vmatprep.subr.mxu1 %v8105_v0 }
 0x80c   : > { %v4188_v56 = vand.u32 4294901760, %v4187_v41  ;;  %v4201_v51 = vsub.f32 %v10431_v10, %v11098_v54  ;;  %v4195_v40 = vand.u32 4294901760, %v4194_v63 }
 0x80e   : > { %7342 = vmatpush3.msra.mxu1 %v4188_v56  ;;  %v4202_v36 = vand.u32 4294901760, %v4201_v51 }
 0x80f   : > { %7343 = vmatprep.subr.mxu1 %v8105_v0 }
 0x810   : > { %7344 = vmatpush3.msra.mxu1 %v4195_v40 }
 0x811   : > { %7345 = vmatprep.subr.mxu1 %v8105_v0 }
 0x812   : > { %7346 = vmatpush3.msra.mxu1 %v4202_v36 }
 0x813   : > { %7385 = vmatprep.subr.mxu1 %v8105_v0 }
 0x891   : > { %v3991_v21 = vpop.xlane.xlu0 %3990 }
 0x892   : > { %v3992_v35 = vmul.f32 0.03125, %v3991_v21 }
 0x893   : > { %v3995_v62 = vpop.xlane.xlu1 %3994 }
 0x894   : > { %v3996_v41 = vmul.f32 0.03125, %v3995_v62  ;;  %v3997_v56 = vsub.f32 %v10372_v49, %v3992_v35 }
 0x896   : > { %v3998_v18 = vmul.f32 %v3996_v41, %v9315_v26 }
 0x898   : > { %v3999_v5 = vsub.f32 %v3997_v56, %v3998_v18 }
 0x89a   : > { %v4000_v54 = vmul.f32 %v9312_v19, %v3999_v5 }
 0x89c   : > { %v10452_v48 = vand.u32 4294901760, %v4000_v54 }
 0x89e   : > { %7348 = vmatmul.mubr.f32.vlgmr.msra.gmra.mxu1 %v10452_v48  ;;  %v10456_v63 = vsub.f32 %v4000_v54, %v10452_v48 }
 0x89f   : > { %7386 = vmatpush3.msra.mxu1 %v10248_v43  ;;  %7417 = vmatprep.mubr.msk.f32.mxu1 %vm8106_vm0, %v8105_v0 }
 0x8a0   : > { %7387 = vmatprep.subr.mxu1 %v8105_v0  ;;  %v4084_v49 = vand.u32 4294901760, %v10456_v63 }
 0x8a1   : > { %7388 = vmatpush3.msra.mxu1 %v10250_v50 }
 0x8a2   : > { %7389 = vmatprep.subr.mxu1 %v8105_v0  ;;  %v4085_v19 = vsub.f32 %v10456_v63, %v4084_v49 }
 0x8a3   : > { %7390 = vmatpush3.msra.mxu1 %v10252_v24 }
 0x8a4   : > { %7391 = vmatprep.subr.mxu1 %v8105_v0  ;;  %v4086_v26 = vand.u32 4294901760, %v4085_v19 }
 0x8a5   : > { %7392 = vmatpush3.msra.mxu1 %v10254_v2 }
 0x8a6   : > { %7393 = vmatprep.subr.mxu1 %v8105_v0  ;;  %7313 = vmatmul.mubr.f32.vlgmr.msra.gmra.mxu0 %v4086_v26 }
 0x8a7   : > { %7351 = vmatpush3.msra.mxu0 %v10261_v33  ;;  %7394 = vmatpush3.msra.mxu1 %v10256_v13  ;;  %v553_v33 = vld [vmem:[#allocation8 + $0x68] sm:$0xff] }
 0x8a8   : > { %7352 = vmatprep.subr.mxu0 %v8105_v0  ;;  %7395 = vmatprep.subr.mxu1 %v8105_v0 }
 0x8a9   : > { %7353 = vmatpush3.msra.mxu0 %v10264_v59  ;;  %7396 = vmatpush3.msra.mxu1 %v10258_v31 }
 0x8aa   : > { %7354 = vmatprep.subr.mxu0 %v8105_v0  ;;  %7397 = vmatprep.subr.mxu1 %v8105_v0 }
 0x8ab   : > { %7355 = vmatpush3.msra.mxu0 %v10267_v52  ;;  %7398 = vmatpush3.msra.mxu1 %v10270_v28 }
 0x8ac   : > { %7356 = vmatprep.subr.mxu0 %v8105_v0  ;;  %7399 = vmatprep.subr.mxu1 %v8105_v0 }
 0x8ad   : > { %7357 = vmatpush3.msra.mxu0 %v10273_v58  ;;  %7400 = vmatpush3.msra.mxu1 %v10286_v25  ;;  %v552_v58 = vld [vmem:[#allocation8 + $0x60] sm:$0xff] }
 0x8ae   : > { %7358 = vmatprep.subr.mxu0 %v8105_v0  ;;  %7401 = vmatprep.subr.mxu1 %v8105_v0 }
 0x8af   : > { %7359 = vmatpush3.msra.mxu0 %v10276_v39  ;;  %7402 = vmatpush3.msra.mxu1 %v10319_v45  ;;  %v551_v39 = vld [vmem:[#allocation8 + $0x58] sm:$0xff] }
 0x8b0   : > { %7360 = vmatprep.subr.mxu0 %v8105_v0  ;;  %7403 = vmatprep.subr.mxu1 %v8105_v0 }
 0x8b1   : > { %7361 = vmatpush3.msra.mxu0 %v10280_v55  ;;  %7404 = vmatpush3.msra.mxu1 %v10321_v16  ;;  %v550_v55 = vld [vmem:[#allocation8 + $0x50] sm:$0xff] }
 0x8b2   : > { %7362 = vmatprep.subr.mxu0 %v8105_v0  ;;  %7405 = vmatprep.subr.mxu1 %v8105_v0 }
 0x8b3   : > { %7363 = vmatpush3.msra.mxu0 %v10291_v7  ;;  %7406 = vmatpush3.msra.mxu1 %v10377_v15 }
 0x8b4   : > { %7364 = vmatprep.subr.mxu0 %v8105_v0  ;;  %7407 = vmatprep.subr.mxu1 %v8105_v0 }
 0x8b5   : > { %7365 = vmatpush3.msra.mxu0 %v10311_v61  ;;  %7408 = vmatpush3.msra.mxu1 %v10382_v11 }
 0x8b6   : > { %7366 = vmatprep.subr.mxu0 %v8105_v0  ;;  %7409 = vmatprep.subr.mxu1 %v8105_v0 }
 0x8b7   : > { %7367 = vmatpush3.msra.mxu0 %v10330_v8  ;;  %7410 = vmatpush3.msra.mxu1 %v10390_v22 }
 0x8b8   : > { %7368 = vmatprep.subr.mxu0 %v8105_v0  ;;  %7411 = vmatprep.subr.mxu1 %v8105_v0 }
 0x8b9   : > { %7369 = vmatpush3.msra.mxu0 %v10334_v37  ;;  %7412 = vmatpush3.msra.mxu1 %v10401_v38 }
 0x8ba   : > { %7370 = vmatprep.subr.mxu0 %v8105_v0  ;;  %7413 = vmatprep.subr.mxu1 %v8105_v0 }
 0x8bb   : > { %7371 = vmatpush3.msra.mxu0 %v10380_v17  ;;  %7414 = vmatpush3.msra.mxu1 %v10413_v27 }
 0x8bc   : > { %7372 = vmatprep.subr.mxu0 %v8105_v0  ;;  %7415 = vmatprep.subr.mxu1 %v8105_v0 }
 0x8bd   : > { %7373 = vmatpush3.msra.mxu0 %v10388_v60  ;;  %7416 = vmatpush3.msra.mxu1 %v10420_v9 }
 0x8be   : > { %7374 = vmatprep.subr.mxu0 %v8105_v0  ;;  %7418 = vmatmul.mubr.f32.vlgmr.msra.gmra.mxu1 %v4084_v49 }
 0x8bf   : > { %7455 = vmatprep.subr.mxu1 %v8105_v0  ;;  %7375 = vmatpush3.msra.mxu0 %v10399_v34 }
 0x8c0   : > { %7456 = vmatpush3.msra.mxu1 %v10248_v43  ;;  %7376 = vmatprep.subr.mxu0 %v8105_v0  ;;  %v11165_v43 = vand.u32 4294901760, %v10399_v34  ;;  %v546_v34 = vld [vmem:[#allocation8 + $0x30] sm:$0xff] }
 0x8c1   : > { %7457 = vmatprep.subr.mxu1 %v8105_v0  ;;  %7377 = vmatpush3.msra.mxu0 %v10410_v6  ;;  %v10692_v18 = vand.u32 4294901760, %v546_v34 }
 0x8c2   : > { %7458 = vmatpush3.msra.mxu1 %v10250_v50  ;;  %7378 = vmatprep.subr.mxu0 %v8105_v0  ;;  %v11166_v50 = vand.u32 4294901760, %v10410_v6 }
 0x8c3   : > { %7459 = vmatprep.subr.mxu1 %v8105_v0  ;;  %7379 = vmatpush3.msra.mxu0 %v10424_v3  ;;  %v10705_v21 = vsub.f32 %v546_v34, %v10692_v18 }
 0x8c4   : > { %7460 = vmatpush3.msra.mxu1 %v10252_v24  ;;  %7380 = vmatprep.subr.mxu0 %v8105_v0  ;;  %v11167_v24 = vand.u32 4294901760, %v10424_v3 }
 0x8c5   : > { %7461 = vmatprep.subr.mxu1 %v8105_v0  ;;  %7381 = vmatpush3.msra.mxu0 %v10431_v10  ;;  %v4818_v49 = vand.u32 4294901760, %v10705_v21 }
 0x8c6   : > { %7382 = vmatprep.mubr.msk.f32.mxu0 %vm8106_vm0, %v8105_v0  ;;  %7462 = vmatpush3.msra.mxu1 %v10254_v2  ;;  %v11168_v2 = vand.u32 4294901760, %v10431_v10 }
 0x8c7   : > { %7383 = vmatmul.mubr.f32.vlgmr.msra.gmra.mxu0 %v10456_v63  ;;  %7420 = vmatprep.subr.mxu0 %v8105_v0 }
 0x8c8   : > { %7463 = vmatprep.subr.mxu1 %v8105_v0  ;;  %7421 = vmatpush3.msra.mxu0 %v4095_v29  ;;  %v10625_v29 = vand.u32 4294901760, %v552_v58 }
 0x8c9   : > { %7464 = vmatpush3.msra.mxu1 %v10256_v13  ;;  %7422 = vmatprep.subr.mxu0 %v8105_v0  ;;  %v555_v13 = vld [vmem:[#allocation8 + $0x78] sm:$0xff] }
 0x8ca   : > { %7465 = vmatprep.subr.mxu1 %v8105_v0  ;;  %7423 = vmatpush3.msra.mxu0 %v4102_v14  ;;  %v10619_v59 = vand.u32 4294901760, %v555_v13  ;;  %v10627_v14 = vand.u32 4294901760, %v551_v39 }
 0x8cb   : > { %7466 = vmatpush3.msra.mxu1 %v10258_v31  ;;  %7424 = vmatprep.subr.mxu0 %v8105_v0  ;;  %v554_v31 = vld [vmem:[#allocation8 + $0x70] sm:$0xff] }
 0x8cc   : > { %7467 = vmatprep.subr.mxu1 %v8105_v0  ;;  %7425 = vmatpush3.msra.mxu0 %v4109_v1  ;;  %v10621_v52 = vand.u32 4294901760, %v554_v31  ;;  %v10629_v1 = vand.u32 4294901760, %v550_v55  ;;  %v10632_v7 = vsub.f32 %v555_v13, %v10619_v59 }
 0x8cd   : > { %7468 = vmatpush3.msra.mxu1 %v10270_v28  ;;  %7426 = vmatprep.subr.mxu0 %v8105_v0  ;;  %v10623_v28 = vand.u32 4294901760, %v553_v33 }
 0x8ce   : > { %7469 = vmatprep.subr.mxu1 %v8105_v0  ;;  %7427 = vmatpush3.msra.mxu0 %v4116_v46  ;;  %v548_v46 = vld [vmem:[#allocation8 + $0x40] sm:$0xff] }
 0x8cf   : > { %7470 = vmatpush3.msra.mxu1 %v10286_v25  ;;  %7428 = vmatprep.subr.mxu0 %v8105_v0  ;;  %v549_v25 = vld [vmem:[#allocation8 + $0x48] sm:$0xff] }
 0x8d0   : > { %7471 = vmatprep.subr.mxu1 %v8105_v0  ;;  %7429 = vmatpush3.msra.mxu0 %v4123_v4  ;;  %v10635_v4 = vsub.f32 %v554_v31, %v10621_v52  ;;  %v10641_v61 = vand.u32 4294901760, %v549_v25 }
 0x8d1   : > { %7472 = vmatpush3.msra.mxu1 %v10319_v45  ;;  %7430 = vmatprep.subr.mxu0 %v8105_v0  ;;  %v10647_v45 = vsub.f32 %v551_v39, %v10627_v14 }
 0x8d2   : > { %7473 = vmatprep.subr.mxu1 %v8105_v0  ;;  %7431 = vmatpush3.msra.mxu0 %v4130_v32  ;;  %v10638_v32 = vsub.f32 %v553_v33, %v10623_v28  ;;  %v4762_v8 = vand.u32 4294901760, %v10635_v4 }
 0x8d3   : > { %7474 = vmatpush3.msra.mxu1 %v10321_v16  ;;  %7432 = vmatprep.subr.mxu0 %v8105_v0  ;;  %v10651_v16 = vsub.f32 %v550_v55, %v10629_v1  ;;  %v4783_v60 = vand.u32 4294901760, %v10647_v45 }
 0x8d4   : > { %7475 = vmatprep.subr.mxu1 %v8105_v0  ;;  %7433 = vmatpush3.msra.mxu0 %v4137_v12  ;;  %v10644_v12 = vsub.f32 %v552_v58, %v10625_v29  ;;  %v4769_v37 = vand.u32 4294901760, %v10638_v32 }
 0x8d5   : > { %7476 = vmatpush3.msra.mxu1 %v10377_v15  ;;  %7434 = vmatprep.subr.mxu0 %v8105_v0  ;;  %v10662_v15 = vsub.f32 %v549_v25, %v10641_v61  ;;  %v4784_v3 = vsub.f32 %v10647_v45, %v4783_v60 }
 0x8d6   : > { %7477 = vmatprep.subr.mxu1 %v8105_v0  ;;  %7435 = vmatpush3.msra.mxu0 %v4144_v20  ;;  %v4755_v20 = vand.u32 4294901760, %v10632_v7 }
 0x8d7   : > { %7478 = vmatpush3.msra.mxu1 %v10382_v11  ;;  %7436 = vmatprep.subr.mxu0 %v8105_v0  ;;  %v4763_v11 = vsub.f32 %v10635_v4, %v4762_v8  ;;  %v4797_v5 = vand.u32 4294901760, %v10662_v15  ;;  %v4785_v35 = vand.u32 4294901760, %v4784_v3 }
 0x8d8   : > { %7479 = vmatprep.subr.mxu1 %v8105_v0  ;;  %7437 = vmatpush3.msra.mxu0 %v4151_v53  ;;  %v10657_v53 = vand.u32 4294901760, %v548_v46  ;;  %v4756_v17 = vsub.f32 %v10632_v7, %v4755_v20 }
 0x8d9   : > { %7480 = vmatpush3.msra.mxu1 %v10390_v22  ;;  %7438 = vmatprep.subr.mxu0 %v8105_v0  ;;  %v4790_v22 = vand.u32 4294901760, %v10651_v16  ;;  %v4798_v62 = vsub.f32 %v10662_v15, %v4797_v5 }
 0x8da   : > { %7481 = vmatprep.subr.mxu1 %v8105_v0  ;;  %7439 = vmatpush3.msra.mxu0 %v4158_v42  ;;  %v4776_v42 = vand.u32 4294901760, %v10644_v12 }
 0x8db   : > { %7482 = vmatpush3.msra.mxu1 %v10401_v38  ;;  %7440 = vmatprep.subr.mxu0 %v8105_v0  ;;  %v4757_v38 = vand.u32 4294901760, %v4756_v17  ;;  %v4791_v54 = vsub.f32 %v10651_v16, %v4790_v22  ;;  %v4799_v19 = vand.u32 4294901760, %v4798_v62  ;;  %v4642_v17 = vmul.f32 -0.5, %v8936_v47 }
 0x8dc   : > { %7483 = vmatprep.subr.mxu1 %v8105_v0  ;;  %7441 = vmatpush3.msra.mxu0 %v4165_v57  ;;  %v4770_v57 = vsub.f32 %v10638_v32, %v4769_v37  ;;  %v4777_v6 = vsub.f32 %v10644_v12, %v4776_v42 }
 0x8dd   : > { %7484 = vmatpush3.msra.mxu1 %v10413_v27  ;;  %7442 = vmatprep.subr.mxu0 %v8105_v0  ;;  %v10682_v27 = vsub.f32 %v548_v46, %v10657_v53  ;;  %v4792_v56 = vand.u32 4294901760, %v4791_v54 }
 0x8de   : > { %7485 = vmatprep.subr.mxu1 %v8105_v0  ;;  %7443 = vmatpush3.msra.mxu0 %v4172_v44  ;;  %v547_v44 = vld [vmem:[#allocation8 + $0x38] sm:$0xff]  ;;  %v4778_v51 = vand.u32 4294901760, %v4777_v6 }
 0x8df   : > { %7486 = vmatpush3.msra.mxu1 %v10420_v9  ;;  %7487 = vmatprep.mubr.msk.f32.mxu1 %vm8106_vm0, %v8105_v0  ;;  %v4771_v9 = vand.u32 4294901760, %v4770_v57  ;;  %v10690_v10 = vand.u32 4294901760, %v547_v44  ;;  %v4804_v40 = vand.u32 4294901760, %v10682_v27 }
 0x8e0   : > { %7444 = vmatprep.subr.mxu0 %v8105_v0  ;;  %7488 = vmatmul.mubr.f32.vlgmr.msra.gmra.mxu1 %v10452_v48 }
 0x8e1   : > { %7445 = vmatpush3.msra.mxu0 %v11165_v43  ;;  %7452 = vmatprep.mubr.msk.f32.mxu0 %vm8106_vm0, %v8105_v0  ;;  %v10701_v36 = vsub.f32 %v547_v44, %v10690_v10  ;;  %v4805_v63 = vsub.f32 %v10682_v27, %v4804_v40 }
 0x8e2   : > { %7446 = vmatprep.subr.mxu0 %v8105_v0  ;;  %7525 = vmatprep.subr.mxu1 %v8105_v0 }
 0x8e3   : > { %7447 = vmatpush3.msra.mxu0 %v11166_v50  ;;  %7557 = vmatprep.mubr.msk.f32.mxu1 %vm8106_vm0, %v8105_v0  ;;  %v4811_v41 = vand.u32 4294901760, %v10701_v36  ;;  %v4806_v43 = vand.u32 4294901760, %v4805_v63  ;;  %v4819_v50 = vsub.f32 %v10705_v21, %v4818_v49 }
 0x8e4   : > { %7448 = vmatprep.subr.mxu0 %v8105_v0  ;;  %7526 = vmatpush3.msra.mxu1 %v4757_v38 }
 0x8e5   : > { %7449 = vmatpush3.msra.mxu0 %v11167_v24  ;;  %7527 = vmatprep.subr.mxu1 %v8105_v0  ;;  %v4812_v26 = vsub.f32 %v10701_v36, %v4811_v41 }
 0x8e6   : > { %7450 = vmatprep.subr.mxu0 %v8105_v0 }
 0x8e7   : > { %7451 = vmatpush3.msra.mxu0 %v11168_v2  ;;  %v4813_v24 = vand.u32 4294901760, %v4812_v26  ;;  %v4820_v2 = vand.u32 4294901760, %v4819_v50  ;;  %v545_v26 = vld [vmem:[#allocation8 + $0x28] sm:$0xff] }
 0x8e8   : > { %7453 = vmatmul.mubr.f32.vlgmr.msra.gmra.mxu0 %v10452_v48  ;;  %7490 = vmatprep.subr.mxu0 %v8105_v0  ;;  %v4764_v48 = vand.u32 4294901760, %v4763_v11  ;;  %v4643_v11 = vmul.f32 %v4642_v17, %v8936_v47  ;;  %v10748_v50 = vand.u32 4294901760, %v545_v26 }
 0x8e9   : > { %7522 = vmatprep.mubr.msk.f32.mxu0 %vm8106_vm0, %v8105_v0  ;;  %7491 = vmatpush3.msra.mxu0 %v10619_v59 }
 0x8ea   : > { %7492 = vmatprep.subr.mxu0 %v8105_v0  ;;  %7528 = vmatpush3.msra.mxu1 %v4764_v48  ;;  %v4644_v57 = vmul.f32 1.442695, %v4643_v11  ;;  %v541_v11 = vld [vmem:[#allocation8 + $0x8] sm:$0xff] }
 0x8eb   : > { %7493 = vmatpush3.msra.mxu0 %v10621_v52  ;;  %7529 = vmatprep.subr.mxu1 %v8105_v0 }
 0x8ec   : > { %7494 = vmatprep.subr.mxu0 %v8105_v0  ;;  %7530 = vmatpush3.msra.mxu1 %v4771_v9  ;;  %7829 = vpow2.f32 %v4644_v57 }
 0x8ed   : > { %7495 = vmatpush3.msra.mxu0 %v10623_v28  ;;  %7531 = vmatprep.subr.mxu1 %v8105_v0 }
 0x8ee   : > { %7496 = vmatprep.subr.mxu0 %v8105_v0  ;;  %7532 = vmatpush3.msra.mxu1 %v4778_v51 }
 0x8ef   : > { %7497 = vmatpush3.msra.mxu0 %v10625_v29  ;;  %7533 = vmatprep.subr.mxu1 %v8105_v0 }
 0x8f0   : > { %7498 = vmatprep.subr.mxu0 %v8105_v0  ;;  %7534 = vmatpush3.msra.mxu1 %v4785_v35 }
 0x8f1   : > { %7499 = vmatpush3.msra.mxu0 %v10627_v14  ;;  %7535 = vmatprep.subr.mxu1 %v8105_v0 }
 0x8f2   : > { %7500 = vmatprep.subr.mxu0 %v8105_v0  ;;  %7536 = vmatpush3.msra.mxu1 %v4792_v56 }
 0x8f3   : > { %7501 = vmatpush3.msra.mxu0 %v10629_v1  ;;  %7537 = vmatprep.subr.mxu1 %v8105_v0 }
 0x8f4   : > { %7502 = vmatprep.subr.mxu0 %v8105_v0  ;;  %7538 = vmatpush3.msra.mxu1 %v4799_v19 }
 0x8f5   : > { %7503 = vmatpush3.msra.mxu0 %v10641_v61  ;;  %7539 = vmatprep.subr.mxu1 %v8105_v0 }
 0x8f6   : > { %7504 = vmatprep.subr.mxu0 %v8105_v0  ;;  %7540 = vmatpush3.msra.mxu1 %v4806_v43 }
 0x8f7   : > { %7505 = vmatpush3.msra.mxu0 %v10657_v53  ;;  %7541 = vmatprep.subr.mxu1 %v8105_v0 }
 0x8f8   : > { %7506 = vmatprep.subr.mxu0 %v8105_v0  ;;  %7542 = vmatpush3.msra.mxu1 %v4813_v24  ;;  %v544_v24 = vld [vmem:[#allocation8 + $0x20] sm:$0xff] }
 0x8f9   : > { %7507 = vmatpush3.msra.mxu0 %v10690_v10  ;;  %7543 = vmatprep.subr.mxu1 %v8105_v0  ;;  %v7830_v38 = vpop.eup %7829 }
 0x8fa   : > { %7508 = vmatprep.subr.mxu0 %v8105_v0  ;;  %7544 = vmatpush3.msra.mxu1 %v4820_v2  ;;  %v4646_v9 = vmul.f32 0.3989423, %v7830_v38  ;;  %v10751_v2 = vsub.f32 %v545_v26, %v10748_v50 }
 0x8fb   : > { %7509 = vmatpush3.msra.mxu0 %v10692_v18  ;;  %7545 = vmatprep.subr.mxu1 %v8105_v0 }
 0x8fc   : > { %7510 = vmatprep.subr.mxu0 %v8105_v0  ;;  %v4647_v35 = vmul.f32 %v4646_v9, %v8936_v47 }
 0x8fd   : > { %7511 = vmatpush3.msra.mxu0 %v10748_v50 }
 0x8fe   : > { %v4648_v63 = vadd.f32 %v4647_v35, %v8940_v23  ;;  %v543_v23 = vld [vmem:[#allocation8 + $0x18] sm:$0xff]  ;;  %7512 = vmatprep.subr.mxu0 %v8105_v0 }
 0x95e   : > { %v4239_v13 = vpop.f32.mrf.mxu1 }
 0x960   : > { %v7349_v31 = vpop.f32.mrf.mxu1 }
 0x961   : > { %v4825_v31 = vand.u32 4294901760, %v10751_v2 }
 0x966   : > { %v4088_v33 = vpop.f32.mrf.mxu0 }
 0x967   : > { %v4240_v34 = vadd.f32 %v4239_v13, %v4088_v33  ;;  %v10753_v13 = vand.u32 4294901760, %v544_v24 }
 0x968   : > { %v7314_v58 = vpop.f32.mrf.mxu0 }
 0x969   : > { %v10759_v33 = vsub.f32 %v544_v24, %v10753_v13  ;;  %v10761_v58 = vand.u32 4294901760, %v543_v23  ;;  %7513 = vmatpush3.msra.mxu0 %v10753_v13 }
 0x96a   : > { %7514 = vmatprep.subr.mxu0 %v8105_v0 }
 0x96b   : > { %7515 = vmatpush3.msra.mxu0 %v10761_v58 }
 0x96c   : > { %7516 = vmatprep.subr.mxu0 %v8105_v0 }
 0x97e   : > { %v4432_v39 = vpop.f32.mrf.mxu1 }
 0x980   : > { %v7419_v55 = vpop.f32.mrf.mxu1 }
 0x981   : > { %v4826_v55 = vsub.f32 %v10751_v2, %v4825_v31 }
 0x983   : > { %v4827_v57 = vand.u32 4294901760, %v4826_v55 }
 0x985   : > { %7546 = vmatpush3.msra.mxu1 %v4827_v57 }
 0x986   : > { %7547 = vmatprep.subr.mxu1 %v8105_v0 }
 0x987   : > { %v4343_v25 = vpop.f32.mrf.mxu0 }
 0x988   : > { %v4344_v6 = vadd.f32 %v4343_v25, %v4240_v34  ;;  %v4832_v25 = vand.u32 4294901760, %v10759_v33 }
 0x989   : > { %v7384_v46 = vpop.f32.mrf.mxu0 }
 0x98a   : > { %v4433_v3 = vadd.f32 %v4432_v39, %v4344_v6  ;;  %v542_v39 = vld [vmem:[#allocation8 + $0x10] sm:$0xff]  ;;  %v10770_v46 = vsub.f32 %v543_v23, %v10761_v58  ;;  %v540_v6 = vld [vmem:[#allocation8] sm:$0xff] }
 0x98b   : > { %v10772_v17 = vand.u32 4294901760, %v542_v39 }
 0x98c   : > { %v4839_v34 = vand.u32 4294901760, %v10770_v46 }
 0x98d   : > { %v10781_v38 = vsub.f32 %v542_v39, %v10772_v17  ;;  %7517 = vmatpush3.msra.mxu0 %v10772_v17 }
 0x98e   : > { %7518 = vmatprep.subr.mxu0 %v8105_v0 }
 0x9a0   : > { %v4638_v44 = vpop.f32.mrf.mxu1 }
 0x9a2   : > { %v7489_v48 = vpop.f32.mrf.mxu1 }
 0x9a3   : > { %v10784_v48 = vand.u32 4294901760, %v541_v11 }
 0x9a5   : > { %v10795_v35 = vsub.f32 %v541_v11, %v10784_v48  ;;  %7519 = vmatpush3.msra.mxu0 %v10784_v48 }
 0x9a6   : > { %7520 = vmatprep.subr.mxu0 %v8105_v0 }
 0x9a7   : > { %v4853_v26 = vand.u32 4294901760, %v10795_v35 }
 0x9a8   : > { %v4551_v54 = vpop.f32.mrf.mxu0 }
 0x9a9   : > { %v4552_v51 = vadd.f32 %v4551_v54, %v4433_v3  ;;  %v4840_v3 = vsub.f32 %v10770_v46, %v4839_v34  ;;  %v4846_v54 = vand.u32 4294901760, %v10781_v38  ;;  %v4854_v23 = vsub.f32 %v10795_v35, %v4853_v26 }
 0x9aa   : > { %v7454_v62 = vpop.f32.mrf.mxu0 }
 0x9ab   : > { %v4639_v56 = vadd.f32 %v4638_v44, %v4552_v51  ;;  %v4833_v44 = vsub.f32 %v10759_v33, %v4832_v25  ;;  %v10791_v51 = vand.u32 4294901760, %v540_v6  ;;  %v4841_v62 = vand.u32 4294901760, %v4840_v3 }
 0x9ac   : > { %v4855_v55 = vand.u32 4294901760, %v4854_v23 }
 0x9ad   : > { %v10743_v19 = vmul.f32 %v4648_v63, %v4639_v56  ;;  %v4834_v9 = vand.u32 4294901760, %v4833_v44  ;;  %v4847_v56 = vsub.f32 %v10781_v38, %v4846_v54  ;;  %v10802_v63 = vsub.f32 %v540_v6, %v10791_v51  ;;  %7521 = vmatpush3.msra.mxu0 %v10791_v51 }
 0x9ae   : > { %7560 = vmatprep.subr.mxu0 %v8105_v0 }
 0x9af   : > { %4650 = vadd.xlane.f32.xlu0 %v10743_v19  ;;  %v4653_v43 = vmul.f32 %v10743_v19, %v8936_v47  ;;  %7548 = vmatpush3.msra.mxu1 %v4834_v9  ;;  %v11100_v24 = vand.u32 4294901760, %v10802_v63 }
 0x9b0   : > { %7549 = vmatprep.subr.mxu1 %v8105_v0 }
 0x9b1   : > { %4654 = vadd.xlane.f32.xlu1 %v4653_v43  ;;  %7550 = vmatpush3.msra.mxu1 %v4841_v62  ;;  %v4848_v43 = vand.u32 4294901760, %v4847_v56  ;;  %v4861_v39 = vsub.f32 %v10802_v63, %v11100_v24 }
 0x9b2   : > { %7551 = vmatprep.subr.mxu1 %v8105_v0 }
 0x9b3   : > { %7552 = vmatpush3.msra.mxu1 %v4848_v43  ;;  %v4862_v11 = vand.u32 4294901760, %v4861_v39 }
 0x9b4   : > { %7553 = vmatprep.subr.mxu1 %v8105_v0 }
 0x9b5   : > { %7554 = vmatpush3.msra.mxu1 %v4855_v55 }
 0x9b6   : > { %7555 = vmatprep.subr.mxu1 %v8105_v0 }
 0x9b7   : > { %7556 = vmatpush3.msra.mxu1 %v4862_v11 }
 0x9b8   : > { %7595 = vmatprep.subr.mxu1 %v8105_v0 }
 0xa38   : > { %v4651_v57 = vpop.xlane.xlu0 %4650 }
 0xa39   : > { %v4652_v44 = vmul.f32 0.03125, %v4651_v57 }
 0xa3a   : > { %v4655_v6 = vpop.xlane.xlu1 %4654 }
 0xa3b   : > { %v4656_v9 = vmul.f32 0.03125, %v4655_v6  ;;  %v4657_v3 = vsub.f32 %v10743_v19, %v4652_v44 }
 0xa3d   : > { %v4658_v62 = vmul.f32 %v4656_v9, %v8936_v47 }
 0xa3f   : > { %v4659_v56 = vsub.f32 %v4657_v3, %v4658_v62 }
 0xa41   : > { %v4660_v43 = vmul.f32 %v8933_v30, %v4659_v56 }
 0xa43   : > { %v10823_v24 = vand.u32 4294901760, %v4660_v43 }
 0xa45   : > { %7558 = vmatmul.mubr.f32.vlgmr.msra.gmra.mxu1 %v10823_v24  ;;  %v10827_v23 = vsub.f32 %v4660_v43, %v10823_v24 }
 0xa46   : > { %7596 = vmatpush3.msra.mxu1 %v10619_v59  ;;  %7627 = vmatprep.mubr.msk.f32.mxu1 %vm8106_vm0, %v8105_v0 }
 0xa47   : > { %7597 = vmatprep.subr.mxu1 %v8105_v0  ;;  %v4744_v19 = vand.u32 4294901760, %v10827_v23 }
 0xa48   : > { %7598 = vmatpush3.msra.mxu1 %v10621_v52 }
 0xa49   : > { %7599 = vmatprep.subr.mxu1 %v8105_v0  ;;  %v4745_v30 = vsub.f32 %v10827_v23, %v4744_v19 }
 0xa4a   : > { %7600 = vmatpush3.msra.mxu1 %v10623_v28 }
 0xa4b   : > { %7601 = vmatprep.subr.mxu1 %v8105_v0  ;;  %v4746_v47 = vand.u32 4294901760, %v4745_v30 }
 0xa4c   : > { %7602 = vmatpush3.msra.mxu1 %v10625_v29 }
 0xa4d   : > { %7603 = vmatprep.subr.mxu1 %v8105_v0  ;;  %7523 = vmatmul.mubr.f32.vlgmr.msra.gmra.mxu0 %v4746_v47 }
 0xa4e   : > { %7561 = vmatpush3.msra.mxu0 %v10632_v7  ;;  %7604 = vmatpush3.msra.mxu1 %v10627_v14 }
 0xa4f   : > { %7562 = vmatprep.subr.mxu0 %v8105_v0  ;;  %7605 = vmatprep.subr.mxu1 %v8105_v0 }
 0xa50   : > { %7563 = vmatpush3.msra.mxu0 %v10635_v4  ;;  %7606 = vmatpush3.msra.mxu1 %v10629_v1 }
 0xa51   : > { %7564 = vmatprep.subr.mxu0 %v8105_v0  ;;  %7607 = vmatprep.subr.mxu1 %v8105_v0 }
 0xa52   : > { %7565 = vmatpush3.msra.mxu0 %v10638_v32  ;;  %7608 = vmatpush3.msra.mxu1 %v10641_v61 }
 0xa53   : > { %7566 = vmatprep.subr.mxu0 %v8105_v0  ;;  %7609 = vmatprep.subr.mxu1 %v8105_v0 }
 0xa54   : > { %7567 = vmatpush3.msra.mxu0 %v10644_v12  ;;  %7610 = vmatpush3.msra.mxu1 %v10657_v53 }
 0xa55   : > { %7568 = vmatprep.subr.mxu0 %v8105_v0  ;;  %7611 = vmatprep.subr.mxu1 %v8105_v0 }
 0xa56   : > { %7569 = vmatpush3.msra.mxu0 %v10647_v45  ;;  %7612 = vmatpush3.msra.mxu1 %v10690_v10 }
 0xa57   : > { %7570 = vmatprep.subr.mxu0 %v8105_v0  ;;  %7613 = vmatprep.subr.mxu1 %v8105_v0 }
 0xa58   : > { %7571 = vmatpush3.msra.mxu0 %v10651_v16  ;;  %7614 = vmatpush3.msra.mxu1 %v10692_v18 }
 0xa59   : > { %7572 = vmatprep.subr.mxu0 %v8105_v0  ;;  %7615 = vmatprep.subr.mxu1 %v8105_v0 }
 0xa5a   : > { %7573 = vmatpush3.msra.mxu0 %v10662_v15  ;;  %7616 = vmatpush3.msra.mxu1 %v10748_v50 }
 0xa5b   : > { %7574 = vmatprep.subr.mxu0 %v8105_v0  ;;  %7617 = vmatprep.subr.mxu1 %v8105_v0 }
 0xa5c   : > { %7575 = vmatpush3.msra.mxu0 %v10682_v27  ;;  %7618 = vmatpush3.msra.mxu1 %v10753_v13 }
 0xa5d   : > { %7576 = vmatprep.subr.mxu0 %v8105_v0  ;;  %7619 = vmatprep.subr.mxu1 %v8105_v0 }
 0xa5e   : > { %7577 = vmatpush3.msra.mxu0 %v10701_v36  ;;  %7620 = vmatpush3.msra.mxu1 %v10761_v58 }
 0xa5f   : > { %7578 = vmatprep.subr.mxu0 %v8105_v0  ;;  %7621 = vmatprep.subr.mxu1 %v8105_v0 }
 0xa60   : > { %7579 = vmatpush3.msra.mxu0 %v10705_v21  ;;  %7622 = vmatpush3.msra.mxu1 %v10772_v17 }
 0xa61   : > { %7580 = vmatprep.subr.mxu0 %v8105_v0  ;;  %7623 = vmatprep.subr.mxu1 %v8105_v0 }
 0xa62   : > { %7581 = vmatpush3.msra.mxu0 %v10751_v2  ;;  %7624 = vmatpush3.msra.mxu1 %v10784_v48 }
 0xa63   : > { %7582 = vmatprep.subr.mxu0 %v8105_v0  ;;  %7625 = vmatprep.subr.mxu1 %v8105_v0 }
 0xa64   : > { %7583 = vmatpush3.msra.mxu0 %v10759_v33  ;;  %7626 = vmatpush3.msra.mxu1 %v10791_v51 }
 0xa65   : > { %7584 = vmatprep.subr.mxu0 %v8105_v0  ;;  %7628 = vmatmul.mubr.f32.vlgmr.msra.gmra.mxu1 %v4744_v19 }
 0xa66   : > { %7665 = vmatprep.subr.mxu1 %v8105_v0  ;;  %7585 = vmatpush3.msra.mxu0 %v10770_v46 }
 0xa67   : > { %7666 = vmatpush3.msra.mxu1 %v10619_v59  ;;  %7586 = vmatprep.subr.mxu0 %v8105_v0  ;;  %v11169_v59 = vand.u32 4294901760, %v10802_v63 }
 0xa68   : > { %7667 = vmatprep.subr.mxu1 %v8105_v0  ;;  %7587 = vmatpush3.msra.mxu0 %v10781_v38 }
 0xa69   : > { %7668 = vmatpush3.msra.mxu1 %v10621_v52  ;;  %7588 = vmatprep.subr.mxu0 %v8105_v0 }
 0xa6a   : > { %7669 = vmatprep.subr.mxu1 %v8105_v0  ;;  %7589 = vmatpush3.msra.mxu0 %v10795_v35 }
 0xa6b   : > { %7670 = vmatpush3.msra.mxu1 %v10623_v28  ;;  %7590 = vmatprep.subr.mxu0 %v8105_v0 }
 0xa6c   : > { %7671 = vmatprep.subr.mxu1 %v8105_v0  ;;  %7591 = vmatpush3.msra.mxu0 %v10802_v63 }
 0xa6d   : > { %7592 = vmatprep.mubr.msk.f32.mxu0 %vm8106_vm0, %v8105_v0  ;;  %7672 = vmatpush3.msra.mxu1 %v10625_v29 }
 0xa6e   : > { %7593 = vmatmul.mubr.f32.vlgmr.msra.gmra.mxu0 %v10827_v23  ;;  %7630 = vmatprep.subr.mxu0 %v8105_v0 }
 0xa6f   : > { %7673 = vmatprep.subr.mxu1 %v8105_v0  ;;  %7631 = vmatpush3.msra.mxu0 %v4755_v20 }
 0xa70   : > { %7674 = vmatpush3.msra.mxu1 %v10627_v14  ;;  %7632 = vmatprep.subr.mxu0 %v8105_v0 }
 0xa71   : > { %7675 = vmatprep.subr.mxu1 %v8105_v0  ;;  %7633 = vmatpush3.msra.mxu0 %v4762_v8 }
 0xa72   : > { %7676 = vmatpush3.msra.mxu1 %v10629_v1  ;;  %7634 = vmatprep.subr.mxu0 %v8105_v0 }
 0xa73   : > { %7677 = vmatprep.subr.mxu1 %v8105_v0  ;;  %7635 = vmatpush3.msra.mxu0 %v4769_v37 }
 0xa74   : > { %7678 = vmatpush3.msra.mxu1 %v10641_v61  ;;  %7636 = vmatprep.subr.mxu0 %v8105_v0 }
 0xa75   : > { %7679 = vmatprep.subr.mxu1 %v8105_v0  ;;  %7637 = vmatpush3.msra.mxu0 %v4776_v42 }
 0xa76   : > { %7680 = vmatpush3.msra.mxu1 %v10657_v53  ;;  %7638 = vmatprep.subr.mxu0 %v8105_v0 }
 0xa77   : > { %7681 = vmatprep.subr.mxu1 %v8105_v0  ;;  %7639 = vmatpush3.msra.mxu0 %v4783_v60 }
 0xa78   : > { %7682 = vmatpush3.msra.mxu1 %v10690_v10  ;;  %7640 = vmatprep.subr.mxu0 %v8105_v0 }
 0xa79   : > { %7683 = vmatprep.subr.mxu1 %v8105_v0  ;;  %7641 = vmatpush3.msra.mxu0 %v4790_v22 }
 0xa7a   : > { %7684 = vmatpush3.msra.mxu1 %v10692_v18  ;;  %7642 = vmatprep.subr.mxu0 %v8105_v0 }
 0xa7b   : > { %7685 = vmatprep.subr.mxu1 %v8105_v0  ;;  %7643 = vmatpush3.msra.mxu0 %v4797_v5 }
 0xa7c   : > { %7686 = vmatpush3.msra.mxu1 %v10748_v50  ;;  %7644 = vmatprep.subr.mxu0 %v8105_v0 }
 0xa7d   : > { %7687 = vmatprep.subr.mxu1 %v8105_v0  ;;  %7645 = vmatpush3.msra.mxu0 %v4804_v40 }
 0xa7e   : > { %7688 = vmatpush3.msra.mxu1 %v10753_v13  ;;  %7646 = vmatprep.subr.mxu0 %v8105_v0 }
 0xa7f   : > { %7689 = vmatprep.subr.mxu1 %v8105_v0  ;;  %7647 = vmatpush3.msra.mxu0 %v4811_v41 }
 0xa80   : > { %7690 = vmatpush3.msra.mxu1 %v10761_v58  ;;  %7648 = vmatprep.subr.mxu0 %v8105_v0 }
 0xa81   : > { %7691 = vmatprep.subr.mxu1 %v8105_v0  ;;  %7649 = vmatpush3.msra.mxu0 %v4818_v49 }
 0xa82   : > { %7692 = vmatpush3.msra.mxu1 %v10772_v17  ;;  %7650 = vmatprep.subr.mxu0 %v8105_v0 }
 0xa83   : > { %7693 = vmatprep.subr.mxu1 %v8105_v0  ;;  %7651 = vmatpush3.msra.mxu0 %v4825_v31 }
 0xa84   : > { %7694 = vmatpush3.msra.mxu1 %v10784_v48  ;;  %7652 = vmatprep.subr.mxu0 %v8105_v0 }
 0xa85   : > { %7695 = vmatprep.subr.mxu1 %v8105_v0  ;;  %7653 = vmatpush3.msra.mxu0 %v4832_v25 }
 0xa86   : > { %7696 = vmatpush3.msra.mxu1 %v10791_v51  ;;  %7697 = vmatprep.mubr.msk.f32.mxu1 %vm8106_vm0, %v8105_v0 }
 0xa87   : > { %7654 = vmatprep.subr.mxu0 %v8105_v0  ;;  %7698 = vmatmul.mubr.f32.vlgmr.msra.gmra.mxu1 %v10823_v24 }
 0xa88   : > { %7655 = vmatpush3.msra.mxu0 %v4839_v34  ;;  %7662 = vmatprep.mubr.msk.f32.mxu0 %vm8106_vm0, %v8105_v0 }
 0xa89   : > { %7656 = vmatprep.subr.mxu0 %v8105_v0 }
 0xa8a   : > { %7657 = vmatpush3.msra.mxu0 %v4846_v54 }
 0xa8b   : > { %7658 = vmatprep.subr.mxu0 %v8105_v0 }
 0xa8c   : > { %7659 = vmatpush3.msra.mxu0 %v4853_v26 }
 0xa8d   : > { %7660 = vmatprep.subr.mxu0 %v8105_v0 }
 0xa8e   : > { %7661 = vmatpush3.msra.mxu0 %v11169_v59 }
 0xa8f   : > { %7663 = vmatmul.mubr.f32.vlgmr.msra.gmra.mxu0 %v10823_v24 }
 0xa90   : > { %8002 = shalt.err (!%p7999_p1)
}
 0xa91   : > { %s8003_s15 = scalar_lea.hbm %s5333_s1, 128  ;;  %s8007_s21 = scalar_lea.hbm %s11053_s11, 256 }
 0xa92   : > { %p8004_p3 = scmp.ne.s32.totalorder %s5333_s1, %s8003_s15  ;;  %p8008_p6 = scmp.lt.s32.totalorder %s5333_s1, %s11053_s11 }
 0xa93   : > { %p8009_p2 = scmp.lt.s32.totalorder %s8007_s21, %s8003_s15 }
 0xa94   : > { %p8005_p4 = pnand %p8004_p3, %p11170_p11 }
 0xa95   : > { %p8010_p7 = por %p8009_p2, %p8008_p6 }
 0xa96   : > { %p8006_p12 = pneg %p8005_p4 }
 0xa98   : > { %p8011_p8 = pnand %p8010_p7, %p8006_p12 }
 0xa9a   : > { %8014 = shalt.err (!%p8011_p8)
}
 0xa9b   : > { %7723 = dma.vmem_to_hbm [thread:$0]  (%p11170_p11), %s5336_s3, 128, %s5333_s1, %s5309_s24  }
 0xa9c   : > { %s478_s29 = scalar_lea.vmem [#allocation13], %s8341_s6  ;;  %s5320_s24 = scalar_lea.hbm %s11052_s10, %s5512_s14 }
 0xa9d   : > { %s5322_s16 = sshll.u32 %s478_s29, 4  ;;  %s5304_s27 = scalar_lea.sflag [#allocation4], %s8338_s5  ;;  %s5323_s16 = int_to_ptr.vmem [resolvable:$true] %s5322_s16 }
 0xa9e   : > { %s8015_s12 = scalar_lea.vmem %s5323_s16, 128  ;;  %s8109_s15 = smov [#allocation13]  }
 0xa9f   : > { %p8016_p0 = scmp.ne.s32.totalorder %s5323_s16, %s8015_s12  ;;  %s8019_s26 = sshll.u32 %s8109_s15, 4  ;;  %s8020_s26 = int_to_ptr.vmem [resolvable:$false] %s8019_s26 }
 0xaa0   : > { %s8021_s6 = scalar_lea.vmem %s8020_s26, 256  ;;  %p8022_p9 = scmp.lt.s32.totalorder %s5323_s16, %s8020_s26 }
 0xaa1   : > { %p8017_p13 = pnand %p8016_p0, %p11170_p11  ;;  %p8023_p10 = scmp.lt.s32.totalorder %s8021_s6, %s8015_s12 }
 0xaa3   : > { %p8018_p5 = pneg %p8017_p13  ;;  %p8024_p1 = por %p8023_p10, %p8022_p9 }
 0xaa5   : > { %p8025_p3 = pnand %p8024_p1, %p8018_p5 }
 0xb05   : > { %v4899_v0 = vpop.f32.mrf.mxu1 }
 0xb07   : > { %v7559_v52 = vpop.f32.mrf.mxu1 }
 0xb0d   : > { %v4748_v28 = vpop.f32.mrf.mxu0 }
 0xb0e   : > { %v4900_v61 = vadd.f32 %v4899_v0, %v4748_v28 }
 0xb0f   : > { %v7524_v29 = vpop.f32.mrf.mxu0 }
 0xb25   : > { %v5092_v14 = vpop.f32.mrf.mxu1 }
 0xb27   : > { %v7629_v1 = vpop.f32.mrf.mxu1 }
 0xb2e   : > { %v5003_v7 = vpop.f32.mrf.mxu0 }
 0xb2f   : > { %v5004_v45 = vadd.f32 %v5003_v7, %v4900_v61 }
 0xb30   : > { %v7594_v4 = vpop.f32.mrf.mxu0 }
 0xb31   : > { %v5093_v16 = vadd.f32 %v5092_v14, %v5004_v45 }
 0xb47   : > { %v5298_v32 = vpop.f32.mrf.mxu1 }
 0xb49   : > { %v7699_v12 = vpop.f32.mrf.mxu1 }
 0xb4f   : > { %v5211_v20 = vpop.f32.mrf.mxu0 }
 0xb50   : > { %v5212_v8 = vadd.f32 %v5211_v20, %v5093_v16 }
 0xb51   : > { %v7664_v37 = vpop.f32.mrf.mxu0 }
 0xb52   : > { %v5299_v53 = vadd.f32 %v5298_v32, %v5212_v8 }
 0xb54   : > { %5302 = vst [vmem:[%s478_s29] sm:$0xff] %v5299_v53 }
 0xb55   : > { %8028 = shalt.err (!%p8025_p3)
}
 0xb56   : > { %s8029_s23 = scalar_lea.hbm %s5320_s24, 128  ;;  %s8033_s22 = scalar_lea.hbm %s11052_s10, 256 }
 0xb57   : > { %p8030_p4 = scmp.ne.s32.totalorder %s5320_s24, %s8029_s23  ;;  %p8034_p2 = scmp.lt.s32.totalorder %s5320_s24, %s11052_s10 }
 0xb58   : > { %p8035_p7 = scmp.lt.s32.totalorder %s8033_s22, %s8029_s23 }
 0xb59   : > { %p8031_p12 = pnand %p8030_p4, %p11170_p11 }
 0xb5a   : > { %p8036_p8 = por %p8035_p7, %p8034_p2 }
 0xb5b   : > { %p8032_p6 = pneg %p8031_p12 }
 0xb5d   : > { %p8037_p0 = pnand %p8036_p8, %p8032_p6 }
 0xb5f   : > { %8040 = shalt.err (!%p8037_p0)
}
 0xb60   : > { %7722 = dma.vmem_to_hbm [thread:$0]  (%p11170_p11), %s5323_s16, 128, %s5320_s24, %s5304_s27  }
 0xb61 PF: > { %s5347_s28 = sand.u32 1, %s8083_s17   ;;  %p11171_p13 = scmp.ne.s32.totalorder %s11117_s25, 0 }
 0xb62   : > { %p11172_p5 = scmp.ge.s32.totalorder %s8095_s20, 2  ;;  %s5348_s29 = scalar_lea.sflag [#allocation4], %s5347_s28 }
 0xb64   : > { %p7747_p9 = pnand %p11172_p5, %p11171_p13 }
 0xb66   : > { %p7748_p10 = pneg %p7747_p9 }
 0xb68   : > { %8074 = dma.done.wait (%p7748_p10), %s5348_s29, 128  }
 0xb69   : > { %8076 = vsyncadd (%p7748_p10), %s5348_s29, 4294967168  ;;  %s5357_s1 = scalar_lea.sflag [#allocation15], %s5347_s28 }
 0xb6a   : > { %8078 = dma.done.wait (%p7748_p10), %s5357_s1, 128  }
 0xb6b   : > { %8080 = vsyncadd (%p7748_p10), %s5357_s1, 4294967168  ;;  %s11173_s13 = sld [smem:[#allocation22_spill]]  ;;  %p31_p11 = scmp.ge.s32.totalorder %s8281_s30, 4  }
 0xb6c   : > { %s11174_s17 = smov %s8087_s18  ;;  %s11175_s18 = smov %s8091_s19 }
 0xb6d   : > { %s11177_s20 = smov %s8281_s30  ;;  %33 = sbr.rel (!%p31_p11) target bundleno = 16 (0x10), region = 145 }
 0xb71   : > { %s11176_s19 = smov %s11173_s13 }
 0xb72   :  { %5362 = vsyncpa [#allocation3], 1 }
 0xb73   :  { %5364 = vsyncpa [#allocation3 + $0x1], 1 }
 0xb74   :  { %5365 = vsyncpa [#allocation6], 1 }
 0xb75   :  { %5366 = vsyncpa [#allocation9], 1 }
 0xb76   :  { %5367 = vsyncpa [#allocation12], 1 }
 0xb77   :  { %5368 = vsyncpa [#allocation4], 1 }
 0xb78   :  { %5370 = vsyncpa [#allocation4 + $0x1], 1 }
 0xb79   :  { %5371 = vsyncpa [#allocation15], 1 }
 0xb7a   :  { %5373 = vsyncpa [#allocation15 + $0x1], 1 }

</bundles_post_ra>
